<compile_context>
chip_gen: v5e
topology: v5e:2x2
jax: 0.10.0
libtpu: 0.0.40
codegen_flags: <defaults>
</compile_context>

<pallas_src>
import functools

import jax
import jax.numpy as jnp
from jax import lax
from jax.experimental import pallas as pl
from jax.experimental.pallas import tpu as pltpu


def _round_up(x, m):
    return (x + m - 1) // m * m


def _local_eq_kernel(feat_ref, npts_ref, wm_ref, out_ref, x_ref, *,
                     n_real_points, c_slot):
    # feat_ref: (C, Pp, T) f32   -- voxels on the lane axis
    # npts_ref: (1, T)    i32
    # wm_ref:   (F, K)    f32    -- folded [node | bias | pad | edge] weight
    # out_ref:  (F, T)    f32
    # x_ref:    (K, T)    f32    -- VMEM scratch, matmul RHS rebuilt per point
    feats = feat_ref[...]
    C, Pp, T = feats.shape
    npts = npts_ref[...]                                     # (1, T)

    # get_paddings_indicator: (q < num_points), voxel index on lanes -> no relayout.
    q_iota = lax.broadcasted_iota(jnp.int32, (Pp, T), 0)
    mask = (q_iota < npts).astype(jnp.float32)               # (Pp, T)

    coords = feats[:3]                                       # (3, Pp, T)
    node = feats * mask[None, :, :]                          # node_features *= node_mask

    # Constant rows of the RHS: bias row (all ones) + 8-alignment zero padding.
    x_ref[C:C + 1, :] = jnp.ones((1, T), jnp.float32)
    if c_slot > C + 1:
        x_ref[C + 1:c_slot, :] = jnp.zeros((c_slot - C - 1, T), jnp.float32)

    acc = None
    # Only the real point rows [0, P) exist in the PyTorch module; wrapper-side padded
    # rows [P, Pp) are never computed, so they never enter the max.
    for p in range(n_real_points):
        # cdist row p: |coords[:, p] - coords[:, q]|_2 for all q.  Sublane slice +
        # stride-0 sublane broadcast only (no lane relayout).  Masked along q only,
        # exactly like `edge_features *= mask.unsqueeze(1)`.
        diff = coords - coords[:, p:p + 1, :]                # (3, Pp, T)
        d2 = diff[0] * diff[0] + diff[1] * diff[1] + diff[2] * diff[2]
        dist = jnp.sqrt(d2) * mask                           # (Pp, T)

        # Assemble the fused RHS for point p and do ONE K=32 f32 MXU dot
        # (bias folded in via the all-ones row).
        x_ref[0:C, :] = node[:, p, :]
        x_ref[c_slot:c_slot + Pp, :] = dist
        y = jnp.dot(wm_ref[...], x_ref[...],
                    preferred_element_type=jnp.float32)      # (F, T)
        y = jnp.maximum(y, 0.0)                              # ReLU

        acc = y if acc is None else jnp.maximum(acc, y)      # running max over points

    out_ref[...] = acc                                       # lane-dense (F, T) store


def local_eq_feature_extraction(features, num_points, weight, gamma, beta,
                                running_mean, running_var, *, eps=1e-3, tile=256):
    """features: (N, P, C) float; num_points: (N,) int; weight: (F, C+P) (PyTorch layout).

    tile = voxels per grid step (lane axis).  256 is v7x-safe; 384-512 is fine on v5e/v6e.
    """
    N, P, C = features.shape
    F, Din = weight.shape
    assert Din == C + P, "PFN in_channels must equal C + max_num_points"
    assert C >= 3

    Pp = _round_up(P, 8)               # point axis -> sublane friendly
    c_slot = _round_up(C + 1, 8)       # node channels + bias row, 8-aligned offset
    K = c_slot + Pp                    # merged contraction length (32 for C=4, P=20)
    Fp = _round_up(F, 8)               # output rows live on sublanes

    tile = max(128, min(tile, _round_up(N, 128)))
    N_pad = _round_up(N, tile)

    # Host-side transpose + padding: voxel axis minor.  Padded voxels/points are inert
    # (num_points = 0 -> fully masked) and sliced off below.
    feats_t = jnp.zeros((C, Pp, N_pad), jnp.float32)
    feats_t = feats_t.at[:, :P, :N].set(
        jnp.transpose(features.astype(jnp.float32), (2, 1, 0)))
    npts = jnp.zeros((1, N_pad), jnp.int32).at[0, :N].set(num_points.astype(jnp.int32))

    # Fold eval-mode BatchNorm1d into the linear layer:  y = x @ W'^T + b'.
    scale = gamma.astype(jnp.float32) * lax.rsqrt(running_var.astype(jnp.float32) + eps)
    w_fold = weight.astype(jnp.float32) * scale[:, None]          # (F, Din)
    b_fold = beta.astype(jnp.float32) - running_mean.astype(jnp.float32) * scale

    # Merged weight: [node cols | bias col | zero pad | edge cols (zero for padded q)].
    wm = jnp.zeros((Fp, K), jnp.float32)
    wm = wm.at[:F, :C].set(w_fold[:, :C])
    wm = wm.at[:F, C].set(b_fold)
    wm = wm.at[:F, c_slot:c_slot + P].set(w_fold[:, C:])

    kernel = functools.partial(_local_eq_kernel, n_real_points=P, c_slot=c_slot)

    out = pl.pallas_call(
        kernel,
        out_shape=jax.ShapeDtypeStruct((Fp, N_pad), jnp.float32),
        grid=(N_pad // tile,),
        in_specs=[
            pl.BlockSpec((C, Pp, tile), lambda i: (0, 0, i)),    # features (C, Pp, N_pad)
            pl.BlockSpec((1, tile), lambda i: (0, i)),           # num_points (1, N_pad)
            pl.BlockSpec((Fp, K), lambda i: (0, 0)),             # merged folded weight
        ],
        out_specs=pl.BlockSpec((Fp, tile), lambda i: (0, i)),
        scratch_shapes=[pltpu.VMEM((K, tile), jnp.float32)],
        compiler_params=pltpu.CompilerParams(
            dimension_semantics=("parallel",)),
    )(feats_t, npts, wm)

    return out[:F, :N].T                                          # (N, F)


def _reference(features, num_points, weight, gamma, beta, mean, var, eps=1e-3):
    """Pure-JAX re-statement of the PyTorch forward (for a sanity check)."""
    N, P, C = features.shape
    coords = features[:, :, :3]
    mask = (jnp.arange(P)[None, :] < num_points[:, None]).astype(jnp.float32)
    node = features * mask[:, :, None]
    diff = coords[:, :, None, :] - coords[:, None, :, :]
    edge = jnp.sqrt(jnp.sum(diff * diff, axis=-1)) * mask[:, None, :]
    x = jnp.concatenate([node, edge], axis=-1)
    y = jnp.einsum('npd,fd->npf', x, weight, precision=lax.Precision.HIGHEST)
    y = (y - mean) / jnp.sqrt(var + eps) * gamma + beta
    y = jnp.maximum(y, 0.0)
    return jnp.max(y, axis=1)


if __name__ == "__main__":
    # Module-consistent small shapes: 30 voxels (not a tile multiple, exercises padding),
    # max_num_points=20, raw point dim 4, one PFN layer of 64 features.
    N, P, C, F = 30, 20, 4, 64
    Din = C + P                      # in_channels + max_num_points = 24

    key = jax.random.PRNGKey(0)
    k1, k2, k3, k4, k5, k6 = jax.random.split(key, 6)

    features = jax.random.normal(k1, (N, P, C), dtype=jnp.float32)
    num_points = jax.random.randint(k2, (N,), 1, P + 1, dtype=jnp.int32)

    # Synthetic parameters (PFNLayer: Linear(Din->F, bias=False) + BN1d(F), eval mode).
    weight = 0.1 * jax.random.normal(k3, (F, Din), dtype=jnp.float32)
    gamma = 1.0 + 0.05 * jax.random.normal(k4, (F,), dtype=jnp.float32)
    beta = 0.05 * jax.random.normal(k5, (F,), dtype=jnp.float32)
    running_mean = 0.1 * jax.random.normal(k6, (F,), dtype=jnp.float32)
    running_var = jnp.ones((F,), dtype=jnp.float32)

    out = local_eq_feature_extraction(features, num_points, weight, gamma, beta,
                                      running_mean, running_var)
    out = jax.block_until_ready(out)
    assert out.shape == (N, F) and out.dtype == jnp.float32

    ref = _reference(features, num_points, weight, gamma, beta,
                     running_mean, running_var)
    max_err = float(jnp.max(jnp.abs(out - ref)))
    # All in-kernel math is f32 (MXU f32 dot); tolerance left generous for MXU rounding.
    assert jnp.allclose(out, ref, rtol=2e-2, atol=2e-2), f"kernel/reference mismatch ({max_err})"

    print("KERNEL_OK")
</pallas_src>

<mosaic_0001>
module attributes {stable_mosaic.version = 11 : i64} {
  func.func @_local_eq_kernel(%arg0: i32, %arg1: memref<4x24x128xf32, #tpu.memory_space<vmem>>, %arg2: memref<1x128xi32, #tpu.memory_space<vmem>>, %arg3: memref<64x32xf32, #tpu.memory_space<vmem>>, %arg4: memref<64x128xf32, #tpu.memory_space<vmem>>, %arg5: memref<32x128xf32, #tpu.memory_space<vmem>>) attributes {dimension_semantics = [#tpu.dimension_semantics<parallel>], iteration_bounds = array<i64: 1>, scalar_prefetch = 0 : i64, scratch_operands = 1 : i64, tpu.core_type = #tpu.core_type<tc>, window_params = [{transform_indices = @transform_0, window_bounds = array<i64: 4, 24, 128>}, {transform_indices = @transform_1, window_bounds = array<i64: 1, 128>}, {pipeline_mode = #tpu.pipeline_mode<synchronous>, transform_indices = @transform_2, window_bounds = array<i64: 64, 32>}, {transform_indices = @transform_3, window_bounds = array<i64: 64, 128>}]} {
    %c0 = arith.constant 0 : index
    %c0_0 = arith.constant 0 : index
    %c0_1 = arith.constant 0 : index
    %0 = vector.load %arg1[%c0, %c0_0, %c0_1] : memref<4x24x128xf32, #tpu.memory_space<vmem>>, vector<4x24x128xf32>
    %c0_2 = arith.constant 0 : index
    %c0_3 = arith.constant 0 : index
    %1 = vector.load %arg2[%c0_2, %c0_3] : memref<1x128xi32, #tpu.memory_space<vmem>>, vector<1x128xi32>
    %2 = tpu.iota {dimensions = array<i32: 0>} : vector<24x128xi32>
    %3 = vector.broadcast %1 : vector<1x128xi32> to vector<24x128xi32>
    %4 = arith.cmpi slt, %2, %3 : vector<24x128xi32>
    %5 = arith.extui %4 : vector<24x128xi1> to vector<24x128xi32>
    %6 = arith.sitofp %5 : vector<24x128xi32> to vector<24x128xf32>
    %7 = vector.extract_strided_slice %0 {offsets = [0, 0, 0], sizes = [3, 24, 128], strides = [1, 1, 1]} : vector<4x24x128xf32> to vector<3x24x128xf32>
    %8 = vector.shape_cast %6 : vector<24x128xf32> to vector<1x24x128xf32>
    %9 = vector.broadcast %8 : vector<1x24x128xf32> to vector<4x24x128xf32>
    %10 = arith.mulf %0, %9 : vector<4x24x128xf32>
    %cst = arith.constant 1.000000e+00 : f32
    %11 = vector.broadcast %cst : f32 to vector<1x128xf32>
    %c4 = arith.constant 4 : index
    %c0_4 = arith.constant 0 : index
    %12 = vector.load %arg5[%c4, %c0_4] : memref<32x128xf32, #tpu.memory_space<vmem>>, vector<1x128xf32>
    tpu.vector_store %arg5[%c4, %c0_4], %11 {strides = array<i32>} : memref<32x128xf32, #tpu.memory_space<vmem>>, vector<1x128xf32>,
    %cst_5 = arith.constant 0.000000e+00 : f32
    %13 = vector.broadcast %cst_5 : f32 to vector<3x128xf32>
    %c5 = arith.constant 5 : index
    %c0_6 = arith.constant 0 : index
    %14 = vector.load %arg5[%c5, %c0_6] : memref<32x128xf32, #tpu.memory_space<vmem>>, vector<3x128xf32>
    tpu.vector_store %arg5[%c5, %c0_6], %13 {strides = array<i32>} : memref<32x128xf32, #tpu.memory_space<vmem>>, vector<3x128xf32>,
    %15 = vector.extract_strided_slice %7 {offsets = [0, 0, 0], sizes = [3, 1, 128], strides = [1, 1, 1]} : vector<3x24x128xf32> to vector<3x1x128xf32>
    %16 = vector.broadcast %15 : vector<3x1x128xf32> to vector<3x24x128xf32>
    %17 = arith.subf %7, %16 : vector<3x24x128xf32>
    %18 = vector.extract_strided_slice %17 {offsets = [0, 0, 0], sizes = [1, 24, 128], strides = [1, 1, 1]} : vector<3x24x128xf32> to vector<1x24x128xf32>
    %19 = vector.shape_cast %18 : vector<1x24x128xf32> to vector<24x128xf32>
    %20 = vector.extract_strided_slice %17 {offsets = [0, 0, 0], sizes = [1, 24, 128], strides = [1, 1, 1]} : vector<3x24x128xf32> to vector<1x24x128xf32>
    %21 = vector.shape_cast %20 : vector<1x24x128xf32> to vector<24x128xf32>
    %22 = arith.mulf %19, %21 : vector<24x128xf32>
    %23 = vector.extract_strided_slice %17 {offsets = [1, 0, 0], sizes = [1, 24, 128], strides = [1, 1, 1]} : vector<3x24x128xf32> to vector<1x24x128xf32>
    %24 = vector.shape_cast %23 : vector<1x24x128xf32> to vector<24x128xf32>
    %25 = vector.extract_strided_slice %17 {offsets = [1, 0, 0], sizes = [1, 24, 128], strides = [1, 1, 1]} : vector<3x24x128xf32> to vector<1x24x128xf32>
    %26 = vector.shape_cast %25 : vector<1x24x128xf32> to vector<24x128xf32>
    %27 = arith.mulf %24, %26 : vector<24x128xf32>
    %28 = arith.addf %22, %27 : vector<24x128xf32>
    %29 = vector.extract_strided_slice %17 {offsets = [2, 0, 0], sizes = [1, 24, 128], strides = [1, 1, 1]} : vector<3x24x128xf32> to vector<1x24x128xf32>
    %30 = vector.shape_cast %29 : vector<1x24x128xf32> to vector<24x128xf32>
    %31 = vector.extract_strided_slice %17 {offsets = [2, 0, 0], sizes = [1, 24, 128], strides = [1, 1, 1]} : vector<3x24x128xf32> to vector<1x24x128xf32>
    %32 = vector.shape_cast %31 : vector<1x24x128xf32> to vector<24x128xf32>
    %33 = arith.mulf %30, %32 : vector<24x128xf32>
    %34 = arith.addf %28, %33 : vector<24x128xf32>
    %35 = math.sqrt %34 : vector<24x128xf32>
    %36 = arith.mulf %35, %6 : vector<24x128xf32>
    %37 = vector.extract_strided_slice %10 {offsets = [0, 0, 0], sizes = [4, 1, 128], strides = [1, 1, 1]} : vector<4x24x128xf32> to vector<4x1x128xf32>
    %38 = vector.shape_cast %37 : vector<4x1x128xf32> to vector<4x128xf32>
    %c0_7 = arith.constant 0 : index
    %c0_8 = arith.constant 0 : index
    %39 = vector.load %arg5[%c0_7, %c0_8] : memref<32x128xf32, #tpu.memory_space<vmem>>, vector<4x128xf32>
    tpu.vector_store %arg5[%c0_7, %c0_8], %38 {strides = array<i32>} : memref<32x128xf32, #tpu.memory_space<vmem>>, vector<4x128xf32>,
    %c8 = arith.constant 8 : index
    %c0_9 = arith.constant 0 : index
    %40 = vector.load %arg5[%c8, %c0_9] : memref<32x128xf32, #tpu.memory_space<vmem>>, vector<24x128xf32>
    tpu.vector_store %arg5[%c8, %c0_9], %36 {strides = array<i32>} : memref<32x128xf32, #tpu.memory_space<vmem>>, vector<24x128xf32>,
    %c0_10 = arith.constant 0 : index
    %c0_11 = arith.constant 0 : index
    %41 = vector.load %arg3[%c0_10, %c0_11] : memref<64x32xf32, #tpu.memory_space<vmem>>, vector<64x32xf32>
    %c0_12 = arith.constant 0 : index
    %c0_13 = arith.constant 0 : index
    %42 = vector.load %arg5[%c0_12, %c0_13] : memref<32x128xf32, #tpu.memory_space<vmem>>, vector<32x128xf32>
    %cst_14 = arith.constant dense<0.000000e+00> : vector<64x128xf32>
    %43 = tpu.matmul %41, %42, %cst_14 {dimension_numbers = #tpu.dot_dimension_numbers<[1], [0], [0], [1], [0, 0, 1, 1], [], []>} : vector<64x32xf32>, vector<32x128xf32>, vector<64x128xf32> -> vector<64x128xf32>
    %cst_15 = arith.constant 0.000000e+00 : f32
    %44 = vector.broadcast %cst_15 : f32 to vector<64x128xf32>
    %45 = arith.maximumf %43, %44 : vector<64x128xf32>
    %46 = vector.extract_strided_slice %7 {offsets = [0, 1, 0], sizes = [3, 1, 128], strides = [1, 1, 1]} : vector<3x24x128xf32> to vector<3x1x128xf32>
    %47 = vector.broadcast %46 : vector<3x1x128xf32> to vector<3x24x128xf32>
    %48 = arith.subf %7, %47 : vector<3x24x128xf32>
    %49 = vector.extract_strided_slice %48 {offsets = [0, 0, 0], sizes = [1, 24, 128], strides = [1, 1, 1]} : vector<3x24x128xf32> to vector<1x24x128xf32>
    %50 = vector.shape_cast %49 : vector<1x24x128xf32> to vector<24x128xf32>
    %51 = vector.extract_strided_slice %48 {offsets = [0, 0, 0], sizes = [1, 24, 128], strides = [1, 1, 1]} : vector<3x24x128xf32> to vector<1x24x128xf32>
    %52 = vector.shape_cast %51 : vector<1x24x128xf32> to vector<24x128xf32>
    %53 = arith.mulf %50, %52 : vector<24x128xf32>
    %54 = vector.extract_strided_slice %48 {offsets = [1, 0, 0], sizes = [1, 24, 128], strides = [1, 1, 1]} : vector<3x24x128xf32> to vector<1x24x128xf32>
    %55 = vector.shape_cast %54 : vector<1x24x128xf32> to vector<24x128xf32>
    %56 = vector.extract_strided_slice %48 {offsets = [1, 0, 0], sizes = [1, 24, 128], strides = [1, 1, 1]} : vector<3x24x128xf32> to vector<1x24x128xf32>
    %57 = vector.shape_cast %56 : vector<1x24x128xf32> to vector<24x128xf32>
    %58 = arith.mulf %55, %57 : vector<24x128xf32>
    %59 = arith.addf %53, %58 : vector<24x128xf32>
    %60 = vector.extract_strided_slice %48 {offsets = [2, 0, 0], sizes = [1, 24, 128], strides = [1, 1, 1]} : vector<3x24x128xf32> to vector<1x24x128xf32>
    %61 = vector.shape_cast %60 : vector<1x24x128xf32> to vector<24x128xf32>
    %62 = vector.extract_strided_slice %48 {offsets = [2, 0, 0], sizes = [1, 24, 128], strides = [1, 1, 1]} : vector<3x24x128xf32> to vector<1x24x128xf32>
    %63 = vector.shape_cast %62 : vector<1x24x128xf32> to vector<24x128xf32>
    %64 = arith.mulf %61, %63 : vector<24x128xf32>
    %65 = arith.addf %59, %64 : vector<24x128xf32>
    %66 = math.sqrt %65 : vector<24x128xf32>
    %67 = arith.mulf %66, %6 : vector<24x128xf32>
    %68 = vector.extract_strided_slice %10 {offsets = [0, 1, 0], sizes = [4, 1, 128], strides = [1, 1, 1]} : vector<4x24x128xf32> to vector<4x1x128xf32>
    %69 = vector.shape_cast %68 : vector<4x1x128xf32> to vector<4x128xf32>
    %c0_16 = arith.constant 0 : index
    %c0_17 = arith.constant 0 : index
    %70 = vector.load %arg5[%c0_16, %c0_17] : memref<32x128xf32, #tpu.memory_space<vmem>>, vector<4x128xf32>
    tpu.vector_store %arg5[%c0_16, %c0_17], %69 {strides = array<i32>} : memref<32x128xf32, #tpu.memory_space<vmem>>, vector<4x128xf32>,
    %c8_18 = arith.constant 8 : index
    %c0_19 = arith.constant 0 : index
    %71 = vector.load %arg5[%c8_18, %c0_19] : memref<32x128xf32, #tpu.memory_space<vmem>>, vector<24x128xf32>
    tpu.vector_store %arg5[%c8_18, %c0_19], %67 {strides = array<i32>} : memref<32x128xf32, #tpu.memory_space<vmem>>, vector<24x128xf32>,
    %c0_20 = arith.constant 0 : index
    %c0_21 = arith.constant 0 : index
    %72 = vector.load %arg3[%c0_20, %c0_21] : memref<64x32xf32, #tpu.memory_space<vmem>>, vector<64x32xf32>
    %c0_22 = arith.constant 0 : index
    %c0_23 = arith.constant 0 : index
    %73 = vector.load %arg5[%c0_22, %c0_23] : memref<32x128xf32, #tpu.memory_space<vmem>>, vector<32x128xf32>
    %cst_24 = arith.constant dense<0.000000e+00> : vector<64x128xf32>
    %74 = tpu.matmul %72, %73, %cst_24 {dimension_numbers = #tpu.dot_dimension_numbers<[1], [0], [0], [1], [0, 0, 1, 1], [], []>} : vector<64x32xf32>, vector<32x128xf32>, vector<64x128xf32> -> vector<64x128xf32>
    %cst_25 = arith.constant 0.000000e+00 : f32
    %75 = vector.broadcast %cst_25 : f32 to vector<64x128xf32>
    %76 = arith.maximumf %74, %75 : vector<64x128xf32>
    %77 = arith.maximumf %45, %76 : vector<64x128xf32>
    %78 = vector.extract_strided_slice %7 {offsets = [0, 2, 0], sizes = [3, 1, 128], strides = [1, 1, 1]} : vector<3x24x128xf32> to vector<3x1x128xf32>
    %79 = vector.broadcast %78 : vector<3x1x128xf32> to vector<3x24x128xf32>
    %80 = arith.subf %7, %79 : vector<3x24x128xf32>
    %81 = vector.extract_strided_slice %80 {offsets = [0, 0, 0], sizes = [1, 24, 128], strides = [1, 1, 1]} : vector<3x24x128xf32> to vector<1x24x128xf32>
    %82 = vector.shape_cast %81 : vector<1x24x128xf32> to vector<24x128xf32>
    %83 = vector.extract_strided_slice %80 {offsets = [0, 0, 0], sizes = [1, 24, 128], strides = [1, 1, 1]} : vector<3x24x128xf32> to vector<1x24x128xf32>
    %84 = vector.shape_cast %83 : vector<1x24x128xf32> to vector<24x128xf32>
    %85 = arith.mulf %82, %84 : vector<24x128xf32>
    %86 = vector.extract_strided_slice %80 {offsets = [1, 0, 0], sizes = [1, 24, 128], strides = [1, 1, 1]} : vector<3x24x128xf32> to vector<1x24x128xf32>
    %87 = vector.shape_cast %86 : vector<1x24x128xf32> to vector<24x128xf32>
    %88 = vector.extract_strided_slice %80 {offsets = [1, 0, 0], sizes = [1, 24, 128], strides = [1, 1, 1]} : vector<3x24x128xf32> to vector<1x24x128xf32>
    %89 = vector.shape_cast %88 : vector<1x24x128xf32> to vector<24x128xf32>
    %90 = arith.mulf %87, %89 : vector<24x128xf32>
    %91 = arith.addf %85, %90 : vector<24x128xf32>
    %92 = vector.extract_strided_slice %80 {offsets = [2, 0, 0], sizes = [1, 24, 128], strides = [1, 1, 1]} : vector<3x24x128xf32> to vector<1x24x128xf32>
    %93 = vector.shape_cast %92 : vector<1x24x128xf32> to vector<24x128xf32>
    %94 = vector.extract_strided_slice %80 {offsets = [2, 0, 0], sizes = [1, 24, 128], strides = [1, 1, 1]} : vector<3x24x128xf32> to vector<1x24x128xf32>
    %95 = vector.shape_cast %94 : vector<1x24x128xf32> to vector<24x128xf32>
    %96 = arith.mulf %93, %95 : vector<24x128xf32>
    %97 = arith.addf %91, %96 : vector<24x128xf32>
    %98 = math.sqrt %97 : vector<24x128xf32>
    %99 = arith.mulf %98, %6 : vector<24x128xf32>
    %100 = vector.extract_strided_slice %10 {offsets = [0, 2, 0], sizes = [4, 1, 128], strides = [1, 1, 1]} : vector<4x24x128xf32> to vector<4x1x128xf32>
    %101 = vector.shape_cast %100 : vector<4x1x128xf32> to vector<4x128xf32>
    %c0_26 = arith.constant 0 : index
    %c0_27 = arith.constant 0 : index
    %102 = vector.load %arg5[%c0_26, %c0_27] : memref<32x128xf32, #tpu.memory_space<vmem>>, vector<4x128xf32>
    tpu.vector_store %arg5[%c0_26, %c0_27], %101 {strides = array<i32>} : memref<32x128xf32, #tpu.memory_space<vmem>>, vector<4x128xf32>,
    %c8_28 = arith.constant 8 : index
    %c0_29 = arith.constant 0 : index
    %103 = vector.load %arg5[%c8_28, %c0_29] : memref<32x128xf32, #tpu.memory_space<vmem>>, vector<24x128xf32>
    tpu.vector_store %arg5[%c8_28, %c0_29], %99 {strides = array<i32>} : memref<32x128xf32, #tpu.memory_space<vmem>>, vector<24x128xf32>,
    %c0_30 = arith.constant 0 : index
    %c0_31 = arith.constant 0 : index
    %104 = vector.load %arg3[%c0_30, %c0_31] : memref<64x32xf32, #tpu.memory_space<vmem>>, vector<64x32xf32>
    %c0_32 = arith.constant 0 : index
    %c0_33 = arith.constant 0 : index
    %105 = vector.load %arg5[%c0_32, %c0_33] : memref<32x128xf32, #tpu.memory_space<vmem>>, vector<32x128xf32>
    %cst_34 = arith.constant dense<0.000000e+00> : vector<64x128xf32>
    %106 = tpu.matmul %104, %105, %cst_34 {dimension_numbers = #tpu.dot_dimension_numbers<[1], [0], [0], [1], [0, 0, 1, 1], [], []>} : vector<64x32xf32>, vector<32x128xf32>, vector<64x128xf32> -> vector<64x128xf32>
    %cst_35 = arith.constant 0.000000e+00 : f32
    %107 = vector.broadcast %cst_35 : f32 to vector<64x128xf32>
    %108 = arith.maximumf %106, %107 : vector<64x128xf32>
    %109 = arith.maximumf %77, %108 : vector<64x128xf32>
    %110 = vector.extract_strided_slice %7 {offsets = [0, 3, 0], sizes = [3, 1, 128], strides = [1, 1, 1]} : vector<3x24x128xf32> to vector<3x1x128xf32>
    %111 = vector.broadcast %110 : vector<3x1x128xf32> to vector<3x24x128xf32>
    %112 = arith.subf %7, %111 : vector<3x24x128xf32>
    %113 = vector.extract_strided_slice %112 {offsets = [0, 0, 0], sizes = [1, 24, 128], strides = [1, 1, 1]} : vector<3x24x128xf32> to vector<1x24x128xf32>
    %114 = vector.shape_cast %113 : vector<1x24x128xf32> to vector<24x128xf32>
    %115 = vector.extract_strided_slice %112 {offsets = [0, 0, 0], sizes = [1, 24, 128], strides = [1, 1, 1]} : vector<3x24x128xf32> to vector<1x24x128xf32>
    %116 = vector.shape_cast %115 : vector<1x24x128xf32> to vector<24x128xf32>
    %117 = arith.mulf %114, %116 : vector<24x128xf32>
    %118 = vector.extract_strided_slice %112 {offsets = [1, 0, 0], sizes = [1, 24, 128], strides = [1, 1, 1]} : vector<3x24x128xf32> to vector<1x24x128xf32>
    %119 = vector.shape_cast %118 : vector<1x24x128xf32> to vector<24x128xf32>
    %120 = vector.extract_strided_slice %112 {offsets = [1, 0, 0], sizes = [1, 24, 128], strides = [1, 1, 1]} : vector<3x24x128xf32> to vector<1x24x128xf32>
    %121 = vector.shape_cast %120 : vector<1x24x128xf32> to vector<24x128xf32>
    %122 = arith.mulf %119, %121 : vector<24x128xf32>
    %123 = arith.addf %117, %122 : vector<24x128xf32>
    %124 = vector.extract_strided_slice %112 {offsets = [2, 0, 0], sizes = [1, 24, 128], strides = [1, 1, 1]} : vector<3x24x128xf32> to vector<1x24x128xf32>
    %125 = vector.shape_cast %124 : vector<1x24x128xf32> to vector<24x128xf32>
    %126 = vector.extract_strided_slice %112 {offsets = [2, 0, 0], sizes = [1, 24, 128], strides = [1, 1, 1]} : vector<3x24x128xf32> to vector<1x24x128xf32>
    %127 = vector.shape_cast %126 : vector<1x24x128xf32> to vector<24x128xf32>
    %128 = arith.mulf %125, %127 : vector<24x128xf32>
    %129 = arith.addf %123, %128 : vector<24x128xf32>
    %130 = math.sqrt %129 : vector<24x128xf32>
    %131 = arith.mulf %130, %6 : vector<24x128xf32>
    %132 = vector.extract_strided_slice %10 {offsets = [0, 3, 0], sizes = [4, 1, 128], strides = [1, 1, 1]} : vector<4x24x128xf32> to vector<4x1x128xf32>
    %133 = vector.shape_cast %132 : vector<4x1x128xf32> to vector<4x128xf32>
    %c0_36 = arith.constant 0 : index
    %c0_37 = arith.constant 0 : index
    %134 = vector.load %arg5[%c0_36, %c0_37] : memref<32x128xf32, #tpu.memory_space<vmem>>, vector<4x128xf32>
    tpu.vector_store %arg5[%c0_36, %c0_37], %133 {strides = array<i32>} : memref<32x128xf32, #tpu.memory_space<vmem>>, vector<4x128xf32>,
    %c8_38 = arith.constant 8 : index
    %c0_39 = arith.constant 0 : index
    %135 = vector.load %arg5[%c8_38, %c0_39] : memref<32x128xf32, #tpu.memory_space<vmem>>, vector<24x128xf32>
    tpu.vector_store %arg5[%c8_38, %c0_39], %131 {strides = array<i32>} : memref<32x128xf32, #tpu.memory_space<vmem>>, vector<24x128xf32>,
    %c0_40 = arith.constant 0 : index
    %c0_41 = arith.constant 0 : index
    %136 = vector.load %arg3[%c0_40, %c0_41] : memref<64x32xf32, #tpu.memory_space<vmem>>, vector<64x32xf32>
    %c0_42 = arith.constant 0 : index
    %c0_43 = arith.constant 0 : index
    %137 = vector.load %arg5[%c0_42, %c0_43] : memref<32x128xf32, #tpu.memory_space<vmem>>, vector<32x128xf32>
    %cst_44 = arith.constant dense<0.000000e+00> : vector<64x128xf32>
    %138 = tpu.matmul %136, %137, %cst_44 {dimension_numbers = #tpu.dot_dimension_numbers<[1], [0], [0], [1], [0, 0, 1, 1], [], []>} : vector<64x32xf32>, vector<32x128xf32>, vector<64x128xf32> -> vector<64x128xf32>
    %cst_45 = arith.constant 0.000000e+00 : f32
    %139 = vector.broadcast %cst_45 : f32 to vector<64x128xf32>
    %140 = arith.maximumf %138, %139 : vector<64x128xf32>
    %141 = arith.maximumf %109, %140 : vector<64x128xf32>
    %142 = vector.extract_strided_slice %7 {offsets = [0, 4, 0], sizes = [3, 1, 128], strides = [1, 1, 1]} : vector<3x24x128xf32> to vector<3x1x128xf32>
    %143 = vector.broadcast %142 : vector<3x1x128xf32> to vector<3x24x128xf32>
    %144 = arith.subf %7, %143 : vector<3x24x128xf32>
    %145 = vector.extract_strided_slice %144 {offsets = [0, 0, 0], sizes = [1, 24, 128], strides = [1, 1, 1]} : vector<3x24x128xf32> to vector<1x24x128xf32>
    %146 = vector.shape_cast %145 : vector<1x24x128xf32> to vector<24x128xf32>
    %147 = vector.extract_strided_slice %144 {offsets = [0, 0, 0], sizes = [1, 24, 128], strides = [1, 1, 1]} : vector<3x24x128xf32> to vector<1x24x128xf32>
    %148 = vector.shape_cast %147 : vector<1x24x128xf32> to vector<24x128xf32>
    %149 = arith.mulf %146, %148 : vector<24x128xf32>
    %150 = vector.extract_strided_slice %144 {offsets = [1, 0, 0], sizes = [1, 24, 128], strides = [1, 1, 1]} : vector<3x24x128xf32> to vector<1x24x128xf32>
    %151 = vector.shape_cast %150 : vector<1x24x128xf32> to vector<24x128xf32>
    %152 = vector.extract_strided_slice %144 {offsets = [1, 0, 0], sizes = [1, 24, 128], strides = [1, 1, 1]} : vector<3x24x128xf32> to vector<1x24x128xf32>
    %153 = vector.shape_cast %152 : vector<1x24x128xf32> to vector<24x128xf32>
    %154 = arith.mulf %151, %153 : vector<24x128xf32>
    %155 = arith.addf %149, %154 : vector<24x128xf32>
    %156 = vector.extract_strided_slice %144 {offsets = [2, 0, 0], sizes = [1, 24, 128], strides = [1, 1, 1]} : vector<3x24x128xf32> to vector<1x24x128xf32>
    %157 = vector.shape_cast %156 : vector<1x24x128xf32> to vector<24x128xf32>
    %158 = vector.extract_strided_slice %144 {offsets = [2, 0, 0], sizes = [1, 24, 128], strides = [1, 1, 1]} : vector<3x24x128xf32> to vector<1x24x128xf32>
    %159 = vector.shape_cast %158 : vector<1x24x128xf32> to vector<24x128xf32>
    %160 = arith.mulf %157, %159 : vector<24x128xf32>
    %161 = arith.addf %155, %160 : vector<24x128xf32>
    %162 = math.sqrt %161 : vector<24x128xf32>
    %163 = arith.mulf %162, %6 : vector<24x128xf32>
    %164 = vector.extract_strided_slice %10 {offsets = [0, 4, 0], sizes = [4, 1, 128], strides = [1, 1, 1]} : vector<4x24x128xf32> to vector<4x1x128xf32>
    %165 = vector.shape_cast %164 : vector<4x1x128xf32> to vector<4x128xf32>
    %c0_46 = arith.constant 0 : index
    %c0_47 = arith.constant 0 : index
    %166 = vector.load %arg5[%c0_46, %c0_47] : memref<32x128xf32, #tpu.memory_space<vmem>>, vector<4x128xf32>
    tpu.vector_store %arg5[%c0_46, %c0_47], %165 {strides = array<i32>} : memref<32x128xf32, #tpu.memory_space<vmem>>, vector<4x128xf32>,
    %c8_48 = arith.constant 8 : index
    %c0_49 = arith.constant 0 : index
    %167 = vector.load %arg5[%c8_48, %c0_49] : memref<32x128xf32, #tpu.memory_space<vmem>>, vector<24x128xf32>
    tpu.vector_store %arg5[%c8_48, %c0_49], %163 {strides = array<i32>} : memref<32x128xf32, #tpu.memory_space<vmem>>, vector<24x128xf32>,
    %c0_50 = arith.constant 0 : index
    %c0_51 = arith.constant 0 : index
    %168 = vector.load %arg3[%c0_50, %c0_51] : memref<64x32xf32, #tpu.memory_space<vmem>>, vector<64x32xf32>
    %c0_52 = arith.constant 0 : index
    %c0_53 = arith.constant 0 : index
    %169 = vector.load %arg5[%c0_52, %c0_53] : memref<32x128xf32, #tpu.memory_space<vmem>>, vector<32x128xf32>
    %cst_54 = arith.constant dense<0.000000e+00> : vector<64x128xf32>
    %170 = tpu.matmul %168, %169, %cst_54 {dimension_numbers = #tpu.dot_dimension_numbers<[1], [0], [0], [1], [0, 0, 1, 1], [], []>} : vector<64x32xf32>, vector<32x128xf32>, vector<64x128xf32> -> vector<64x128xf32>
    %cst_55 = arith.constant 0.000000e+00 : f32
    %171 = vector.broadcast %cst_55 : f32 to vector<64x128xf32>
    %172 = arith.maximumf %170, %171 : vector<64x128xf32>
    %173 = arith.maximumf %141, %172 : vector<64x128xf32>
    %174 = vector.extract_strided_slice %7 {offsets = [0, 5, 0], sizes = [3, 1, 128], strides = [1, 1, 1]} : vector<3x24x128xf32> to vector<3x1x128xf32>
    %175 = vector.broadcast %174 : vector<3x1x128xf32> to vector<3x24x128xf32>
    %176 = arith.subf %7, %175 : vector<3x24x128xf32>
    %177 = vector.extract_strided_slice %176 {offsets = [0, 0, 0], sizes = [1, 24, 128], strides = [1, 1, 1]} : vector<3x24x128xf32> to vector<1x24x128xf32>
    %178 = vector.shape_cast %177 : vector<1x24x128xf32> to vector<24x128xf32>
    %179 = vector.extract_strided_slice %176 {offsets = [0, 0, 0], sizes = [1, 24, 128], strides = [1, 1, 1]} : vector<3x24x128xf32> to vector<1x24x128xf32>
    %180 = vector.shape_cast %179 : vector<1x24x128xf32> to vector<24x128xf32>
    %181 = arith.mulf %178, %180 : vector<24x128xf32>
    %182 = vector.extract_strided_slice %176 {offsets = [1, 0, 0], sizes = [1, 24, 128], strides = [1, 1, 1]} : vector<3x24x128xf32> to vector<1x24x128xf32>
    %183 = vector.shape_cast %182 : vector<1x24x128xf32> to vector<24x128xf32>
    %184 = vector.extract_strided_slice %176 {offsets = [1, 0, 0], sizes = [1, 24, 128], strides = [1, 1, 1]} : vector<3x24x128xf32> to vector<1x24x128xf32>
    %185 = vector.shape_cast %184 : vector<1x24x128xf32> to vector<24x128xf32>
    %186 = arith.mulf %183, %185 : vector<24x128xf32>
    %187 = arith.addf %181, %186 : vector<24x128xf32>
    %188 = vector.extract_strided_slice %176 {offsets = [2, 0, 0], sizes = [1, 24, 128], strides = [1, 1, 1]} : vector<3x24x128xf32> to vector<1x24x128xf32>
    %189 = vector.shape_cast %188 : vector<1x24x128xf32> to vector<24x128xf32>
    %190 = vector.extract_strided_slice %176 {offsets = [2, 0, 0], sizes = [1, 24, 128], strides = [1, 1, 1]} : vector<3x24x128xf32> to vector<1x24x128xf32>
    %191 = vector.shape_cast %190 : vector<1x24x128xf32> to vector<24x128xf32>
    %192 = arith.mulf %189, %191 : vector<24x128xf32>
    %193 = arith.addf %187, %192 : vector<24x128xf32>
    %194 = math.sqrt %193 : vector<24x128xf32>
    %195 = arith.mulf %194, %6 : vector<24x128xf32>
    %196 = vector.extract_strided_slice %10 {offsets = [0, 5, 0], sizes = [4, 1, 128], strides = [1, 1, 1]} : vector<4x24x128xf32> to vector<4x1x128xf32>
    %197 = vector.shape_cast %196 : vector<4x1x128xf32> to vector<4x128xf32>
    %c0_56 = arith.constant 0 : index
    %c0_57 = arith.constant 0 : index
    %198 = vector.load %arg5[%c0_56, %c0_57] : memref<32x128xf32, #tpu.memory_space<vmem>>, vector<4x128xf32>
    tpu.vector_store %arg5[%c0_56, %c0_57], %197 {strides = array<i32>} : memref<32x128xf32, #tpu.memory_space<vmem>>, vector<4x128xf32>,
    %c8_58 = arith.constant 8 : index
    %c0_59 = arith.constant 0 : index
    %199 = vector.load %arg5[%c8_58, %c0_59] : memref<32x128xf32, #tpu.memory_space<vmem>>, vector<24x128xf32>
    tpu.vector_store %arg5[%c8_58, %c0_59], %195 {strides = array<i32>} : memref<32x128xf32, #tpu.memory_space<vmem>>, vector<24x128xf32>,
    %c0_60 = arith.constant 0 : index
    %c0_61 = arith.constant 0 : index
    %200 = vector.load %arg3[%c0_60, %c0_61] : memref<64x32xf32, #tpu.memory_space<vmem>>, vector<64x32xf32>
    %c0_62 = arith.constant 0 : index
    %c0_63 = arith.constant 0 : index
    %201 = vector.load %arg5[%c0_62, %c0_63] : memref<32x128xf32, #tpu.memory_space<vmem>>, vector<32x128xf32>
    %cst_64 = arith.constant dense<0.000000e+00> : vector<64x128xf32>
    %202 = tpu.matmul %200, %201, %cst_64 {dimension_numbers = #tpu.dot_dimension_numbers<[1], [0], [0], [1], [0, 0, 1, 1], [], []>} : vector<64x32xf32>, vector<32x128xf32>, vector<64x128xf32> -> vector<64x128xf32>
    %cst_65 = arith.constant 0.000000e+00 : f32
    %203 = vector.broadcast %cst_65 : f32 to vector<64x128xf32>
    %204 = arith.maximumf %202, %203 : vector<64x128xf32>
    %205 = arith.maximumf %173, %204 : vector<64x128xf32>
    %206 = vector.extract_strided_slice %7 {offsets = [0, 6, 0], sizes = [3, 1, 128], strides = [1, 1, 1]} : vector<3x24x128xf32> to vector<3x1x128xf32>
    %207 = vector.broadcast %206 : vector<3x1x128xf32> to vector<3x24x128xf32>
    %208 = arith.subf %7, %207 : vector<3x24x128xf32>
    %209 = vector.extract_strided_slice %208 {offsets = [0, 0, 0], sizes = [1, 24, 128], strides = [1, 1, 1]} : vector<3x24x128xf32> to vector<1x24x128xf32>
    %210 = vector.shape_cast %209 : vector<1x24x128xf32> to vector<24x128xf32>
    %211 = vector.extract_strided_slice %208 {offsets = [0, 0, 0], sizes = [1, 24, 128], strides = [1, 1, 1]} : vector<3x24x128xf32> to vector<1x24x128xf32>
    %212 = vector.shape_cast %211 : vector<1x24x128xf32> to vector<24x128xf32>
    %213 = arith.mulf %210, %212 : vector<24x128xf32>
    %214 = vector.extract_strided_slice %208 {offsets = [1, 0, 0], sizes = [1, 24, 128], strides = [1, 1, 1]} : vector<3x24x128xf32> to vector<1x24x128xf32>
    %215 = vector.shape_cast %214 : vector<1x24x128xf32> to vector<24x128xf32>
    %216 = vector.extract_strided_slice %208 {offsets = [1, 0, 0], sizes = [1, 24, 128], strides = [1, 1, 1]} : vector<3x24x128xf32> to vector<1x24x128xf32>
    %217 = vector.shape_cast %216 : vector<1x24x128xf32> to vector<24x128xf32>
    %218 = arith.mulf %215, %217 : vector<24x128xf32>
    %219 = arith.addf %213, %218 : vector<24x128xf32>
    %220 = vector.extract_strided_slice %208 {offsets = [2, 0, 0], sizes = [1, 24, 128], strides = [1, 1, 1]} : vector<3x24x128xf32> to vector<1x24x128xf32>
    %221 = vector.shape_cast %220 : vector<1x24x128xf32> to vector<24x128xf32>
    %222 = vector.extract_strided_slice %208 {offsets = [2, 0, 0], sizes = [1, 24, 128], strides = [1, 1, 1]} : vector<3x24x128xf32> to vector<1x24x128xf32>
    %223 = vector.shape_cast %222 : vector<1x24x128xf32> to vector<24x128xf32>
    %224 = arith.mulf %221, %223 : vector<24x128xf32>
    %225 = arith.addf %219, %224 : vector<24x128xf32>
    %226 = math.sqrt %225 : vector<24x128xf32>
    %227 = arith.mulf %226, %6 : vector<24x128xf32>
    %228 = vector.extract_strided_slice %10 {offsets = [0, 6, 0], sizes = [4, 1, 128], strides = [1, 1, 1]} : vector<4x24x128xf32> to vector<4x1x128xf32>
    %229 = vector.shape_cast %228 : vector<4x1x128xf32> to vector<4x128xf32>
    %c0_66 = arith.constant 0 : index
    %c0_67 = arith.constant 0 : index
    %230 = vector.load %arg5[%c0_66, %c0_67] : memref<32x128xf32, #tpu.memory_space<vmem>>, vector<4x128xf32>
    tpu.vector_store %arg5[%c0_66, %c0_67], %229 {strides = array<i32>} : memref<32x128xf32, #tpu.memory_space<vmem>>, vector<4x128xf32>,
    %c8_68 = arith.constant 8 : index
    %c0_69 = arith.constant 0 : index
    %231 = vector.load %arg5[%c8_68, %c0_69] : memref<32x128xf32, #tpu.memory_space<vmem>>, vector<24x128xf32>
    tpu.vector_store %arg5[%c8_68, %c0_69], %227 {strides = array<i32>} : memref<32x128xf32, #tpu.memory_space<vmem>>, vector<24x128xf32>,
    %c0_70 = arith.constant 0 : index
    %c0_71 = arith.constant 0 : index
    %232 = vector.load %arg3[%c0_70, %c0_71] : memref<64x32xf32, #tpu.memory_space<vmem>>, vector<64x32xf32>
    %c0_72 = arith.constant 0 : index
    %c0_73 = arith.constant 0 : index
    %233 = vector.load %arg5[%c0_72, %c0_73] : memref<32x128xf32, #tpu.memory_space<vmem>>, vector<32x128xf32>
    %cst_74 = arith.constant dense<0.000000e+00> : vector<64x128xf32>
    %234 = tpu.matmul %232, %233, %cst_74 {dimension_numbers = #tpu.dot_dimension_numbers<[1], [0], [0], [1], [0, 0, 1, 1], [], []>} : vector<64x32xf32>, vector<32x128xf32>, vector<64x128xf32> -> vector<64x128xf32>
    %cst_75 = arith.constant 0.000000e+00 : f32
    %235 = vector.broadcast %cst_75 : f32 to vector<64x128xf32>
    %236 = arith.maximumf %234, %235 : vector<64x128xf32>
    %237 = arith.maximumf %205, %236 : vector<64x128xf32>
    %238 = vector.extract_strided_slice %7 {offsets = [0, 7, 0], sizes = [3, 1, 128], strides = [1, 1, 1]} : vector<3x24x128xf32> to vector<3x1x128xf32>
    %239 = vector.broadcast %238 : vector<3x1x128xf32> to vector<3x24x128xf32>
    %240 = arith.subf %7, %239 : vector<3x24x128xf32>
    %241 = vector.extract_strided_slice %240 {offsets = [0, 0, 0], sizes = [1, 24, 128], strides = [1, 1, 1]} : vector<3x24x128xf32> to vector<1x24x128xf32>
    %242 = vector.shape_cast %241 : vector<1x24x128xf32> to vector<24x128xf32>
    %243 = vector.extract_strided_slice %240 {offsets = [0, 0, 0], sizes = [1, 24, 128], strides = [1, 1, 1]} : vector<3x24x128xf32> to vector<1x24x128xf32>
    %244 = vector.shape_cast %243 : vector<1x24x128xf32> to vector<24x128xf32>
    %245 = arith.mulf %242, %244 : vector<24x128xf32>
    %246 = vector.extract_strided_slice %240 {offsets = [1, 0, 0], sizes = [1, 24, 128], strides = [1, 1, 1]} : vector<3x24x128xf32> to vector<1x24x128xf32>
    %247 = vector.shape_cast %246 : vector<1x24x128xf32> to vector<24x128xf32>
    %248 = vector.extract_strided_slice %240 {offsets = [1, 0, 0], sizes = [1, 24, 128], strides = [1, 1, 1]} : vector<3x24x128xf32> to vector<1x24x128xf32>
    %249 = vector.shape_cast %248 : vector<1x24x128xf32> to vector<24x128xf32>
    %250 = arith.mulf %247, %249 : vector<24x128xf32>
    %251 = arith.addf %245, %250 : vector<24x128xf32>
    %252 = vector.extract_strided_slice %240 {offsets = [2, 0, 0], sizes = [1, 24, 128], strides = [1, 1, 1]} : vector<3x24x128xf32> to vector<1x24x128xf32>
    %253 = vector.shape_cast %252 : vector<1x24x128xf32> to vector<24x128xf32>
    %254 = vector.extract_strided_slice %240 {offsets = [2, 0, 0], sizes = [1, 24, 128], strides = [1, 1, 1]} : vector<3x24x128xf32> to vector<1x24x128xf32>
    %255 = vector.shape_cast %254 : vector<1x24x128xf32> to vector<24x128xf32>
    %256 = arith.mulf %253, %255 : vector<24x128xf32>
    %257 = arith.addf %251, %256 : vector<24x128xf32>
    %258 = math.sqrt %257 : vector<24x128xf32>
    %259 = arith.mulf %258, %6 : vector<24x128xf32>
    %260 = vector.extract_strided_slice %10 {offsets = [0, 7, 0], sizes = [4, 1, 128], strides = [1, 1, 1]} : vector<4x24x128xf32> to vector<4x1x128xf32>
    %261 = vector.shape_cast %260 : vector<4x1x128xf32> to vector<4x128xf32>
    %c0_76 = arith.constant 0 : index
    %c0_77 = arith.constant 0 : index
    %262 = vector.load %arg5[%c0_76, %c0_77] : memref<32x128xf32, #tpu.memory_space<vmem>>, vector<4x128xf32>
    tpu.vector_store %arg5[%c0_76, %c0_77], %261 {strides = array<i32>} : memref<32x128xf32, #tpu.memory_space<vmem>>, vector<4x128xf32>,
    %c8_78 = arith.constant 8 : index
    %c0_79 = arith.constant 0 : index
    %263 = vector.load %arg5[%c8_78, %c0_79] : memref<32x128xf32, #tpu.memory_space<vmem>>, vector<24x128xf32>
    tpu.vector_store %arg5[%c8_78, %c0_79], %259 {strides = array<i32>} : memref<32x128xf32, #tpu.memory_space<vmem>>, vector<24x128xf32>,
    %c0_80 = arith.constant 0 : index
    %c0_81 = arith.constant 0 : index
    %264 = vector.load %arg3[%c0_80, %c0_81] : memref<64x32xf32, #tpu.memory_space<vmem>>, vector<64x32xf32>
    %c0_82 = arith.constant 0 : index
    %c0_83 = arith.constant 0 : index
    %265 = vector.load %arg5[%c0_82, %c0_83] : memref<32x128xf32, #tpu.memory_space<vmem>>, vector<32x128xf32>
    %cst_84 = arith.constant dense<0.000000e+00> : vector<64x128xf32>
    %266 = tpu.matmul %264, %265, %cst_84 {dimension_numbers = #tpu.dot_dimension_numbers<[1], [0], [0], [1], [0, 0, 1, 1], [], []>} : vector<64x32xf32>, vector<32x128xf32>, vector<64x128xf32> -> vector<64x128xf32>
    %cst_85 = arith.constant 0.000000e+00 : f32
    %267 = vector.broadcast %cst_85 : f32 to vector<64x128xf32>
    %268 = arith.maximumf %266, %267 : vector<64x128xf32>
    %269 = arith.maximumf %237, %268 : vector<64x128xf32>
    %270 = vector.extract_strided_slice %7 {offsets = [0, 8, 0], sizes = [3, 1, 128], strides = [1, 1, 1]} : vector<3x24x128xf32> to vector<3x1x128xf32>
    %271 = vector.broadcast %270 : vector<3x1x128xf32> to vector<3x24x128xf32>
    %272 = arith.subf %7, %271 : vector<3x24x128xf32>
    %273 = vector.extract_strided_slice %272 {offsets = [0, 0, 0], sizes = [1, 24, 128], strides = [1, 1, 1]} : vector<3x24x128xf32> to vector<1x24x128xf32>
    %274 = vector.shape_cast %273 : vector<1x24x128xf32> to vector<24x128xf32>
    %275 = vector.extract_strided_slice %272 {offsets = [0, 0, 0], sizes = [1, 24, 128], strides = [1, 1, 1]} : vector<3x24x128xf32> to vector<1x24x128xf32>
    %276 = vector.shape_cast %275 : vector<1x24x128xf32> to vector<24x128xf32>
    %277 = arith.mulf %274, %276 : vector<24x128xf32>
    %278 = vector.extract_strided_slice %272 {offsets = [1, 0, 0], sizes = [1, 24, 128], strides = [1, 1, 1]} : vector<3x24x128xf32> to vector<1x24x128xf32>
    %279 = vector.shape_cast %278 : vector<1x24x128xf32> to vector<24x128xf32>
    %280 = vector.extract_strided_slice %272 {offsets = [1, 0, 0], sizes = [1, 24, 128], strides = [1, 1, 1]} : vector<3x24x128xf32> to vector<1x24x128xf32>
    %281 = vector.shape_cast %280 : vector<1x24x128xf32> to vector<24x128xf32>
    %282 = arith.mulf %279, %281 : vector<24x128xf32>
    %283 = arith.addf %277, %282 : vector<24x128xf32>
    %284 = vector.extract_strided_slice %272 {offsets = [2, 0, 0], sizes = [1, 24, 128], strides = [1, 1, 1]} : vector<3x24x128xf32> to vector<1x24x128xf32>
    %285 = vector.shape_cast %284 : vector<1x24x128xf32> to vector<24x128xf32>
    %286 = vector.extract_strided_slice %272 {offsets = [2, 0, 0], sizes = [1, 24, 128], strides = [1, 1, 1]} : vector<3x24x128xf32> to vector<1x24x128xf32>
    %287 = vector.shape_cast %286 : vector<1x24x128xf32> to vector<24x128xf32>
    %288 = arith.mulf %285, %287 : vector<24x128xf32>
    %289 = arith.addf %283, %288 : vector<24x128xf32>
    %290 = math.sqrt %289 : vector<24x128xf32>
    %291 = arith.mulf %290, %6 : vector<24x128xf32>
    %292 = vector.extract_strided_slice %10 {offsets = [0, 8, 0], sizes = [4, 1, 128], strides = [1, 1, 1]} : vector<4x24x128xf32> to vector<4x1x128xf32>
    %293 = vector.shape_cast %292 : vector<4x1x128xf32> to vector<4x128xf32>
    %c0_86 = arith.constant 0 : index
    %c0_87 = arith.constant 0 : index
    %294 = vector.load %arg5[%c0_86, %c0_87] : memref<32x128xf32, #tpu.memory_space<vmem>>, vector<4x128xf32>
    tpu.vector_store %arg5[%c0_86, %c0_87], %293 {strides = array<i32>} : memref<32x128xf32, #tpu.memory_space<vmem>>, vector<4x128xf32>,
    %c8_88 = arith.constant 8 : index
    %c0_89 = arith.constant 0 : index
    %295 = vector.load %arg5[%c8_88, %c0_89] : memref<32x128xf32, #tpu.memory_space<vmem>>, vector<24x128xf32>
    tpu.vector_store %arg5[%c8_88, %c0_89], %291 {strides = array<i32>} : memref<32x128xf32, #tpu.memory_space<vmem>>, vector<24x128xf32>,
    %c0_90 = arith.constant 0 : index
    %c0_91 = arith.constant 0 : index
    %296 = vector.load %arg3[%c0_90, %c0_91] : memref<64x32xf32, #tpu.memory_space<vmem>>, vector<64x32xf32>
    %c0_92 = arith.constant 0 : index
    %c0_93 = arith.constant 0 : index
    %297 = vector.load %arg5[%c0_92, %c0_93] : memref<32x128xf32, #tpu.memory_space<vmem>>, vector<32x128xf32>
    %cst_94 = arith.constant dense<0.000000e+00> : vector<64x128xf32>
    %298 = tpu.matmul %296, %297, %cst_94 {dimension_numbers = #tpu.dot_dimension_numbers<[1], [0], [0], [1], [0, 0, 1, 1], [], []>} : vector<64x32xf32>, vector<32x128xf32>, vector<64x128xf32> -> vector<64x128xf32>
    %cst_95 = arith.constant 0.000000e+00 : f32
    %299 = vector.broadcast %cst_95 : f32 to vector<64x128xf32>
    %300 = arith.maximumf %298, %299 : vector<64x128xf32>
    %301 = arith.maximumf %269, %300 : vector<64x128xf32>
    %302 = vector.extract_strided_slice %7 {offsets = [0, 9, 0], sizes = [3, 1, 128], strides = [1, 1, 1]} : vector<3x24x128xf32> to vector<3x1x128xf32>
    %303 = vector.broadcast %302 : vector<3x1x128xf32> to vector<3x24x128xf32>
    %304 = arith.subf %7, %303 : vector<3x24x128xf32>
    %305 = vector.extract_strided_slice %304 {offsets = [0, 0, 0], sizes = [1, 24, 128], strides = [1, 1, 1]} : vector<3x24x128xf32> to vector<1x24x128xf32>
    %306 = vector.shape_cast %305 : vector<1x24x128xf32> to vector<24x128xf32>
    %307 = vector.extract_strided_slice %304 {offsets = [0, 0, 0], sizes = [1, 24, 128], strides = [1, 1, 1]} : vector<3x24x128xf32> to vector<1x24x128xf32>
    %308 = vector.shape_cast %307 : vector<1x24x128xf32> to vector<24x128xf32>
    %309 = arith.mulf %306, %308 : vector<24x128xf32>
    %310 = vector.extract_strided_slice %304 {offsets = [1, 0, 0], sizes = [1, 24, 128], strides = [1, 1, 1]} : vector<3x24x128xf32> to vector<1x24x128xf32>
    %311 = vector.shape_cast %310 : vector<1x24x128xf32> to vector<24x128xf32>
    %312 = vector.extract_strided_slice %304 {offsets = [1, 0, 0], sizes = [1, 24, 128], strides = [1, 1, 1]} : vector<3x24x128xf32> to vector<1x24x128xf32>
    %313 = vector.shape_cast %312 : vector<1x24x128xf32> to vector<24x128xf32>
    %314 = arith.mulf %311, %313 : vector<24x128xf32>
    %315 = arith.addf %309, %314 : vector<24x128xf32>
    %316 = vector.extract_strided_slice %304 {offsets = [2, 0, 0], sizes = [1, 24, 128], strides = [1, 1, 1]} : vector<3x24x128xf32> to vector<1x24x128xf32>
    %317 = vector.shape_cast %316 : vector<1x24x128xf32> to vector<24x128xf32>
    %318 = vector.extract_strided_slice %304 {offsets = [2, 0, 0], sizes = [1, 24, 128], strides = [1, 1, 1]} : vector<3x24x128xf32> to vector<1x24x128xf32>
    %319 = vector.shape_cast %318 : vector<1x24x128xf32> to vector<24x128xf32>
    %320 = arith.mulf %317, %319 : vector<24x128xf32>
    %321 = arith.addf %315, %320 : vector<24x128xf32>
    %322 = math.sqrt %321 : vector<24x128xf32>
    %323 = arith.mulf %322, %6 : vector<24x128xf32>
    %324 = vector.extract_strided_slice %10 {offsets = [0, 9, 0], sizes = [4, 1, 128], strides = [1, 1, 1]} : vector<4x24x128xf32> to vector<4x1x128xf32>
    %325 = vector.shape_cast %324 : vector<4x1x128xf32> to vector<4x128xf32>
    %c0_96 = arith.constant 0 : index
    %c0_97 = arith.constant 0 : index
    %326 = vector.load %arg5[%c0_96, %c0_97] : memref<32x128xf32, #tpu.memory_space<vmem>>, vector<4x128xf32>
    tpu.vector_store %arg5[%c0_96, %c0_97], %325 {strides = array<i32>} : memref<32x128xf32, #tpu.memory_space<vmem>>, vector<4x128xf32>,
    %c8_98 = arith.constant 8 : index
    %c0_99 = arith.constant 0 : index
    %327 = vector.load %arg5[%c8_98, %c0_99] : memref<32x128xf32, #tpu.memory_space<vmem>>, vector<24x128xf32>
    tpu.vector_store %arg5[%c8_98, %c0_99], %323 {strides = array<i32>} : memref<32x128xf32, #tpu.memory_space<vmem>>, vector<24x128xf32>,
    %c0_100 = arith.constant 0 : index
    %c0_101 = arith.constant 0 : index
    %328 = vector.load %arg3[%c0_100, %c0_101] : memref<64x32xf32, #tpu.memory_space<vmem>>, vector<64x32xf32>
    %c0_102 = arith.constant 0 : index
    %c0_103 = arith.constant 0 : index
    %329 = vector.load %arg5[%c0_102, %c0_103] : memref<32x128xf32, #tpu.memory_space<vmem>>, vector<32x128xf32>
    %cst_104 = arith.constant dense<0.000000e+00> : vector<64x128xf32>
    %330 = tpu.matmul %328, %329, %cst_104 {dimension_numbers = #tpu.dot_dimension_numbers<[1], [0], [0], [1], [0, 0, 1, 1], [], []>} : vector<64x32xf32>, vector<32x128xf32>, vector<64x128xf32> -> vector<64x128xf32>
    %cst_105 = arith.constant 0.000000e+00 : f32
    %331 = vector.broadcast %cst_105 : f32 to vector<64x128xf32>
    %332 = arith.maximumf %330, %331 : vector<64x128xf32>
    %333 = arith.maximumf %301, %332 : vector<64x128xf32>
    %334 = vector.extract_strided_slice %7 {offsets = [0, 10, 0], sizes = [3, 1, 128], strides = [1, 1, 1]} : vector<3x24x128xf32> to vector<3x1x128xf32>
    %335 = vector.broadcast %334 : vector<3x1x128xf32> to vector<3x24x128xf32>
    %336 = arith.subf %7, %335 : vector<3x24x128xf32>
    %337 = vector.extract_strided_slice %336 {offsets = [0, 0, 0], sizes = [1, 24, 128], strides = [1, 1, 1]} : vector<3x24x128xf32> to vector<1x24x128xf32>
    %338 = vector.shape_cast %337 : vector<1x24x128xf32> to vector<24x128xf32>
    %339 = vector.extract_strided_slice %336 {offsets = [0, 0, 0], sizes = [1, 24, 128], strides = [1, 1, 1]} : vector<3x24x128xf32> to vector<1x24x128xf32>
    %340 = vector.shape_cast %339 : vector<1x24x128xf32> to vector<24x128xf32>
    %341 = arith.mulf %338, %340 : vector<24x128xf32>
    %342 = vector.extract_strided_slice %336 {offsets = [1, 0, 0], sizes = [1, 24, 128], strides = [1, 1, 1]} : vector<3x24x128xf32> to vector<1x24x128xf32>
    %343 = vector.shape_cast %342 : vector<1x24x128xf32> to vector<24x128xf32>
    %344 = vector.extract_strided_slice %336 {offsets = [1, 0, 0], sizes = [1, 24, 128], strides = [1, 1, 1]} : vector<3x24x128xf32> to vector<1x24x128xf32>
    %345 = vector.shape_cast %344 : vector<1x24x128xf32> to vector<24x128xf32>
    %346 = arith.mulf %343, %345 : vector<24x128xf32>
    %347 = arith.addf %341, %346 : vector<24x128xf32>
    %348 = vector.extract_strided_slice %336 {offsets = [2, 0, 0], sizes = [1, 24, 128], strides = [1, 1, 1]} : vector<3x24x128xf32> to vector<1x24x128xf32>
    %349 = vector.shape_cast %348 : vector<1x24x128xf32> to vector<24x128xf32>
    %350 = vector.extract_strided_slice %336 {offsets = [2, 0, 0], sizes = [1, 24, 128], strides = [1, 1, 1]} : vector<3x24x128xf32> to vector<1x24x128xf32>
    %351 = vector.shape_cast %350 : vector<1x24x128xf32> to vector<24x128xf32>
    %352 = arith.mulf %349, %351 : vector<24x128xf32>
    %353 = arith.addf %347, %352 : vector<24x128xf32>
    %354 = math.sqrt %353 : vector<24x128xf32>
    %355 = arith.mulf %354, %6 : vector<24x128xf32>
    %356 = vector.extract_strided_slice %10 {offsets = [0, 10, 0], sizes = [4, 1, 128], strides = [1, 1, 1]} : vector<4x24x128xf32> to vector<4x1x128xf32>
    %357 = vector.shape_cast %356 : vector<4x1x128xf32> to vector<4x128xf32>
    %c0_106 = arith.constant 0 : index
    %c0_107 = arith.constant 0 : index
    %358 = vector.load %arg5[%c0_106, %c0_107] : memref<32x128xf32, #tpu.memory_space<vmem>>, vector<4x128xf32>
    tpu.vector_store %arg5[%c0_106, %c0_107], %357 {strides = array<i32>} : memref<32x128xf32, #tpu.memory_space<vmem>>, vector<4x128xf32>,
    %c8_108 = arith.constant 8 : index
    %c0_109 = arith.constant 0 : index
    %359 = vector.load %arg5[%c8_108, %c0_109] : memref<32x128xf32, #tpu.memory_space<vmem>>, vector<24x128xf32>
    tpu.vector_store %arg5[%c8_108, %c0_109], %355 {strides = array<i32>} : memref<32x128xf32, #tpu.memory_space<vmem>>, vector<24x128xf32>,
    %c0_110 = arith.constant 0 : index
    %c0_111 = arith.constant 0 : index
    %360 = vector.load %arg3[%c0_110, %c0_111] : memref<64x32xf32, #tpu.memory_space<vmem>>, vector<64x32xf32>
    %c0_112 = arith.constant 0 : index
    %c0_113 = arith.constant 0 : index
    %361 = vector.load %arg5[%c0_112, %c0_113] : memref<32x128xf32, #tpu.memory_space<vmem>>, vector<32x128xf32>
    %cst_114 = arith.constant dense<0.000000e+00> : vector<64x128xf32>
    %362 = tpu.matmul %360, %361, %cst_114 {dimension_numbers = #tpu.dot_dimension_numbers<[1], [0], [0], [1], [0, 0, 1, 1], [], []>} : vector<64x32xf32>, vector<32x128xf32>, vector<64x128xf32> -> vector<64x128xf32>
    %cst_115 = arith.constant 0.000000e+00 : f32
    %363 = vector.broadcast %cst_115 : f32 to vector<64x128xf32>
    %364 = arith.maximumf %362, %363 : vector<64x128xf32>
    %365 = arith.maximumf %333, %364 : vector<64x128xf32>
    %366 = vector.extract_strided_slice %7 {offsets = [0, 11, 0], sizes = [3, 1, 128], strides = [1, 1, 1]} : vector<3x24x128xf32> to vector<3x1x128xf32>
    %367 = vector.broadcast %366 : vector<3x1x128xf32> to vector<3x24x128xf32>
    %368 = arith.subf %7, %367 : vector<3x24x128xf32>
    %369 = vector.extract_strided_slice %368 {offsets = [0, 0, 0], sizes = [1, 24, 128], strides = [1, 1, 1]} : vector<3x24x128xf32> to vector<1x24x128xf32>
    %370 = vector.shape_cast %369 : vector<1x24x128xf32> to vector<24x128xf32>
    %371 = vector.extract_strided_slice %368 {offsets = [0, 0, 0], sizes = [1, 24, 128], strides = [1, 1, 1]} : vector<3x24x128xf32> to vector<1x24x128xf32>
    %372 = vector.shape_cast %371 : vector<1x24x128xf32> to vector<24x128xf32>
    %373 = arith.mulf %370, %372 : vector<24x128xf32>
    %374 = vector.extract_strided_slice %368 {offsets = [1, 0, 0], sizes = [1, 24, 128], strides = [1, 1, 1]} : vector<3x24x128xf32> to vector<1x24x128xf32>
    %375 = vector.shape_cast %374 : vector<1x24x128xf32> to vector<24x128xf32>
    %376 = vector.extract_strided_slice %368 {offsets = [1, 0, 0], sizes = [1, 24, 128], strides = [1, 1, 1]} : vector<3x24x128xf32> to vector<1x24x128xf32>
    %377 = vector.shape_cast %376 : vector<1x24x128xf32> to vector<24x128xf32>
    %378 = arith.mulf %375, %377 : vector<24x128xf32>
    %379 = arith.addf %373, %378 : vector<24x128xf32>
    %380 = vector.extract_strided_slice %368 {offsets = [2, 0, 0], sizes = [1, 24, 128], strides = [1, 1, 1]} : vector<3x24x128xf32> to vector<1x24x128xf32>
    %381 = vector.shape_cast %380 : vector<1x24x128xf32> to vector<24x128xf32>
    %382 = vector.extract_strided_slice %368 {offsets = [2, 0, 0], sizes = [1, 24, 128], strides = [1, 1, 1]} : vector<3x24x128xf32> to vector<1x24x128xf32>
    %383 = vector.shape_cast %382 : vector<1x24x128xf32> to vector<24x128xf32>
    %384 = arith.mulf %381, %383 : vector<24x128xf32>
    %385 = arith.addf %379, %384 : vector<24x128xf32>
    %386 = math.sqrt %385 : vector<24x128xf32>
    %387 = arith.mulf %386, %6 : vector<24x128xf32>
    %388 = vector.extract_strided_slice %10 {offsets = [0, 11, 0], sizes = [4, 1, 128], strides = [1, 1, 1]} : vector<4x24x128xf32> to vector<4x1x128xf32>
    %389 = vector.shape_cast %388 : vector<4x1x128xf32> to vector<4x128xf32>
    %c0_116 = arith.constant 0 : index
    %c0_117 = arith.constant 0 : index
    %390 = vector.load %arg5[%c0_116, %c0_117] : memref<32x128xf32, #tpu.memory_space<vmem>>, vector<4x128xf32>
    tpu.vector_store %arg5[%c0_116, %c0_117], %389 {strides = array<i32>} : memref<32x128xf32, #tpu.memory_space<vmem>>, vector<4x128xf32>,
    %c8_118 = arith.constant 8 : index
    %c0_119 = arith.constant 0 : index
    %391 = vector.load %arg5[%c8_118, %c0_119] : memref<32x128xf32, #tpu.memory_space<vmem>>, vector<24x128xf32>
    tpu.vector_store %arg5[%c8_118, %c0_119], %387 {strides = array<i32>} : memref<32x128xf32, #tpu.memory_space<vmem>>, vector<24x128xf32>,
    %c0_120 = arith.constant 0 : index
    %c0_121 = arith.constant 0 : index
    %392 = vector.load %arg3[%c0_120, %c0_121] : memref<64x32xf32, #tpu.memory_space<vmem>>, vector<64x32xf32>
    %c0_122 = arith.constant 0 : index
    %c0_123 = arith.constant 0 : index
    %393 = vector.load %arg5[%c0_122, %c0_123] : memref<32x128xf32, #tpu.memory_space<vmem>>, vector<32x128xf32>
    %cst_124 = arith.constant dense<0.000000e+00> : vector<64x128xf32>
    %394 = tpu.matmul %392, %393, %cst_124 {dimension_numbers = #tpu.dot_dimension_numbers<[1], [0], [0], [1], [0, 0, 1, 1], [], []>} : vector<64x32xf32>, vector<32x128xf32>, vector<64x128xf32> -> vector<64x128xf32>
    %cst_125 = arith.constant 0.000000e+00 : f32
    %395 = vector.broadcast %cst_125 : f32 to vector<64x128xf32>
    %396 = arith.maximumf %394, %395 : vector<64x128xf32>
    %397 = arith.maximumf %365, %396 : vector<64x128xf32>
    %398 = vector.extract_strided_slice %7 {offsets = [0, 12, 0], sizes = [3, 1, 128], strides = [1, 1, 1]} : vector<3x24x128xf32> to vector<3x1x128xf32>
    %399 = vector.broadcast %398 : vector<3x1x128xf32> to vector<3x24x128xf32>
    %400 = arith.subf %7, %399 : vector<3x24x128xf32>
    %401 = vector.extract_strided_slice %400 {offsets = [0, 0, 0], sizes = [1, 24, 128], strides = [1, 1, 1]} : vector<3x24x128xf32> to vector<1x24x128xf32>
    %402 = vector.shape_cast %401 : vector<1x24x128xf32> to vector<24x128xf32>
    %403 = vector.extract_strided_slice %400 {offsets = [0, 0, 0], sizes = [1, 24, 128], strides = [1, 1, 1]} : vector<3x24x128xf32> to vector<1x24x128xf32>
    %404 = vector.shape_cast %403 : vector<1x24x128xf32> to vector<24x128xf32>
    %405 = arith.mulf %402, %404 : vector<24x128xf32>
    %406 = vector.extract_strided_slice %400 {offsets = [1, 0, 0], sizes = [1, 24, 128], strides = [1, 1, 1]} : vector<3x24x128xf32> to vector<1x24x128xf32>
    %407 = vector.shape_cast %406 : vector<1x24x128xf32> to vector<24x128xf32>
    %408 = vector.extract_strided_slice %400 {offsets = [1, 0, 0], sizes = [1, 24, 128], strides = [1, 1, 1]} : vector<3x24x128xf32> to vector<1x24x128xf32>
    %409 = vector.shape_cast %408 : vector<1x24x128xf32> to vector<24x128xf32>
    %410 = arith.mulf %407, %409 : vector<24x128xf32>
    %411 = arith.addf %405, %410 : vector<24x128xf32>
    %412 = vector.extract_strided_slice %400 {offsets = [2, 0, 0], sizes = [1, 24, 128], strides = [1, 1, 1]} : vector<3x24x128xf32> to vector<1x24x128xf32>
    %413 = vector.shape_cast %412 : vector<1x24x128xf32> to vector<24x128xf32>
    %414 = vector.extract_strided_slice %400 {offsets = [2, 0, 0], sizes = [1, 24, 128], strides = [1, 1, 1]} : vector<3x24x128xf32> to vector<1x24x128xf32>
    %415 = vector.shape_cast %414 : vector<1x24x128xf32> to vector<24x128xf32>
    %416 = arith.mulf %413, %415 : vector<24x128xf32>
    %417 = arith.addf %411, %416 : vector<24x128xf32>
    %418 = math.sqrt %417 : vector<24x128xf32>
    %419 = arith.mulf %418, %6 : vector<24x128xf32>
    %420 = vector.extract_strided_slice %10 {offsets = [0, 12, 0], sizes = [4, 1, 128], strides = [1, 1, 1]} : vector<4x24x128xf32> to vector<4x1x128xf32>
    %421 = vector.shape_cast %420 : vector<4x1x128xf32> to vector<4x128xf32>
    %c0_126 = arith.constant 0 : index
    %c0_127 = arith.constant 0 : index
    %422 = vector.load %arg5[%c0_126, %c0_127] : memref<32x128xf32, #tpu.memory_space<vmem>>, vector<4x128xf32>
    tpu.vector_store %arg5[%c0_126, %c0_127], %421 {strides = array<i32>} : memref<32x128xf32, #tpu.memory_space<vmem>>, vector<4x128xf32>,
    %c8_128 = arith.constant 8 : index
    %c0_129 = arith.constant 0 : index
    %423 = vector.load %arg5[%c8_128, %c0_129] : memref<32x128xf32, #tpu.memory_space<vmem>>, vector<24x128xf32>
    tpu.vector_store %arg5[%c8_128, %c0_129], %419 {strides = array<i32>} : memref<32x128xf32, #tpu.memory_space<vmem>>, vector<24x128xf32>,
    %c0_130 = arith.constant 0 : index
    %c0_131 = arith.constant 0 : index
    %424 = vector.load %arg3[%c0_130, %c0_131] : memref<64x32xf32, #tpu.memory_space<vmem>>, vector<64x32xf32>
    %c0_132 = arith.constant 0 : index
    %c0_133 = arith.constant 0 : index
    %425 = vector.load %arg5[%c0_132, %c0_133] : memref<32x128xf32, #tpu.memory_space<vmem>>, vector<32x128xf32>
    %cst_134 = arith.constant dense<0.000000e+00> : vector<64x128xf32>
    %426 = tpu.matmul %424, %425, %cst_134 {dimension_numbers = #tpu.dot_dimension_numbers<[1], [0], [0], [1], [0, 0, 1, 1], [], []>} : vector<64x32xf32>, vector<32x128xf32>, vector<64x128xf32> -> vector<64x128xf32>
    %cst_135 = arith.constant 0.000000e+00 : f32
    %427 = vector.broadcast %cst_135 : f32 to vector<64x128xf32>
    %428 = arith.maximumf %426, %427 : vector<64x128xf32>
    %429 = arith.maximumf %397, %428 : vector<64x128xf32>
    %430 = vector.extract_strided_slice %7 {offsets = [0, 13, 0], sizes = [3, 1, 128], strides = [1, 1, 1]} : vector<3x24x128xf32> to vector<3x1x128xf32>
    %431 = vector.broadcast %430 : vector<3x1x128xf32> to vector<3x24x128xf32>
    %432 = arith.subf %7, %431 : vector<3x24x128xf32>
    %433 = vector.extract_strided_slice %432 {offsets = [0, 0, 0], sizes = [1, 24, 128], strides = [1, 1, 1]} : vector<3x24x128xf32> to vector<1x24x128xf32>
    %434 = vector.shape_cast %433 : vector<1x24x128xf32> to vector<24x128xf32>
    %435 = vector.extract_strided_slice %432 {offsets = [0, 0, 0], sizes = [1, 24, 128], strides = [1, 1, 1]} : vector<3x24x128xf32> to vector<1x24x128xf32>
    %436 = vector.shape_cast %435 : vector<1x24x128xf32> to vector<24x128xf32>
    %437 = arith.mulf %434, %436 : vector<24x128xf32>
    %438 = vector.extract_strided_slice %432 {offsets = [1, 0, 0], sizes = [1, 24, 128], strides = [1, 1, 1]} : vector<3x24x128xf32> to vector<1x24x128xf32>
    %439 = vector.shape_cast %438 : vector<1x24x128xf32> to vector<24x128xf32>
    %440 = vector.extract_strided_slice %432 {offsets = [1, 0, 0], sizes = [1, 24, 128], strides = [1, 1, 1]} : vector<3x24x128xf32> to vector<1x24x128xf32>
    %441 = vector.shape_cast %440 : vector<1x24x128xf32> to vector<24x128xf32>
    %442 = arith.mulf %439, %441 : vector<24x128xf32>
    %443 = arith.addf %437, %442 : vector<24x128xf32>
    %444 = vector.extract_strided_slice %432 {offsets = [2, 0, 0], sizes = [1, 24, 128], strides = [1, 1, 1]} : vector<3x24x128xf32> to vector<1x24x128xf32>
    %445 = vector.shape_cast %444 : vector<1x24x128xf32> to vector<24x128xf32>
    %446 = vector.extract_strided_slice %432 {offsets = [2, 0, 0], sizes = [1, 24, 128], strides = [1, 1, 1]} : vector<3x24x128xf32> to vector<1x24x128xf32>
    %447 = vector.shape_cast %446 : vector<1x24x128xf32> to vector<24x128xf32>
    %448 = arith.mulf %445, %447 : vector<24x128xf32>
    %449 = arith.addf %443, %448 : vector<24x128xf32>
    %450 = math.sqrt %449 : vector<24x128xf32>
    %451 = arith.mulf %450, %6 : vector<24x128xf32>
    %452 = vector.extract_strided_slice %10 {offsets = [0, 13, 0], sizes = [4, 1, 128], strides = [1, 1, 1]} : vector<4x24x128xf32> to vector<4x1x128xf32>
    %453 = vector.shape_cast %452 : vector<4x1x128xf32> to vector<4x128xf32>
    %c0_136 = arith.constant 0 : index
    %c0_137 = arith.constant 0 : index
    %454 = vector.load %arg5[%c0_136, %c0_137] : memref<32x128xf32, #tpu.memory_space<vmem>>, vector<4x128xf32>
    tpu.vector_store %arg5[%c0_136, %c0_137], %453 {strides = array<i32>} : memref<32x128xf32, #tpu.memory_space<vmem>>, vector<4x128xf32>,
    %c8_138 = arith.constant 8 : index
    %c0_139 = arith.constant 0 : index
    %455 = vector.load %arg5[%c8_138, %c0_139] : memref<32x128xf32, #tpu.memory_space<vmem>>, vector<24x128xf32>
    tpu.vector_store %arg5[%c8_138, %c0_139], %451 {strides = array<i32>} : memref<32x128xf32, #tpu.memory_space<vmem>>, vector<24x128xf32>,
    %c0_140 = arith.constant 0 : index
    %c0_141 = arith.constant 0 : index
    %456 = vector.load %arg3[%c0_140, %c0_141] : memref<64x32xf32, #tpu.memory_space<vmem>>, vector<64x32xf32>
    %c0_142 = arith.constant 0 : index
    %c0_143 = arith.constant 0 : index
    %457 = vector.load %arg5[%c0_142, %c0_143] : memref<32x128xf32, #tpu.memory_space<vmem>>, vector<32x128xf32>
    %cst_144 = arith.constant dense<0.000000e+00> : vector<64x128xf32>
    %458 = tpu.matmul %456, %457, %cst_144 {dimension_numbers = #tpu.dot_dimension_numbers<[1], [0], [0], [1], [0, 0, 1, 1], [], []>} : vector<64x32xf32>, vector<32x128xf32>, vector<64x128xf32> -> vector<64x128xf32>
    %cst_145 = arith.constant 0.000000e+00 : f32
    %459 = vector.broadcast %cst_145 : f32 to vector<64x128xf32>
    %460 = arith.maximumf %458, %459 : vector<64x128xf32>
    %461 = arith.maximumf %429, %460 : vector<64x128xf32>
    %462 = vector.extract_strided_slice %7 {offsets = [0, 14, 0], sizes = [3, 1, 128], strides = [1, 1, 1]} : vector<3x24x128xf32> to vector<3x1x128xf32>
    %463 = vector.broadcast %462 : vector<3x1x128xf32> to vector<3x24x128xf32>
    %464 = arith.subf %7, %463 : vector<3x24x128xf32>
    %465 = vector.extract_strided_slice %464 {offsets = [0, 0, 0], sizes = [1, 24, 128], strides = [1, 1, 1]} : vector<3x24x128xf32> to vector<1x24x128xf32>
    %466 = vector.shape_cast %465 : vector<1x24x128xf32> to vector<24x128xf32>
    %467 = vector.extract_strided_slice %464 {offsets = [0, 0, 0], sizes = [1, 24, 128], strides = [1, 1, 1]} : vector<3x24x128xf32> to vector<1x24x128xf32>
    %468 = vector.shape_cast %467 : vector<1x24x128xf32> to vector<24x128xf32>
    %469 = arith.mulf %466, %468 : vector<24x128xf32>
    %470 = vector.extract_strided_slice %464 {offsets = [1, 0, 0], sizes = [1, 24, 128], strides = [1, 1, 1]} : vector<3x24x128xf32> to vector<1x24x128xf32>
    %471 = vector.shape_cast %470 : vector<1x24x128xf32> to vector<24x128xf32>
    %472 = vector.extract_strided_slice %464 {offsets = [1, 0, 0], sizes = [1, 24, 128], strides = [1, 1, 1]} : vector<3x24x128xf32> to vector<1x24x128xf32>
    %473 = vector.shape_cast %472 : vector<1x24x128xf32> to vector<24x128xf32>
    %474 = arith.mulf %471, %473 : vector<24x128xf32>
    %475 = arith.addf %469, %474 : vector<24x128xf32>
    %476 = vector.extract_strided_slice %464 {offsets = [2, 0, 0], sizes = [1, 24, 128], strides = [1, 1, 1]} : vector<3x24x128xf32> to vector<1x24x128xf32>
    %477 = vector.shape_cast %476 : vector<1x24x128xf32> to vector<24x128xf32>
    %478 = vector.extract_strided_slice %464 {offsets = [2, 0, 0], sizes = [1, 24, 128], strides = [1, 1, 1]} : vector<3x24x128xf32> to vector<1x24x128xf32>
    %479 = vector.shape_cast %478 : vector<1x24x128xf32> to vector<24x128xf32>
    %480 = arith.mulf %477, %479 : vector<24x128xf32>
    %481 = arith.addf %475, %480 : vector<24x128xf32>
    %482 = math.sqrt %481 : vector<24x128xf32>
    %483 = arith.mulf %482, %6 : vector<24x128xf32>
    %484 = vector.extract_strided_slice %10 {offsets = [0, 14, 0], sizes = [4, 1, 128], strides = [1, 1, 1]} : vector<4x24x128xf32> to vector<4x1x128xf32>
    %485 = vector.shape_cast %484 : vector<4x1x128xf32> to vector<4x128xf32>
    %c0_146 = arith.constant 0 : index
    %c0_147 = arith.constant 0 : index
    %486 = vector.load %arg5[%c0_146, %c0_147] : memref<32x128xf32, #tpu.memory_space<vmem>>, vector<4x128xf32>
    tpu.vector_store %arg5[%c0_146, %c0_147], %485 {strides = array<i32>} : memref<32x128xf32, #tpu.memory_space<vmem>>, vector<4x128xf32>,
    %c8_148 = arith.constant 8 : index
    %c0_149 = arith.constant 0 : index
    %487 = vector.load %arg5[%c8_148, %c0_149] : memref<32x128xf32, #tpu.memory_space<vmem>>, vector<24x128xf32>
    tpu.vector_store %arg5[%c8_148, %c0_149], %483 {strides = array<i32>} : memref<32x128xf32, #tpu.memory_space<vmem>>, vector<24x128xf32>,
    %c0_150 = arith.constant 0 : index
    %c0_151 = arith.constant 0 : index
    %488 = vector.load %arg3[%c0_150, %c0_151] : memref<64x32xf32, #tpu.memory_space<vmem>>, vector<64x32xf32>
    %c0_152 = arith.constant 0 : index
    %c0_153 = arith.constant 0 : index
    %489 = vector.load %arg5[%c0_152, %c0_153] : memref<32x128xf32, #tpu.memory_space<vmem>>, vector<32x128xf32>
    %cst_154 = arith.constant dense<0.000000e+00> : vector<64x128xf32>
    %490 = tpu.matmul %488, %489, %cst_154 {dimension_numbers = #tpu.dot_dimension_numbers<[1], [0], [0], [1], [0, 0, 1, 1], [], []>} : vector<64x32xf32>, vector<32x128xf32>, vector<64x128xf32> -> vector<64x128xf32>
    %cst_155 = arith.constant 0.000000e+00 : f32
    %491 = vector.broadcast %cst_155 : f32 to vector<64x128xf32>
    %492 = arith.maximumf %490, %491 : vector<64x128xf32>
    %493 = arith.maximumf %461, %492 : vector<64x128xf32>
    %494 = vector.extract_strided_slice %7 {offsets = [0, 15, 0], sizes = [3, 1, 128], strides = [1, 1, 1]} : vector<3x24x128xf32> to vector<3x1x128xf32>
    %495 = vector.broadcast %494 : vector<3x1x128xf32> to vector<3x24x128xf32>
    %496 = arith.subf %7, %495 : vector<3x24x128xf32>
    %497 = vector.extract_strided_slice %496 {offsets = [0, 0, 0], sizes = [1, 24, 128], strides = [1, 1, 1]} : vector<3x24x128xf32> to vector<1x24x128xf32>
    %498 = vector.shape_cast %497 : vector<1x24x128xf32> to vector<24x128xf32>
    %499 = vector.extract_strided_slice %496 {offsets = [0, 0, 0], sizes = [1, 24, 128], strides = [1, 1, 1]} : vector<3x24x128xf32> to vector<1x24x128xf32>
    %500 = vector.shape_cast %499 : vector<1x24x128xf32> to vector<24x128xf32>
    %501 = arith.mulf %498, %500 : vector<24x128xf32>
    %502 = vector.extract_strided_slice %496 {offsets = [1, 0, 0], sizes = [1, 24, 128], strides = [1, 1, 1]} : vector<3x24x128xf32> to vector<1x24x128xf32>
    %503 = vector.shape_cast %502 : vector<1x24x128xf32> to vector<24x128xf32>
    %504 = vector.extract_strided_slice %496 {offsets = [1, 0, 0], sizes = [1, 24, 128], strides = [1, 1, 1]} : vector<3x24x128xf32> to vector<1x24x128xf32>
    %505 = vector.shape_cast %504 : vector<1x24x128xf32> to vector<24x128xf32>
    %506 = arith.mulf %503, %505 : vector<24x128xf32>
    %507 = arith.addf %501, %506 : vector<24x128xf32>
    %508 = vector.extract_strided_slice %496 {offsets = [2, 0, 0], sizes = [1, 24, 128], strides = [1, 1, 1]} : vector<3x24x128xf32> to vector<1x24x128xf32>
    %509 = vector.shape_cast %508 : vector<1x24x128xf32> to vector<24x128xf32>
    %510 = vector.extract_strided_slice %496 {offsets = [2, 0, 0], sizes = [1, 24, 128], strides = [1, 1, 1]} : vector<3x24x128xf32> to vector<1x24x128xf32>
    %511 = vector.shape_cast %510 : vector<1x24x128xf32> to vector<24x128xf32>
    %512 = arith.mulf %509, %511 : vector<24x128xf32>
    %513 = arith.addf %507, %512 : vector<24x128xf32>
    %514 = math.sqrt %513 : vector<24x128xf32>
    %515 = arith.mulf %514, %6 : vector<24x128xf32>
    %516 = vector.extract_strided_slice %10 {offsets = [0, 15, 0], sizes = [4, 1, 128], strides = [1, 1, 1]} : vector<4x24x128xf32> to vector<4x1x128xf32>
    %517 = vector.shape_cast %516 : vector<4x1x128xf32> to vector<4x128xf32>
    %c0_156 = arith.constant 0 : index
    %c0_157 = arith.constant 0 : index
    %518 = vector.load %arg5[%c0_156, %c0_157] : memref<32x128xf32, #tpu.memory_space<vmem>>, vector<4x128xf32>
    tpu.vector_store %arg5[%c0_156, %c0_157], %517 {strides = array<i32>} : memref<32x128xf32, #tpu.memory_space<vmem>>, vector<4x128xf32>,
    %c8_158 = arith.constant 8 : index
    %c0_159 = arith.constant 0 : index
    %519 = vector.load %arg5[%c8_158, %c0_159] : memref<32x128xf32, #tpu.memory_space<vmem>>, vector<24x128xf32>
    tpu.vector_store %arg5[%c8_158, %c0_159], %515 {strides = array<i32>} : memref<32x128xf32, #tpu.memory_space<vmem>>, vector<24x128xf32>,
    %c0_160 = arith.constant 0 : index
    %c0_161 = arith.constant 0 : index
    %520 = vector.load %arg3[%c0_160, %c0_161] : memref<64x32xf32, #tpu.memory_space<vmem>>, vector<64x32xf32>
    %c0_162 = arith.constant 0 : index
    %c0_163 = arith.constant 0 : index
    %521 = vector.load %arg5[%c0_162, %c0_163] : memref<32x128xf32, #tpu.memory_space<vmem>>, vector<32x128xf32>
    %cst_164 = arith.constant dense<0.000000e+00> : vector<64x128xf32>
    %522 = tpu.matmul %520, %521, %cst_164 {dimension_numbers = #tpu.dot_dimension_numbers<[1], [0], [0], [1], [0, 0, 1, 1], [], []>} : vector<64x32xf32>, vector<32x128xf32>, vector<64x128xf32> -> vector<64x128xf32>
    %cst_165 = arith.constant 0.000000e+00 : f32
    %523 = vector.broadcast %cst_165 : f32 to vector<64x128xf32>
    %524 = arith.maximumf %522, %523 : vector<64x128xf32>
    %525 = arith.maximumf %493, %524 : vector<64x128xf32>
    %526 = vector.extract_strided_slice %7 {offsets = [0, 16, 0], sizes = [3, 1, 128], strides = [1, 1, 1]} : vector<3x24x128xf32> to vector<3x1x128xf32>
    %527 = vector.broadcast %526 : vector<3x1x128xf32> to vector<3x24x128xf32>
    %528 = arith.subf %7, %527 : vector<3x24x128xf32>
    %529 = vector.extract_strided_slice %528 {offsets = [0, 0, 0], sizes = [1, 24, 128], strides = [1, 1, 1]} : vector<3x24x128xf32> to vector<1x24x128xf32>
    %530 = vector.shape_cast %529 : vector<1x24x128xf32> to vector<24x128xf32>
    %531 = vector.extract_strided_slice %528 {offsets = [0, 0, 0], sizes = [1, 24, 128], strides = [1, 1, 1]} : vector<3x24x128xf32> to vector<1x24x128xf32>
    %532 = vector.shape_cast %531 : vector<1x24x128xf32> to vector<24x128xf32>
    %533 = arith.mulf %530, %532 : vector<24x128xf32>
    %534 = vector.extract_strided_slice %528 {offsets = [1, 0, 0], sizes = [1, 24, 128], strides = [1, 1, 1]} : vector<3x24x128xf32> to vector<1x24x128xf32>
    %535 = vector.shape_cast %534 : vector<1x24x128xf32> to vector<24x128xf32>
    %536 = vector.extract_strided_slice %528 {offsets = [1, 0, 0], sizes = [1, 24, 128], strides = [1, 1, 1]} : vector<3x24x128xf32> to vector<1x24x128xf32>
    %537 = vector.shape_cast %536 : vector<1x24x128xf32> to vector<24x128xf32>
    %538 = arith.mulf %535, %537 : vector<24x128xf32>
    %539 = arith.addf %533, %538 : vector<24x128xf32>
    %540 = vector.extract_strided_slice %528 {offsets = [2, 0, 0], sizes = [1, 24, 128], strides = [1, 1, 1]} : vector<3x24x128xf32> to vector<1x24x128xf32>
    %541 = vector.shape_cast %540 : vector<1x24x128xf32> to vector<24x128xf32>
    %542 = vector.extract_strided_slice %528 {offsets = [2, 0, 0], sizes = [1, 24, 128], strides = [1, 1, 1]} : vector<3x24x128xf32> to vector<1x24x128xf32>
    %543 = vector.shape_cast %542 : vector<1x24x128xf32> to vector<24x128xf32>
    %544 = arith.mulf %541, %543 : vector<24x128xf32>
    %545 = arith.addf %539, %544 : vector<24x128xf32>
    %546 = math.sqrt %545 : vector<24x128xf32>
    %547 = arith.mulf %546, %6 : vector<24x128xf32>
    %548 = vector.extract_strided_slice %10 {offsets = [0, 16, 0], sizes = [4, 1, 128], strides = [1, 1, 1]} : vector<4x24x128xf32> to vector<4x1x128xf32>
    %549 = vector.shape_cast %548 : vector<4x1x128xf32> to vector<4x128xf32>
    %c0_166 = arith.constant 0 : index
    %c0_167 = arith.constant 0 : index
    %550 = vector.load %arg5[%c0_166, %c0_167] : memref<32x128xf32, #tpu.memory_space<vmem>>, vector<4x128xf32>
    tpu.vector_store %arg5[%c0_166, %c0_167], %549 {strides = array<i32>} : memref<32x128xf32, #tpu.memory_space<vmem>>, vector<4x128xf32>,
    %c8_168 = arith.constant 8 : index
    %c0_169 = arith.constant 0 : index
    %551 = vector.load %arg5[%c8_168, %c0_169] : memref<32x128xf32, #tpu.memory_space<vmem>>, vector<24x128xf32>
    tpu.vector_store %arg5[%c8_168, %c0_169], %547 {strides = array<i32>} : memref<32x128xf32, #tpu.memory_space<vmem>>, vector<24x128xf32>,
    %c0_170 = arith.constant 0 : index
    %c0_171 = arith.constant 0 : index
    %552 = vector.load %arg3[%c0_170, %c0_171] : memref<64x32xf32, #tpu.memory_space<vmem>>, vector<64x32xf32>
    %c0_172 = arith.constant 0 : index
    %c0_173 = arith.constant 0 : index
    %553 = vector.load %arg5[%c0_172, %c0_173] : memref<32x128xf32, #tpu.memory_space<vmem>>, vector<32x128xf32>
    %cst_174 = arith.constant dense<0.000000e+00> : vector<64x128xf32>
    %554 = tpu.matmul %552, %553, %cst_174 {dimension_numbers = #tpu.dot_dimension_numbers<[1], [0], [0], [1], [0, 0, 1, 1], [], []>} : vector<64x32xf32>, vector<32x128xf32>, vector<64x128xf32> -> vector<64x128xf32>
    %cst_175 = arith.constant 0.000000e+00 : f32
    %555 = vector.broadcast %cst_175 : f32 to vector<64x128xf32>
    %556 = arith.maximumf %554, %555 : vector<64x128xf32>
    %557 = arith.maximumf %525, %556 : vector<64x128xf32>
    %558 = vector.extract_strided_slice %7 {offsets = [0, 17, 0], sizes = [3, 1, 128], strides = [1, 1, 1]} : vector<3x24x128xf32> to vector<3x1x128xf32>
    %559 = vector.broadcast %558 : vector<3x1x128xf32> to vector<3x24x128xf32>
    %560 = arith.subf %7, %559 : vector<3x24x128xf32>
    %561 = vector.extract_strided_slice %560 {offsets = [0, 0, 0], sizes = [1, 24, 128], strides = [1, 1, 1]} : vector<3x24x128xf32> to vector<1x24x128xf32>
    %562 = vector.shape_cast %561 : vector<1x24x128xf32> to vector<24x128xf32>
    %563 = vector.extract_strided_slice %560 {offsets = [0, 0, 0], sizes = [1, 24, 128], strides = [1, 1, 1]} : vector<3x24x128xf32> to vector<1x24x128xf32>
    %564 = vector.shape_cast %563 : vector<1x24x128xf32> to vector<24x128xf32>
    %565 = arith.mulf %562, %564 : vector<24x128xf32>
    %566 = vector.extract_strided_slice %560 {offsets = [1, 0, 0], sizes = [1, 24, 128], strides = [1, 1, 1]} : vector<3x24x128xf32> to vector<1x24x128xf32>
    %567 = vector.shape_cast %566 : vector<1x24x128xf32> to vector<24x128xf32>
    %568 = vector.extract_strided_slice %560 {offsets = [1, 0, 0], sizes = [1, 24, 128], strides = [1, 1, 1]} : vector<3x24x128xf32> to vector<1x24x128xf32>
    %569 = vector.shape_cast %568 : vector<1x24x128xf32> to vector<24x128xf32>
    %570 = arith.mulf %567, %569 : vector<24x128xf32>
    %571 = arith.addf %565, %570 : vector<24x128xf32>
    %572 = vector.extract_strided_slice %560 {offsets = [2, 0, 0], sizes = [1, 24, 128], strides = [1, 1, 1]} : vector<3x24x128xf32> to vector<1x24x128xf32>
    %573 = vector.shape_cast %572 : vector<1x24x128xf32> to vector<24x128xf32>
    %574 = vector.extract_strided_slice %560 {offsets = [2, 0, 0], sizes = [1, 24, 128], strides = [1, 1, 1]} : vector<3x24x128xf32> to vector<1x24x128xf32>
    %575 = vector.shape_cast %574 : vector<1x24x128xf32> to vector<24x128xf32>
    %576 = arith.mulf %573, %575 : vector<24x128xf32>
    %577 = arith.addf %571, %576 : vector<24x128xf32>
    %578 = math.sqrt %577 : vector<24x128xf32>
    %579 = arith.mulf %578, %6 : vector<24x128xf32>
    %580 = vector.extract_strided_slice %10 {offsets = [0, 17, 0], sizes = [4, 1, 128], strides = [1, 1, 1]} : vector<4x24x128xf32> to vector<4x1x128xf32>
    %581 = vector.shape_cast %580 : vector<4x1x128xf32> to vector<4x128xf32>
    %c0_176 = arith.constant 0 : index
    %c0_177 = arith.constant 0 : index
    %582 = vector.load %arg5[%c0_176, %c0_177] : memref<32x128xf32, #tpu.memory_space<vmem>>, vector<4x128xf32>
    tpu.vector_store %arg5[%c0_176, %c0_177], %581 {strides = array<i32>} : memref<32x128xf32, #tpu.memory_space<vmem>>, vector<4x128xf32>,
    %c8_178 = arith.constant 8 : index
    %c0_179 = arith.constant 0 : index
    %583 = vector.load %arg5[%c8_178, %c0_179] : memref<32x128xf32, #tpu.memory_space<vmem>>, vector<24x128xf32>
    tpu.vector_store %arg5[%c8_178, %c0_179], %579 {strides = array<i32>} : memref<32x128xf32, #tpu.memory_space<vmem>>, vector<24x128xf32>,
    %c0_180 = arith.constant 0 : index
    %c0_181 = arith.constant 0 : index
    %584 = vector.load %arg3[%c0_180, %c0_181] : memref<64x32xf32, #tpu.memory_space<vmem>>, vector<64x32xf32>
    %c0_182 = arith.constant 0 : index
    %c0_183 = arith.constant 0 : index
    %585 = vector.load %arg5[%c0_182, %c0_183] : memref<32x128xf32, #tpu.memory_space<vmem>>, vector<32x128xf32>
    %cst_184 = arith.constant dense<0.000000e+00> : vector<64x128xf32>
    %586 = tpu.matmul %584, %585, %cst_184 {dimension_numbers = #tpu.dot_dimension_numbers<[1], [0], [0], [1], [0, 0, 1, 1], [], []>} : vector<64x32xf32>, vector<32x128xf32>, vector<64x128xf32> -> vector<64x128xf32>
    %cst_185 = arith.constant 0.000000e+00 : f32
    %587 = vector.broadcast %cst_185 : f32 to vector<64x128xf32>
    %588 = arith.maximumf %586, %587 : vector<64x128xf32>
    %589 = arith.maximumf %557, %588 : vector<64x128xf32>
    %590 = vector.extract_strided_slice %7 {offsets = [0, 18, 0], sizes = [3, 1, 128], strides = [1, 1, 1]} : vector<3x24x128xf32> to vector<3x1x128xf32>
    %591 = vector.broadcast %590 : vector<3x1x128xf32> to vector<3x24x128xf32>
    %592 = arith.subf %7, %591 : vector<3x24x128xf32>
    %593 = vector.extract_strided_slice %592 {offsets = [0, 0, 0], sizes = [1, 24, 128], strides = [1, 1, 1]} : vector<3x24x128xf32> to vector<1x24x128xf32>
    %594 = vector.shape_cast %593 : vector<1x24x128xf32> to vector<24x128xf32>
    %595 = vector.extract_strided_slice %592 {offsets = [0, 0, 0], sizes = [1, 24, 128], strides = [1, 1, 1]} : vector<3x24x128xf32> to vector<1x24x128xf32>
    %596 = vector.shape_cast %595 : vector<1x24x128xf32> to vector<24x128xf32>
    %597 = arith.mulf %594, %596 : vector<24x128xf32>
    %598 = vector.extract_strided_slice %592 {offsets = [1, 0, 0], sizes = [1, 24, 128], strides = [1, 1, 1]} : vector<3x24x128xf32> to vector<1x24x128xf32>
    %599 = vector.shape_cast %598 : vector<1x24x128xf32> to vector<24x128xf32>
    %600 = vector.extract_strided_slice %592 {offsets = [1, 0, 0], sizes = [1, 24, 128], strides = [1, 1, 1]} : vector<3x24x128xf32> to vector<1x24x128xf32>
    %601 = vector.shape_cast %600 : vector<1x24x128xf32> to vector<24x128xf32>
    %602 = arith.mulf %599, %601 : vector<24x128xf32>
    %603 = arith.addf %597, %602 : vector<24x128xf32>
    %604 = vector.extract_strided_slice %592 {offsets = [2, 0, 0], sizes = [1, 24, 128], strides = [1, 1, 1]} : vector<3x24x128xf32> to vector<1x24x128xf32>
    %605 = vector.shape_cast %604 : vector<1x24x128xf32> to vector<24x128xf32>
    %606 = vector.extract_strided_slice %592 {offsets = [2, 0, 0], sizes = [1, 24, 128], strides = [1, 1, 1]} : vector<3x24x128xf32> to vector<1x24x128xf32>
    %607 = vector.shape_cast %606 : vector<1x24x128xf32> to vector<24x128xf32>
    %608 = arith.mulf %605, %607 : vector<24x128xf32>
    %609 = arith.addf %603, %608 : vector<24x128xf32>
    %610 = math.sqrt %609 : vector<24x128xf32>
    %611 = arith.mulf %610, %6 : vector<24x128xf32>
    %612 = vector.extract_strided_slice %10 {offsets = [0, 18, 0], sizes = [4, 1, 128], strides = [1, 1, 1]} : vector<4x24x128xf32> to vector<4x1x128xf32>
    %613 = vector.shape_cast %612 : vector<4x1x128xf32> to vector<4x128xf32>
    %c0_186 = arith.constant 0 : index
    %c0_187 = arith.constant 0 : index
    %614 = vector.load %arg5[%c0_186, %c0_187] : memref<32x128xf32, #tpu.memory_space<vmem>>, vector<4x128xf32>
    tpu.vector_store %arg5[%c0_186, %c0_187], %613 {strides = array<i32>} : memref<32x128xf32, #tpu.memory_space<vmem>>, vector<4x128xf32>,
    %c8_188 = arith.constant 8 : index
    %c0_189 = arith.constant 0 : index
    %615 = vector.load %arg5[%c8_188, %c0_189] : memref<32x128xf32, #tpu.memory_space<vmem>>, vector<24x128xf32>
    tpu.vector_store %arg5[%c8_188, %c0_189], %611 {strides = array<i32>} : memref<32x128xf32, #tpu.memory_space<vmem>>, vector<24x128xf32>,
    %c0_190 = arith.constant 0 : index
    %c0_191 = arith.constant 0 : index
    %616 = vector.load %arg3[%c0_190, %c0_191] : memref<64x32xf32, #tpu.memory_space<vmem>>, vector<64x32xf32>
    %c0_192 = arith.constant 0 : index
    %c0_193 = arith.constant 0 : index
    %617 = vector.load %arg5[%c0_192, %c0_193] : memref<32x128xf32, #tpu.memory_space<vmem>>, vector<32x128xf32>
    %cst_194 = arith.constant dense<0.000000e+00> : vector<64x128xf32>
    %618 = tpu.matmul %616, %617, %cst_194 {dimension_numbers = #tpu.dot_dimension_numbers<[1], [0], [0], [1], [0, 0, 1, 1], [], []>} : vector<64x32xf32>, vector<32x128xf32>, vector<64x128xf32> -> vector<64x128xf32>
    %cst_195 = arith.constant 0.000000e+00 : f32
    %619 = vector.broadcast %cst_195 : f32 to vector<64x128xf32>
    %620 = arith.maximumf %618, %619 : vector<64x128xf32>
    %621 = arith.maximumf %589, %620 : vector<64x128xf32>
    %622 = vector.extract_strided_slice %7 {offsets = [0, 19, 0], sizes = [3, 1, 128], strides = [1, 1, 1]} : vector<3x24x128xf32> to vector<3x1x128xf32>
    %623 = vector.broadcast %622 : vector<3x1x128xf32> to vector<3x24x128xf32>
    %624 = arith.subf %7, %623 : vector<3x24x128xf32>
    %625 = vector.extract_strided_slice %624 {offsets = [0, 0, 0], sizes = [1, 24, 128], strides = [1, 1, 1]} : vector<3x24x128xf32> to vector<1x24x128xf32>
    %626 = vector.shape_cast %625 : vector<1x24x128xf32> to vector<24x128xf32>
    %627 = vector.extract_strided_slice %624 {offsets = [0, 0, 0], sizes = [1, 24, 128], strides = [1, 1, 1]} : vector<3x24x128xf32> to vector<1x24x128xf32>
    %628 = vector.shape_cast %627 : vector<1x24x128xf32> to vector<24x128xf32>
    %629 = arith.mulf %626, %628 : vector<24x128xf32>
    %630 = vector.extract_strided_slice %624 {offsets = [1, 0, 0], sizes = [1, 24, 128], strides = [1, 1, 1]} : vector<3x24x128xf32> to vector<1x24x128xf32>
    %631 = vector.shape_cast %630 : vector<1x24x128xf32> to vector<24x128xf32>
    %632 = vector.extract_strided_slice %624 {offsets = [1, 0, 0], sizes = [1, 24, 128], strides = [1, 1, 1]} : vector<3x24x128xf32> to vector<1x24x128xf32>
    %633 = vector.shape_cast %632 : vector<1x24x128xf32> to vector<24x128xf32>
    %634 = arith.mulf %631, %633 : vector<24x128xf32>
    %635 = arith.addf %629, %634 : vector<24x128xf32>
    %636 = vector.extract_strided_slice %624 {offsets = [2, 0, 0], sizes = [1, 24, 128], strides = [1, 1, 1]} : vector<3x24x128xf32> to vector<1x24x128xf32>
    %637 = vector.shape_cast %636 : vector<1x24x128xf32> to vector<24x128xf32>
    %638 = vector.extract_strided_slice %624 {offsets = [2, 0, 0], sizes = [1, 24, 128], strides = [1, 1, 1]} : vector<3x24x128xf32> to vector<1x24x128xf32>
    %639 = vector.shape_cast %638 : vector<1x24x128xf32> to vector<24x128xf32>
    %640 = arith.mulf %637, %639 : vector<24x128xf32>
    %641 = arith.addf %635, %640 : vector<24x128xf32>
    %642 = math.sqrt %641 : vector<24x128xf32>
    %643 = arith.mulf %642, %6 : vector<24x128xf32>
    %644 = vector.extract_strided_slice %10 {offsets = [0, 19, 0], sizes = [4, 1, 128], strides = [1, 1, 1]} : vector<4x24x128xf32> to vector<4x1x128xf32>
    %645 = vector.shape_cast %644 : vector<4x1x128xf32> to vector<4x128xf32>
    %c0_196 = arith.constant 0 : index
    %c0_197 = arith.constant 0 : index
    %646 = vector.load %arg5[%c0_196, %c0_197] : memref<32x128xf32, #tpu.memory_space<vmem>>, vector<4x128xf32>
    tpu.vector_store %arg5[%c0_196, %c0_197], %645 {strides = array<i32>} : memref<32x128xf32, #tpu.memory_space<vmem>>, vector<4x128xf32>,
    %c8_198 = arith.constant 8 : index
    %c0_199 = arith.constant 0 : index
    %647 = vector.load %arg5[%c8_198, %c0_199] : memref<32x128xf32, #tpu.memory_space<vmem>>, vector<24x128xf32>
    tpu.vector_store %arg5[%c8_198, %c0_199], %643 {strides = array<i32>} : memref<32x128xf32, #tpu.memory_space<vmem>>, vector<24x128xf32>,
    %c0_200 = arith.constant 0 : index
    %c0_201 = arith.constant 0 : index
    %648 = vector.load %arg3[%c0_200, %c0_201] : memref<64x32xf32, #tpu.memory_space<vmem>>, vector<64x32xf32>
    %c0_202 = arith.constant 0 : index
    %c0_203 = arith.constant 0 : index
    %649 = vector.load %arg5[%c0_202, %c0_203] : memref<32x128xf32, #tpu.memory_space<vmem>>, vector<32x128xf32>
    %cst_204 = arith.constant dense<0.000000e+00> : vector<64x128xf32>
    %650 = tpu.matmul %648, %649, %cst_204 {dimension_numbers = #tpu.dot_dimension_numbers<[1], [0], [0], [1], [0, 0, 1, 1], [], []>} : vector<64x32xf32>, vector<32x128xf32>, vector<64x128xf32> -> vector<64x128xf32>
    %cst_205 = arith.constant 0.000000e+00 : f32
    %651 = vector.broadcast %cst_205 : f32 to vector<64x128xf32>
    %652 = arith.maximumf %650, %651 : vector<64x128xf32>
    %653 = arith.maximumf %621, %652 : vector<64x128xf32>
    %c0_206 = arith.constant 0 : index
    %c0_207 = arith.constant 0 : index
    %654 = vector.load %arg4[%c0_206, %c0_207] : memref<64x128xf32, #tpu.memory_space<vmem>>, vector<64x128xf32>
    tpu.vector_store %arg4[%c0_206, %c0_207], %653 {strides = array<i32>} : memref<64x128xf32, #tpu.memory_space<vmem>>, vector<64x128xf32>,
    return
  }
  func.func @transform_0(%arg0: i32) -> (i32, i32, i32) {
    %c0_i32 = arith.constant 0 : i32
    %c0_i32_0 = arith.constant 0 : i32
    %c0_i32_1 = arith.constant 0 : i32
    return %c0_i32, %c0_i32_0, %arg0 : i32, i32, i32
  }
  func.func @transform_1(%arg0: i32) -> (i32, i32) {
    %c0_i32 = arith.constant 0 : i32
    %c0_i32_0 = arith.constant 0 : i32
    return %c0_i32, %arg0 : i32, i32
  }
  func.func @transform_2(%arg0: i32) -> (i32, i32) {
    %c0_i32 = arith.constant 0 : i32
    %c0_i32_0 = arith.constant 0 : i32
    %c0_i32_1 = arith.constant 0 : i32
    return %c0_i32, %c0_i32_0 : i32, i32
  }
  func.func @transform_3(%arg0: i32) -> (i32, i32) {
    %c0_i32 = arith.constant 0 : i32
    %c0_i32_0 = arith.constant 0 : i32
    return %c0_i32, %arg0 : i32, i32
  }
}

</mosaic_0001>

<bundles_post_ra>
// kernel: tpu_custom_call.1
= control target key start
LH: loop header
LB: loop body
LE: loop exit
PB: predicated region body
PF: predicated region fallthrough
CT: control target
= control target key end

     0   :  { %8 = vsyncpa [#allocation4], 0  ;;  %s6343_s0 = inlined_call_operand.vmem [shape: f32[4,24,128], index: 0, kind: input, shape index: {}]   ;;  %s6344_s1 = inlined_call_operand.hbm [shape: s32[1,128], index: 1, kind: input, shape index: {}]   ;;  %s6345_s2 = inlined_call_operand.vmem [shape: f32[64,32], index: 2, kind: input, shape index: {}]   ;;  %s6346_s3 = inlined_call_operand.hbm [shape: f32[64,128], index: 3, kind: output, shape index: {}]  }
   0x1   :  { %9 = vsyncpa [#allocation5], 0  ;;  %s17_s14 = sshll.u32 %s6344_s1, 4  ;;  %s3838_s15 = smov [#allocation3]   ;;  %s18_s14 = int_to_ptr.hbm [resolvable:$true] %s17_s14 }
   0x2   :  { %s19_s16 = sshll.u32 %s3838_s15, 4  ;;  %s20_s16 = int_to_ptr.vmem [resolvable:$true] %s19_s16 }
   0x3   :  { %22 = dma.hbm_to_vmem [thread:$0]  %s18_s14, 16, %s20_s16, [#allocation4]  }
   0x4   :  { %3834 = dma.done.wait [#allocation4], 16  }
   0x5   :  { %3835 = vsyncadd [#allocation4], 4294967280  ;;  %v3839_v0 = vmov 0.0   ;;  %v3840_v1 = vmov 1.0   ;;  %v3871_v2 = vld [vmem:[%s6343_s0] sm:$0xff]  ;;  %v3876_v3 = vld [vmem:[%s6343_s0 + $0x10] sm:$0xff]  ;;  %v42_v5 = vlaneseq }
   0x6   :  { %69 = vst [vmem:[#allocation2 + $0x5] sm:$0x7] %v3839_v0  ;;  %v3881_v4 = vld [vmem:[%s6343_s0 + $0x18] sm:$0xff]  ;;  %v3886_v6 = vld [vmem:[%s6343_s0 + $0x28] sm:$0xff]  ;;  %v3891_v7 = vld [vmem:[%s6343_s0 + $0x30] sm:$0xff]  ;;  %v70_v9 = vperm.slane %v3871_v2, 0 }
   0x7   :  { %68 = vst [vmem:[#allocation2 + $0x4] sm:$0x1] %v3840_v1  ;;  %v3896_v8 = vld [vmem:[%s6343_s0 + $0x40] sm:$0xff]  ;;  %v71_v10 = vperm.slane %v3881_v4, 0  ;;  %v240_v11 = vperm.slane %v3871_v2, 1  ;;  %v72_v12 = vperm.slane %v3891_v7, 0 }
   0x8   :  { %v241_v13 = vperm.slane %v3881_v4, 1  ;;  %v75_v14 = vsub.f32 %v3876_v3, %v70_v9  ;;  %v242_v16 = vperm.slane %v3891_v7, 1  ;;  %v43_v18 = vshrl.u32 %v42_v5, 7  ;;  %v3912_v21 = vld [vmem:[%s6343_s0 + $0x8] sm:$0xff]  ;;  %v3917_v22 = vld [vmem:[%s6343_s0 + $0x20] sm:$0xff]  ;;  %v3923_v26 = vld [vmem:[%s6343_s0 + $0x38] sm:$0xff] }
   0x9   :  { %v78_v15 = vsub.f32 %v3886_v6, %v71_v10  ;;  %v245_v17 = vsub.f32 %v3876_v3, %v240_v11  ;;  %v81_v19 = vsub.f32 %v3896_v8, %v72_v12  ;;  %v74_v33 = vsub.f32 %v3912_v21, %v70_v9  ;;  %v3633_v47 = vld [vmem:[#allocation3] ss:$0 sm:$0xff]  ;;  %s3451_s24 = sshll.u32 %s6346_s3, 4  ;;  %s3842_s25 = smov 128   ;;  %s3452_s24 = int_to_ptr.hbm [resolvable:$true] %s3451_s24 }
   0xa   :  { %v248_v20 = vsub.f32 %v3886_v6, %v241_v13  ;;  %v84_v23 = vmul.f32 %v75_v14, %v75_v14  ;;  %v251_v25 = vsub.f32 %v3896_v8, %v242_v16  ;;  %v45_v27 = vadd.s32 16, %v43_v18  ;;  %s3843_s26 = smov 8  }
   0xb   :  { %v87_v24 = vmul.f32 %v78_v15, %v78_v15  ;;  %v93_v28 = vmul.f32 %v81_v19, %v81_v19  ;;  %v254_v29 = vmul.f32 %v245_v17, %v245_v17  ;;  %v77_v34 = vsub.f32 %v3917_v22, %v71_v10 }
   0xc   :  { %v257_v30 = vmul.f32 %v248_v20, %v248_v20  ;;  %v263_v32 = vmul.f32 %v251_v25, %v251_v25  ;;  %v80_v36 = vsub.f32 %v3923_v26, %v72_v12  ;;  %v244_v37 = vsub.f32 %v3912_v21, %v240_v11  ;;  %v38_v20 = vld [vmem:[%s6343_s0 + $0x48] sm:$0xff] }
   0xd   :  { %v90_v31 = vadd.f32 %v87_v24, %v84_v23  ;;  %v247_v38 = vsub.f32 %v3917_v22, %v241_v13  ;;  %v83_v40 = vmul.f32 %v74_v33, %v74_v33  ;;  %v86_v41 = vmul.f32 %v77_v34, %v77_v34 }
   0xe   :  { %v260_v35 = vadd.f32 %v257_v30, %v254_v29  ;;  %v250_v42 = vsub.f32 %v3923_v26, %v242_v16  ;;  %v44_v44 = vadd.s32 8, %v43_v18  ;;  %v253_v45 = vmul.f32 %v244_v37, %v244_v37 }
   0xf   :  { %v3930_v39 = vadd.f32 %v93_v28, %v90_v31  ;;  %v256_v46 = vmul.f32 %v247_v38, %v247_v38  ;;  %v92_v48 = vmul.f32 %v80_v36, %v80_v36  ;;  %vm49_vm0 = vcmp.lt.s32.totalorder %v45_v27, %v3633_v47 }
  0x10   :  { %v3933_v43 = vadd.f32 %v263_v32, %v260_v35  ;;  %v89_v49 = vadd.f32 %v86_v41, %v83_v40  ;;  %v262_v51 = vmul.f32 %v250_v42, %v250_v42  ;;  %vm48_vm1 = vcmp.lt.s32.totalorder %v44_v44, %v3633_v47 }
  0x11   :  { %3634 = vrsqrt.f32 %v3930_v39  ;;  %v259_v50 = vadd.f32 %v256_v46, %v253_v45  ;;  %v73_v52 = vsub.f32 %v3871_v2, %v70_v9  ;;  %v76_v53 = vsub.f32 %v3881_v4, %v71_v10 }
  0x12   :  { %3636 = vrsqrt.f32 %v3933_v43  ;;  %v79_v54 = vsub.f32 %v3891_v7, %v72_v12  ;;  %v3940_v55 = vadd.f32 %v92_v48, %v89_v49  ;;  %vm47_vm2 = vcmp.lt.s32.totalorder %v43_v18, %v3633_v47 }
  0x13   :  { %v3942_v56 = vadd.f32 %v262_v51, %v259_v50  ;;  %v243_v57 = vsub.f32 %v3871_v2, %v240_v11  ;;  %v82_v58 = vmul.f32 %v73_v52, %v73_v52  ;;  %v85_v59 = vmul.f32 %v76_v53, %v76_v53 }
  0x14   :  { %v246_v60 = vsub.f32 %v3881_v4, %v241_v13  ;;  %v249_v61 = vsub.f32 %v3891_v7, %v242_v16  ;;  %v3949_v63 = vsel %vm49_vm0, 1.0, %v3839_v0  ;;  %3638 = vrsqrt.f32 %v3940_v55 }
  0x15   :  { %v91_v1 = vmul.f32 %v79_v54, %v79_v54  ;;  %vm141_vm3 = vcmask 1041409   ;;  %v3955_v10 = vsel %vm48_vm1, 1.0, %v3839_v0  ;;  %3640 = vrsqrt.f32 %v3942_v56 }
  0x16   :  { %6368 = vst [vmem:[#allocation9_spill] sm:$0xff] %v3955_v10  ;;  %v3959_v11 = vsel %vm47_vm2, 1.0, %v3839_v0  ;;  %vm144_vm4 = vcmask 1042434   ;;  %vm128_vm5 = vcmp.eq.f32.partialorder %v3930_v39, inf  ;;  %v131_v12 = vand.u32 2147483648, %v3930_v39 }
  0x17   :  { %v3635_v62 = vpop.eup %3634  ;;  %6369 = vst [vmem:[#allocation10_spill] sm:$0xff] %v3959_v11  ;;  %v88_v14 = vadd.f32 %v85_v59, %v82_v58  ;;  %v252_v15 = vmul.f32 %v243_v57, %v243_v57  ;;  %vm147_vm6 = vcmask 1043459   ;;  %vm130_vm7 = vcmp.eq.f32.partialorder %v3930_v39, 0.0 }
  0x18   :  { %v3637_v5 = vpop.eup %3636  ;;  %v122_v9 = vmul.f32 %v3635_v62, %v3930_v39  ;;  %vm298_vm8 = vcmp.eq.f32.partialorder %v3933_v43, inf  ;;  %v255_v17 = vmul.f32 %v246_v60, %v246_v60  ;;  %v261_v18 = vmul.f32 %v249_v61, %v249_v61 }
  0x19   :  { %v292_v13 = vmul.f32 %v3637_v5, %v3933_v43  ;;  %v3966_v0 = vadd.f32 %v91_v1, %v88_v14  ;;  %v59_v23 = vmul.f32 %v3959_v11, %v3881_v4  ;;  %v62_v24 = vmul.f32 %v3959_v11, %v3891_v7 }
  0x1a   :  { %v123_v16 = vmul.f32 %v3635_v62, %v122_v9  ;;  %vm300_vm9 = vcmp.eq.f32.partialorder %v3933_v43, 0.0  ;;  %v301_v27 = vand.u32 2147483648, %v3933_v43  ;;  %v258_v28 = vadd.f32 %v255_v17, %v252_v15  ;;  %v3639_v29 = vpop.eup %3638 }
  0x1b   :  { %v293_v19 = vmul.f32 %v3637_v5, %v292_v13  ;;  %v119_v31 = vand.u32 2147483648, %v3940_v55  ;;  %3642 = vrsqrt.f32 %v3966_v0  ;;  %v3981_v32 = vmul.f32 %v3959_v11, %v3871_v2  ;;  %v3641_v33 = vpop.eup %3640 }
  0x1c   :  { %v124_v25 = vmul.f32 0.5, %v123_v16  ;;  %v110_v35 = vmul.f32 %v3639_v29, %v3940_v55  ;;  %v3984_v36 = vadd.f32 %v261_v18, %v258_v28  ;;  %v65_v37 = vmul.f32 %v3959_v11, %v38_v20 }
  0x1d   :  { %v294_v30 = vmul.f32 0.5, %v293_v19  ;;  %vm116_vm10 = vcmp.eq.f32.partialorder %v3940_v55, inf  ;;  %v280_v40 = vmul.f32 %v3641_v33, %v3942_v56  ;;  %v3989_v41 = vrot.slane %v59_v23, 7 }
  0x1e   :  { %v125_v34 = vsub.f32 1.5, %v124_v25  ;;  %v3991_v42 = vrot.slane %v62_v24, 6  ;;  %v111_v45 = vmul.f32 %v3639_v29, %v110_v35  ;;  %vm118_vm11 = vcmp.eq.f32.partialorder %v3940_v55, 0.0 }
  0x1f   :  { %v295_v38 = vsub.f32 1.5, %v294_v30  ;;  %vm286_vm12 = vcmp.eq.f32.partialorder %v3942_v56, inf  ;;  %3644 = vrsqrt.f32 %v3984_v36  ;;  %v281_v47 = vmul.f32 %v3641_v33, %v280_v40 }
  0x20   :  { %v126_v44 = vmul.f32 %v3635_v62, %v125_v34  ;;  %vm288_vm13 = vcmp.eq.f32.partialorder %v3942_v56, 0.0  ;;  %v289_v48 = vand.u32 2147483648, %v3942_v56  ;;  %v107_v49 = vand.u32 2147483648, %v3966_v0 }
  0x21   :  { %v296_v46 = vmul.f32 %v3637_v5, %v295_v38  ;;  %v112_v51 = vmul.f32 0.5, %v111_v45  ;;  %v142_v52 = vsel %vm141_vm3, %v3989_v41, %v3981_v32  ;;  %v4003_v53 = vrot.slane %v65_v37, 5  ;;  %v3643_v54 = vpop.eup %3642 }
  0x22   :  { %v127_v50 = vmul.f32 %v126_v44, %v3930_v39  ;;  %v282_v58 = vmul.f32 0.5, %v281_v47  ;;  %v145_v59 = vsel %vm144_vm4, %v3991_v42, %v142_v52  ;;  %v408_v60 = vperm.slane %v3871_v2, 2 }
  0x23   :  { %v297_v57 = vmul.f32 %v296_v46, %v3933_v43  ;;  %v113_v62 = vsub.f32 1.5, %v112_v51  ;;  %v98_v1 = vmul.f32 %v3643_v54, %v3966_v0  ;;  %v148_v5 = vsel %vm147_vm6, %v4003_v53, %v145_v59 }
  0x24   :  { %v129_v61 = vsel %vm128_vm5, %v3930_v39, %v127_v50  ;;  %v283_v14 = vsub.f32 1.5, %v282_v58  ;;  %vm104_vm14 = vcmp.eq.f32.partialorder %v3966_v0, inf  ;;  %150 = vst [vmem:[#allocation2] sm:$0xf] %v148_v5  ;;  %v409_v15 = vperm.slane %v3881_v4, 2 }
  0x25   :  { %v132_v9 = vsel %vm130_vm7, %v131_v12, %v129_v61  ;;  %v299_v13 = vsel %vm298_vm8, %v3933_v43, %v297_v57  ;;  %v3645_v16 = vpop.eup %3644  ;;  %v114_v19 = vmul.f32 %v3639_v29, %v113_v62  ;;  %v99_v20 = vmul.f32 %v3643_v54, %v98_v1 }
  0x26   :  { %v135_v17 = vmul.f32 %v3949_v63, %v132_v9  ;;  %v302_v18 = vsel %vm300_vm9, %v301_v27, %v299_v13  ;;  %vm106_vm15 = vcmp.eq.f32.partialorder %v3966_v0, 0.0  ;;  %v284_v12 = vmul.f32 %v3641_v33, %v283_v14 }
  0x27   :  { %v305_v39 = vmul.f32 %v3949_v63, %v302_v18  ;;  %v268_v23 = vmul.f32 %v3645_v16, %v3984_v36  ;;  %v410_v24 = vperm.slane %v3891_v7, 2  ;;  %v115_v25 = vmul.f32 %v114_v19, %v3940_v55 }
  0x28   :  { %203 = vmatpush.msra.mxu0 %v135_v17  ;;  %v100_v28 = vmul.f32 0.5, %v99_v20  ;;  %v413_v30 = vsub.f32 %v3876_v3, %v408_v60  ;;  %v416_v43 = vsub.f32 %v3886_v6, %v409_v15  ;;  %v285_v27 = vmul.f32 %v284_v12, %v3942_v56 }
  0x29   :  { %v269_v29 = vmul.f32 %v3645_v16, %v268_v23  ;;  %363 = vmatpush.msra.mxu1 %v305_v39  ;;  %v419_v34 = vsub.f32 %v3896_v8, %v410_v24  ;;  %v412_v33 = vsub.f32 %v3912_v21, %v408_v60  ;;  %v117_v35 = vsel %vm116_vm10, %v3940_v55, %v115_v25  ;;  %v4079_v25 = vld [vmem:[%s6345_s2] sm:$0xff] }
  0x2a   :  { %v101_v37 = vsub.f32 1.5, %v100_v28  ;;  %v422_v38 = vmul.f32 %v413_v30, %v413_v30  ;;  %v425_v40 = vmul.f32 %v416_v43, %v416_v43  ;;  %v120_v44 = vsel %vm118_vm11, %v119_v31, %v117_v35 }
  0x2b   :  { %v287_v45 = vsel %vm286_vm12, %v3942_v56, %v285_v27  ;;  %v270_v46 = vmul.f32 0.5, %v269_v29  ;;  %v431_v47 = vmul.f32 %v419_v34, %v419_v34  ;;  %v134_v50 = vmul.f32 %v3955_v10, %v120_v44  ;;  %v162_v23 = vld [vmem:[#allocation2] sm:$0xff] }
  0x2c   :  { %v290_v51 = vsel %vm288_vm13, %v289_v48, %v287_v45  ;;  %v102_v52 = vmul.f32 %v3643_v54, %v101_v37  ;;  %vm166_vm0 = vcmask 261120   ;;  %v428_v57 = vadd.f32 %v425_v40, %v422_v38 }
  0x2d   :  { %v304_v58 = vmul.f32 %v3955_v10, %v290_v51  ;;  %v271_v59 = vsub.f32 1.5, %v270_v46  ;;  %v415_v55 = vsub.f32 %v3917_v22, %v409_v15  ;;  %v418_v31 = vsub.f32 %v3923_v26, %v410_v24  ;;  %204 = vmatpush.msra.mxu0 %v134_v50 }
  0x2e   :  { %v103_v61 = vmul.f32 %v102_v52, %v3966_v0  ;;  %v4052_v62 = vadd.f32 %v431_v47, %v428_v57  ;;  %v421_v1 = vmul.f32 %v412_v33, %v412_v33  ;;  %v411_v5 = vsub.f32 %v3871_v2, %v408_v60 }
  0x2f   :  { %v272_v56 = vmul.f32 %v3645_v16, %v271_v59  ;;  %364 = vmatpush.msra.mxu1 %v304_v58  ;;  %v424_v48 = vmul.f32 %v415_v55, %v415_v55  ;;  %v430_v54 = vmul.f32 %v418_v31, %v418_v31  ;;  %v414_v9 = vsub.f32 %v3881_v4, %v409_v15 }
  0x30   :  { %v105_v13 = vsel %vm104_vm14, %v3966_v0, %v103_v61  ;;  %vm274_vm1 = vcmp.eq.f32.partialorder %v3984_v36, inf  ;;  %v277_v14 = vand.u32 2147483648, %v3984_v36  ;;  %3646 = vrsqrt.f32 %v4052_v62  ;;  %v4109_v61 = vld [vmem:[%s6345_s2 + $0x8] sm:$0xff] }
  0x31   :  { %v108_v60 = vsel %vm106_vm15, %v107_v49, %v105_v13  ;;  %v273_v16 = vmul.f32 %v272_v56, %v3984_v36  ;;  %vm276_vm2 = vcmp.eq.f32.partialorder %v3984_v36, 0.0  ;;  %v427_v15 = vadd.f32 %v424_v48, %v421_v1 }
  0x32   :  { %v133_v17 = vmul.f32 %v3959_v11, %v108_v60  ;;  %v417_v18 = vsub.f32 %v3891_v7, %v410_v24  ;;  %v420_v19 = vmul.f32 %v411_v5, %v411_v5  ;;  %v423_v20 = vmul.f32 %v414_v9, %v414_v9 }
  0x33   :  { %v275_v39 = vsel %vm274_vm1, %v3984_v36, %v273_v16  ;;  %v4071_v12 = vadd.f32 %v430_v54, %v427_v15  ;;  %v306_v0 = vsel %vm144_vm4, %v3989_v41, %v3981_v32  ;;  %vm308_vm5 = vcmask 1044484  }
  0x34   :  { %205 = vmatpush.msra.mxu0 %v133_v17  ;;  %v278_v49 = vsel %vm276_vm2, %v277_v14, %v275_v39  ;;  %v426_v24 = vadd.f32 %v423_v20, %v420_v19  ;;  %v429_v28 = vmul.f32 %v417_v18, %v417_v18  ;;  %v307_v36 = vsel %vm147_vm6, %v3991_v42, %v306_v0 }
  0x35   :  { %v303_v30 = vmul.f32 %v3959_v11, %v278_v49  ;;  %3648 = vrsqrt.f32 %v4071_v12  ;;  %v309_v29 = vsel %vm308_vm5, %v4003_v53, %v307_v36  ;;  %v576_v34 = vperm.slane %v3871_v2, 3 }
  0x36   :  { %v3647_v43 = vpop.eup %3646  ;;  %206 = vmatpush.msra.mxu0 %v162_v23  ;;  %v4085_v27 = vadd.f32 %v429_v28, %v426_v24  ;;  %311 = vst [vmem:[#allocation2 - $0x1] sm:$0x1e] %v309_v29  ;;  %v577_v35 = vperm.slane %v3881_v4, 3  ;;  %v578_v37 = vperm.slane %v3891_v7, 3  ;;  %vm466_vm7 = vcmp.eq.f32.partialorder %v4052_v62, inf }
  0x37   :  { %3467 = vmatmul.msk.f32.vlgmr.msra.gmra.mxu0 %vm166_vm0, %v4079_v25  ;;  %v460_v33 = vmul.f32 %v3647_v43, %v4052_v62  ;;  %365 = vmatpush.msra.mxu1 %v303_v30  ;;  %vm468_vm8 = vcmp.eq.f32.partialorder %v4052_v62, 0.0  ;;  %v581_v40 = vsub.f32 %v3876_v3, %v576_v34  ;;  %v580_v46 = vsub.f32 %v3912_v21, %v576_v34 }
  0x38   :  { %3650 = vrsqrt.f32 %v4085_v27  ;;  %v584_v44 = vsub.f32 %v3886_v6, %v577_v35  ;;  %v587_v45 = vsub.f32 %v3896_v8, %v578_v37  ;;  %v583_v47 = vsub.f32 %v3917_v22, %v577_v35 }
  0x39   :  { %v461_v38 = vmul.f32 %v3647_v43, %v460_v33  ;;  %v586_v50 = vsub.f32 %v3923_v26, %v578_v37  ;;  %v579_v51 = vsub.f32 %v3871_v2, %v576_v34  ;;  %v590_v58 = vmul.f32 %v581_v40, %v581_v40 }
  0x3a   :  { %v593_v59 = vmul.f32 %v584_v44, %v584_v44  ;;  %v599_v55 = vmul.f32 %v587_v45, %v587_v45  ;;  %v589_v1 = vmul.f32 %v580_v46, %v580_v46  ;;  %v592_v5 = vmul.f32 %v583_v47, %v583_v47  ;;  %v4143_v44 = vld [vmem:[%s6345_s2 + $0x10] sm:$0xff] }
  0x3b   :  { %v3649_v52 = vpop.eup %3648  ;;  %v462_v57 = vmul.f32 0.5, %v461_v38  ;;  %v598_v56 = vmul.f32 %v586_v50, %v586_v50  ;;  %v469_v54 = vand.u32 2147483648, %v4052_v62  ;;  %v582_v13 = vsub.f32 %v3881_v4, %v577_v35 }
  0x3c   :  { %v448_v31 = vmul.f32 %v3649_v52, %v4071_v12  ;;  %v596_v9 = vadd.f32 %v593_v59, %v590_v58  ;;  %v595_v15 = vadd.f32 %v592_v5, %v589_v1  ;;  %v585_v17 = vsub.f32 %v3891_v7, %v578_v37 }
  0x3d   :  { %v463_v48 = vsub.f32 1.5, %v462_v57  ;;  %v323_v16 = vld [vmem:[#allocation2] sm:$0xff]  ;;  %v474_v18 = vsel %vm147_vm6, %v3989_v41, %v3981_v32  ;;  %vm454_vm9 = vcmp.eq.f32.partialorder %v4071_v12, inf  ;;  %v588_v23 = vmul.f32 %v579_v51, %v579_v51 }
  0x3e   :  { %v3651_v14 = vpop.eup %3650  ;;  %v449_v60 = vmul.f32 %v3649_v52, %v448_v31  ;;  %366 = vmatpush.msra.mxu1 %v323_v16  ;;  %v4121_v39 = vadd.f32 %v599_v55, %v596_v9  ;;  %v4125_v49 = vadd.f32 %v598_v56, %v595_v15  ;;  %v591_v24 = vmul.f32 %v582_v13, %v582_v13 }
  0x3f   :  { %v464_v19 = vmul.f32 %v3647_v43, %v463_v48  ;;  %v436_v20 = vmul.f32 %v3651_v14, %v4085_v27  ;;  %3468 = vmatmul.msk.f32.gmra.mxu0 %vm166_vm0, %v4109_v61  ;;  %3475 = vmatmul.msk.f32.vlgmr.msra.gmra.mxu1 %vm166_vm0, %v4079_v25  ;;  %v475_v30 = vsel %vm308_vm5, %v3991_v42, %v474_v18  ;;  %vm476_vm10 = vcmask 1045509  }
  0x40   :  { %v450_v0 = vmul.f32 0.5, %v449_v60  ;;  %3652 = vrsqrt.f32 %v4121_v39  ;;  %v597_v29 = vmul.f32 %v585_v17, %v585_v17  ;;  %vm456_vm11 = vcmp.eq.f32.partialorder %v4071_v12, 0.0 }
  0x41   :  { %v465_v28 = vmul.f32 %v464_v19, %v4052_v62  ;;  %v437_v36 = vmul.f32 %v3651_v14, %v436_v20  ;;  %3654 = vrsqrt.f32 %v4125_v49  ;;  %v457_v33 = vand.u32 2147483648, %v4071_v12 }
  0x42   :  { %v451_v43 = vsub.f32 1.5, %v450_v0  ;;  %vm442_vm12 = vcmp.eq.f32.partialorder %v4085_v27, inf  ;;  %v594_v40 = vadd.f32 %v591_v24, %v588_v23  ;;  %v477_v47 = vsel %vm476_vm10, %v4003_v53, %v475_v30 }
  0x43   :  { %v467_v34 = vsel %vm466_vm7, %v4052_v62, %v465_v28  ;;  %v438_v35 = vmul.f32 0.5, %v437_v36  ;;  %v4149_v50 = vperm.slane %v3871_v2, 4  ;;  %vm444_vm13 = vcmp.eq.f32.partialorder %v4085_v27, 0.0  ;;  %479 = vst [vmem:[#allocation2 - $0x2] sm:$0x3c] %v477_v47 }
  0x44   :  { %v470_v37 = vsel %vm468_vm8, %v469_v54, %v467_v34  ;;  %v452_v38 = vmul.f32 %v3649_v52, %v451_v43  ;;  %v4153_v51 = vadd.f32 %v597_v29, %v594_v40  ;;  %v4156_v52 = vperm.slane %v3881_v4, 4 }
  0x45   :  { %v473_v45 = vmul.f32 %v3949_v63, %v470_v37  ;;  %v439_v46 = vsub.f32 1.5, %v438_v35  ;;  %v445_v59 = vand.u32 2147483648, %v4085_v27  ;;  %v4162_v55 = vperm.slane %v3891_v7, 4 }
  0x46   :  { %v453_v62 = vmul.f32 %v452_v38, %v4071_v12  ;;  %v3653_v57 = vpop.eup %3652  ;;  %v749_v31 = vsub.f32 %v3876_v3, %v4149_v50  ;;  %v637_v48 = vand.u32 2147483648, %v4121_v39  ;;  %3656 = vrsqrt.f32 %v4153_v51 }
  0x47   :  { %v440_v58 = vmul.f32 %v3651_v14, %v439_v46  ;;  %531 = vmatpush.msra.mxu2 %v473_v45  ;;  %3469 = vmatmul.msk.f32.gmra.mxu0 %vm166_vm0, %v4143_v44  ;;  %v3655_v1 = vpop.eup %3654  ;;  %v628_v56 = vmul.f32 %v3653_v57, %v4121_v39  ;;  %vm634_vm14 = vcmp.eq.f32.partialorder %v4121_v39, inf  ;;  %v4180_v14 = vperm.slane %v3871_v2, 5 }
  0x48   :  { %v455_v5 = vsel %vm454_vm9, %v4071_v12, %v453_v62  ;;  %3476 = vmatmul.msk.f32.gmra.mxu1 %vm166_vm0, %v4109_v61  ;;  %v616_v13 = vmul.f32 %v3655_v1, %v4125_v49  ;;  %vm636_vm15 = vcmp.eq.f32.partialorder %v4121_v39, 0.0  ;;  %v752_v15 = vsub.f32 %v3886_v6, %v4156_v52 }
  0x49   :  { %v458_v54 = vsel %vm456_vm11, %v457_v33, %v455_v5  ;;  %v441_v9 = vmul.f32 %v440_v58, %v4085_v27  ;;  %v629_v16 = vmul.f32 %v3653_v57, %v628_v56  ;;  %v4187_v12 = vperm.slane %v3881_v4, 5 }
  0x4a   :  { %v472_v60 = vmul.f32 %v3955_v10, %v458_v54  ;;  %v617_v18 = vmul.f32 %v3655_v1, %v616_v13  ;;  %v755_v19 = vsub.f32 %v3896_v8, %v4162_v55  ;;  %v758_v20 = vmul.f32 %v749_v31, %v749_v31  ;;  %v491_v62 = vld [vmem:[#allocation2] sm:$0xff] }
  0x4b   :  { %v443_v17 = vsel %vm442_vm12, %v4085_v27, %v441_v9  ;;  %v630_v23 = vmul.f32 0.5, %v629_v16  ;;  %v761_v24 = vmul.f32 %v752_v15, %v752_v15  ;;  %v4197_v28 = vperm.slane %v3891_v7, 5 }
  0x4c   :  { %v446_v0 = vsel %vm444_vm13, %v445_v59, %v443_v17  ;;  %532 = vmatpush.msra.mxu2 %v472_v60  ;;  %v618_v30 = vmul.f32 0.5, %v617_v18  ;;  %v767_v43 = vmul.f32 %v755_v19, %v755_v19  ;;  %v917_v29 = vsub.f32 %v3876_v3, %v4180_v14  ;;  %v3657_v34 = vpop.eup %3656 }
  0x4d   :  { %v471_v36 = vmul.f32 %v3959_v11, %v446_v0  ;;  %v631_v33 = vsub.f32 1.5, %v630_v23  ;;  %v764_v35 = vadd.f32 %v761_v24, %v758_v20  ;;  %v920_v27 = vsub.f32 %v3886_v6, %v4187_v12 }
  0x4e   :  { %v923_v37 = vsub.f32 %v3896_v8, %v4197_v28  ;;  %v619_v38 = vsub.f32 1.5, %v618_v30  ;;  %v604_v40 = vmul.f32 %v3657_v34, %v4153_v51  ;;  %v926_v45 = vmul.f32 %v917_v29, %v917_v29 }
  0x4f   :  { %533 = vmatpush.msra.mxu2 %v471_v36  ;;  %v748_v46 = vsub.f32 %v3912_v21, %v4149_v50  ;;  %v632_v47 = vmul.f32 %v3653_v57, %v631_v33  ;;  %v4209_v58 = vadd.f32 %v767_v43, %v764_v35  ;;  %v929_v59 = vmul.f32 %v920_v27, %v920_v27  ;;  %v4239_v33 = vld [vmem:[%s6345_s2 + $0x18] sm:$0xff] }
  0x50   :  { %v935_v31 = vmul.f32 %v923_v37, %v923_v37  ;;  %3477 = vmatmul.msk.f32.gmra.mxu1 %vm166_vm0, %v4143_v44  ;;  %v620_v5 = vmul.f32 %v3655_v1, %v619_v38  ;;  %v605_v56 = vmul.f32 %v3657_v34, %v604_v40  ;;  %v751_v54 = vsub.f32 %v3917_v22, %v4156_v52 }
  0x51   :  { %534 = vmatpush.msra.mxu2 %v491_v62  ;;  %v754_v9 = vsub.f32 %v3923_v26, %v4162_v55  ;;  %v633_v13 = vmul.f32 %v632_v47, %v4121_v39  ;;  %vm622_vm1 = vcmp.eq.f32.partialorder %v4125_v49, inf  ;;  %v625_v57 = vand.u32 2147483648, %v4125_v49  ;;  %3470 = vmatmul.msk.f32.gmra.mxu0 %vm166_vm0, %v4239_v33 }
  0x52   :  { %3483 = vmatmul.msk.f32.vlgmr.msra.gmra.mxu2 %vm166_vm0, %v4079_v25  ;;  %3658 = vrsqrt.f32 %v4209_v58  ;;  %v621_v1 = vmul.f32 %v620_v5, %v4125_v49  ;;  %vm624_vm2 = vcmp.eq.f32.partialorder %v4125_v49, 0.0  ;;  %v606_v60 = vmul.f32 0.5, %v605_v56 }
  0x53   :  { %v932_v16 = vadd.f32 %v929_v59, %v926_v45  ;;  %v635_v15 = vsel %vm634_vm14, %v4121_v39, %v633_v13  ;;  %v757_v17 = vmul.f32 %v748_v46, %v748_v46  ;;  %v760_v18 = vmul.f32 %v751_v54, %v751_v54  ;;  %v4274_v59 = vld [vmem:[%s6345_s2 + $0x20] sm:$0xff] }
  0x54   :  { %v766_v19 = vmul.f32 %v754_v9, %v754_v9  ;;  %v638_v20 = vsel %vm636_vm15, %v637_v48, %v635_v15  ;;  %v623_v0 = vsel %vm622_vm1, %v4125_v49, %v621_v1  ;;  %v607_v23 = vsub.f32 1.5, %v606_v60 }
  0x55   :  { %v4231_v24 = vadd.f32 %v935_v31, %v932_v16  ;;  %v641_v36 = vmul.f32 %v3949_v63, %v638_v20  ;;  %v626_v30 = vsel %vm624_vm2, %v625_v57, %v623_v0  ;;  %v763_v43 = vadd.f32 %v760_v18, %v757_v17 }
  0x56   :  { %v747_v29 = vsub.f32 %v3871_v2, %v4149_v50  ;;  %v640_v39 = vmul.f32 %v3955_v10, %v626_v30  ;;  %v608_v48 = vmul.f32 %v3657_v34, %v607_v23  ;;  %vm610_vm7 = vcmp.eq.f32.partialorder %v4153_v51, inf }
  0x57   :  { %3660 = vrsqrt.f32 %v4231_v24  ;;  %vm612_vm8 = vcmp.eq.f32.partialorder %v4153_v51, 0.0  ;;  %v613_v50 = vand.u32 2147483648, %v4153_v51  ;;  %699 = vmatpush.msra.mxu3 %v641_v36  ;;  %v4248_v35 = vadd.f32 %v766_v19, %v763_v43 }
  0x58   :  { %v3659_v49 = vpop.eup %3658  ;;  %v750_v27 = vsub.f32 %v3881_v4, %v4156_v52  ;;  %3478 = vmatmul.msk.f32.gmra.mxu1 %vm166_vm0, %v4239_v33  ;;  %v609_v34 = vmul.f32 %v608_v48, %v4153_v51  ;;  %v753_v38 = vsub.f32 %v3891_v7, %v4162_v55  ;;  %v756_v40 = vmul.f32 %v747_v29, %v747_v29 }
  0x59   :  { %v796_v37 = vmul.f32 %v3659_v49, %v4209_v58  ;;  %vm802_vm9 = vcmp.eq.f32.partialorder %v4209_v58, inf  ;;  %700 = vmatpush.msra.mxu3 %v640_v39  ;;  %3662 = vrsqrt.f32 %v4248_v35  ;;  %vm804_vm11 = vcmp.eq.f32.partialorder %v4209_v58, 0.0  ;;  %3471 = vmatmul.msk.f32.gmra.mxu0 %vm166_vm0, %v4274_v59 }
  0x5a   :  { %3484 = vmatmul.msk.f32.gmra.mxu2 %vm166_vm0, %v4109_v61  ;;  %v611_v52 = vsel %vm610_vm7, %v4153_v51, %v609_v34  ;;  %v759_v46 = vmul.f32 %v750_v27, %v750_v27  ;;  %v765_v47 = vmul.f32 %v753_v38, %v753_v38  ;;  %v642_v62 = vsel %vm308_vm5, %v3989_v41, %v3981_v32 }
  0x5b   :  { %v797_v45 = vmul.f32 %v3659_v49, %v796_v37  ;;  %v614_v55 = vsel %vm612_vm8, %v613_v50, %v611_v52  ;;  %vm644_vm12 = vcmask 1046534   ;;  %v4277_v31 = vperm.slane %v3871_v2, 6  ;;  %v4318_v37 = vld [vmem:[%s6345_s2 + $0x28] sm:$0xff] }
  0x5c   :  { %v639_v56 = vmul.f32 %v3959_v11, %v614_v55  ;;  %v762_v9 = vadd.f32 %v759_v46, %v756_v40  ;;  %v643_v51 = vsel %vm476_vm10, %v3991_v42, %v642_v62  ;;  %v4286_v1 = vperm.slane %v3881_v4, 6 }
  0x5d   :  { %v3661_v5 = vpop.eup %3660  ;;  %v798_v54 = vmul.f32 0.5, %v797_v45  ;;  %v645_v57 = vsel %vm644_vm12, %v4003_v53, %v643_v51  ;;  %v4289_v60 = vperm.slane %v3891_v7, 6  ;;  %v805_v15 = vand.u32 2147483648, %v4209_v58 }
  0x5e   :  { %v964_v13 = vmul.f32 %v3661_v5, %v4231_v24  ;;  %701 = vmatpush.msra.mxu3 %v639_v56  ;;  %v4292_v17 = vadd.f32 %v765_v47, %v762_v9  ;;  %647 = vst [vmem:[#allocation2 - $0x3] sm:$0x78] %v645_v57  ;;  %v1085_v18 = vsub.f32 %v3876_v3, %v4277_v31  ;;  %v4305_v36 = vperm.slane %v3871_v2, 7 }
  0x5f   :  { %v799_v16 = vsub.f32 1.5, %v798_v54  ;;  %v3663_v19 = vpop.eup %3662  ;;  %v1088_v0 = vsub.f32 %v3886_v6, %v4286_v1  ;;  %v1091_v23 = vsub.f32 %v3896_v8, %v4289_v60  ;;  %vm970_vm13 = vcmp.eq.f32.partialorder %v4231_v24, inf }
  0x60   :  { %v965_v20 = vmul.f32 %v3661_v5, %v964_v13  ;;  %3479 = vmatmul.msk.f32.gmra.mxu1 %vm166_vm0, %v4274_v59  ;;  %v784_v43 = vmul.f32 %v3663_v19, %v4248_v35  ;;  %3664 = vrsqrt.f32 %v4292_v17  ;;  %vm972_vm14 = vcmp.eq.f32.partialorder %v4231_v24, 0.0 }
  0x61   :  { %v800_v30 = vmul.f32 %v3659_v49, %v799_v16  ;;  %v973_v39 = vand.u32 2147483648, %v4231_v24  ;;  %v1094_v48 = vmul.f32 %v1085_v18, %v1085_v18  ;;  %v1097_v27 = vmul.f32 %v1088_v0, %v1088_v0  ;;  %3472 = vmatmul.msk.f32.gmra.mxu0 %vm166_vm0, %v4318_v37 }
  0x62   :  { %v966_v29 = vmul.f32 0.5, %v965_v20  ;;  %3485 = vmatmul.msk.f32.gmra.mxu2 %vm166_vm0, %v4143_v44  ;;  %v785_v2 = vmul.f32 %v3663_v19, %v784_v43  ;;  %v1103_v49 = vmul.f32 %v1091_v23, %v1091_v23  ;;  %v4321_v38 = vperm.slane %v3881_v4, 7 }
  0x63   :  { %v801_v50 = vmul.f32 %v800_v30, %v4209_v58  ;;  %v4324_v40 = vperm.slane %v3891_v7, 7  ;;  %v1253_v52 = vsub.f32 %v3876_v3, %v4305_v36  ;;  %v1100_v47 = vadd.f32 %v1097_v27, %v1094_v48 }
  0x64   :  { %v967_v34 = vsub.f32 1.5, %v966_v29  ;;  %v786_v46 = vmul.f32 0.5, %v785_v2  ;;  %v4332_v55 = vperm.slane %v3912_v21, 0  ;;  %v1256_v7 = vsub.f32 %v3886_v6, %v4321_v38 }
  0x65   :  { %v803_v45 = vsel %vm802_vm9, %v4209_v58, %v801_v50  ;;  %v659_v56 = vld [vmem:[#allocation2] sm:$0xff]  ;;  %v1259_v54 = vsub.f32 %v3896_v8, %v4324_v40  ;;  %v4343_v57 = vadd.f32 %v1103_v49, %v1100_v47  ;;  %v1262_v58 = vmul.f32 %v1253_v52, %v1253_v52  ;;  %v4375_v49 = vld [vmem:[%s6345_s2 + $0x30] sm:$0xff] }
  0x66   :  { %v806_v62 = vsel %vm804_vm11, %v805_v15, %v803_v45  ;;  %v968_v4 = vmul.f32 %v3661_v5, %v967_v34  ;;  %v3665_v9 = vpop.eup %3664  ;;  %v787_v13 = vsub.f32 1.5, %v786_v46  ;;  %702 = vmatpush.msra.mxu3 %v659_v56  ;;  %v1265_v15 = vmul.f32 %v1256_v7, %v1256_v7 }
  0x67   :  { %v809_v51 = vmul.f32 %v3949_v63, %v806_v62  ;;  %v772_v16 = vmul.f32 %v3665_v9, %v4292_v17  ;;  %3491 = vmatmul.msk.f32.vlgmr.msra.gmra.mxu3 %vm166_vm0, %v4079_v25  ;;  %v1271_v18 = vmul.f32 %v1259_v54, %v1259_v54  ;;  %vm790_vm15 = vcmp.eq.f32.partialorder %v4248_v35, inf }
  0x68   :  { %v969_v5 = vmul.f32 %v968_v4, %v4231_v24  ;;  %v788_v20 = vmul.f32 %v3663_v19, %v787_v13  ;;  %vm792_vm1 = vcmp.eq.f32.partialorder %v4248_v35, 0.0  ;;  %3666 = vrsqrt.f32 %v4343_v57  ;;  %3480 = vmatmul.msk.f32.gmra.mxu1 %vm166_vm0, %v4318_v37 }
  0x69   :  { %867 = vmatpush.msrb.mxu0 %v809_v51  ;;  %v793_v23 = vand.u32 2147483648, %v4248_v35  ;;  %v773_v25 = vmul.f32 %v3665_v9, %v772_v16  ;;  %v1268_v19 = vadd.f32 %v1265_v15, %v1262_v58  ;;  %v4364_v29 = vperm.slane %v3917_v22, 0 }
  0x6a   :  { %v971_v0 = vsel %vm970_vm13, %v4231_v24, %v969_v5  ;;  %3486 = vmatmul.msk.f32.gmra.mxu2 %vm166_vm0, %v4239_v33  ;;  %v789_v43 = vmul.f32 %v788_v20, %v4248_v35  ;;  %v4367_v48 = vperm.slane %v3923_v26, 0  ;;  %v1421_v24 = vsub.f32 %v3876_v3, %v4332_v55  ;;  %3473 = vmatmul.msk.f32.gmra.mxu0 %vm166_vm0, %v4375_v49 }
  0x6b   :  { %v974_v30 = vsel %vm972_vm14, %v973_v39, %v971_v0  ;;  %v774_v2 = vmul.f32 0.5, %v773_v25  ;;  %v4370_v27 = vadd.f32 %v1271_v18, %v1268_v19  ;;  %v1424_v34 = vsub.f32 %v3886_v6, %v4364_v29 }
  0x6c   :  { %v977_v50 = vmul.f32 %v3949_v63, %v974_v30  ;;  %v791_v39 = vsel %vm790_vm15, %v4248_v35, %v789_v43  ;;  %v1427_v52 = vsub.f32 %v3896_v8, %v4367_v48  ;;  %v4387_v45 = vperm.slane %v3912_v21, 1 }
  0x6d   :  { %v794_v46 = vsel %vm792_vm1, %v793_v23, %v791_v39  ;;  %v775_v47 = vsub.f32 1.5, %v774_v2  ;;  %3668 = vrsqrt.f32 %v4370_v27  ;;  %vm778_vm2 = vcmp.eq.f32.partialorder %v4292_v17, inf }
  0x6e   :  { %1035 = vmatpush.msrb.mxu1 %v977_v50  ;;  %v3667_v62 = vpop.eup %3666  ;;  %v808_v4 = vmul.f32 %v3955_v10, %v794_v46  ;;  %vm780_vm7 = vcmp.eq.f32.partialorder %v4292_v17, 0.0  ;;  %v1430_v56 = vmul.f32 %v1421_v24, %v1421_v24  ;;  %v1433_v54 = vmul.f32 %v1424_v34, %v1424_v34 }
  0x6f   :  { %v776_v7 = vmul.f32 %v3665_v9, %v775_v47  ;;  %3492 = vmatmul.msk.f32.gmra.mxu3 %vm166_vm0, %v4109_v61  ;;  %v1132_v35 = vmul.f32 %v3667_v62, %v4343_v57  ;;  %v1439_v51 = vmul.f32 %v1427_v52, %v1427_v52  ;;  %v781_v13 = vand.u32 2147483648, %v4292_v17 }
  0x70   :  { %v4402_v58 = vperm.slane %v3917_v22, 1  ;;  %v4405_v5 = vperm.slane %v3923_v26, 1  ;;  %v1595_v16 = vsub.f32 %v3876_v3, %v4387_v45  ;;  %3481 = vmatmul.msk.f32.gmra.mxu1 %vm166_vm0, %v4375_v49  ;;  %868 = vmatpush.msrb.mxu0 %v808_v4  ;;  %v1436_v15 = vadd.f32 %v1433_v54, %v1430_v56 }
  0x71   :  { %v777_v61 = vmul.f32 %v776_v7, %v4292_v17  ;;  %v1133_v9 = vmul.f32 %v3667_v62, %v1132_v35  ;;  %v916_v18 = vsub.f32 %v3912_v21, %v4180_v14  ;;  %v919_v23 = vsub.f32 %v3917_v22, %v4187_v12  ;;  %v4430_v21 = vld [vmem:[%s6345_s2 + $0x38] sm:$0xff]  ;;  %v4450_v35 = vld [vmem:[%s6343_s0] sm:$0xff] }
  0x72   :  { %3487 = vmatmul.msk.f32.gmra.mxu2 %vm166_vm0, %v4274_v59  ;;  %v1598_v20 = vsub.f32 %v3886_v6, %v4402_v58  ;;  %v1601_v3 = vsub.f32 %v3896_v8, %v4405_v5  ;;  %v1604_v0 = vmul.f32 %v1595_v16, %v1595_v16  ;;  %v4425_v43 = vadd.f32 %v1439_v51, %v1436_v15 }
  0x73   :  { %v3669_v25 = vpop.eup %3668  ;;  %v779_v19 = vsel %vm778_vm2, %v4292_v17, %v777_v61  ;;  %v1134_v30 = vmul.f32 0.5, %v1133_v9  ;;  %v922_v6 = vsub.f32 %v3923_v26, %v4197_v28  ;;  %v925_v34 = vmul.f32 %v916_v18, %v916_v18  ;;  %3474 = vmatmul.msk.f32.gmra.mxu0 %vm166_vm0, %v4430_v21 }
  0x74   :  { %v782_v8 = vsel %vm780_vm7, %v781_v13, %v779_v19  ;;  %v1300_v22 = vmul.f32 %v3669_v25, %v4370_v27  ;;  %v1607_v50 = vmul.f32 %v1598_v20, %v1598_v20  ;;  %v1613_v2 = vmul.f32 %v1601_v3, %v1601_v3 }
  0x75   :  { %v807_v24 = vmul.f32 %v3959_v11, %v782_v8  ;;  %v1135_v39 = vsub.f32 1.5, %v1134_v30  ;;  %3670 = vrsqrt.f32 %v4425_v43  ;;  %vm1138_vm8 = vcmp.eq.f32.partialorder %v4343_v57, inf }
  0x76   :  { %v1301_v52 = vmul.f32 %v3669_v25, %v1300_v22  ;;  %v1610_v46 = vadd.f32 %v1607_v50, %v1604_v0  ;;  %v1141_v17 = vand.u32 2147483648, %v4343_v57  ;;  %v928_v47 = vmul.f32 %v919_v23, %v919_v23 }
  0x77   :  { %3493 = vmatmul.msk.f32.gmra.mxu3 %vm166_vm0, %v4143_v44  ;;  %v1136_v26 = vmul.f32 %v3667_v62, %v1135_v39  ;;  %v934_v4 = vmul.f32 %v922_v6, %v922_v6  ;;  %869 = vmatpush.msrb.mxu0 %v807_v24  ;;  %v915_v54 = vsub.f32 %v4450_v35, %v4180_v14  ;;  %v4457_v62 = vld [vmem:[%s6343_s0 + $0x18] sm:$0xff]  ;;  %vm1140_vm9 = vcmp.eq.f32.partialorder %v4343_v57, 0.0 }
  0x78   :  { %v1302_v56 = vmul.f32 0.5, %v1301_v52  ;;  %v4445_v7 = vadd.f32 %v1613_v2, %v1610_v46  ;;  %v918_v51 = vsub.f32 %v4457_v62, %v4187_v12  ;;  %3482 = vmatmul.msk.f32.gmra.mxu1 %vm166_vm0, %v4430_v21  ;;  %v931_v16 = vadd.f32 %v928_v47, %v925_v34  ;;  %v4472_v12 = vld [vmem:[%s6343_s0 + $0x30] sm:$0xff]  ;;  %v4497_v2 = vld [vmem:[%s6343_s0 + $0x8] sm:$0xff] }
  0x79   :  { %v1137_v13 = vmul.f32 %v1136_v26, %v4343_v57  ;;  %vm1306_vm11 = vcmp.eq.f32.partialorder %v4370_v27, inf  ;;  %v921_v61 = vsub.f32 %v4472_v12, %v4197_v28  ;;  %v924_v20 = vmul.f32 %v915_v54, %v915_v54  ;;  %v4509_v26 = vld [vmem:[%s6343_s0 + $0x20] sm:$0xff] }
  0x7a   :  { %3488 = vmatmul.msk.f32.gmra.mxu2 %vm166_vm0, %v4318_v37  ;;  %v1303_v14 = vsub.f32 1.5, %v1302_v56  ;;  %3672 = vrsqrt.f32 %v4445_v7  ;;  %v4479_v18 = vadd.f32 %v934_v4, %v931_v16  ;;  %v810_v3 = vsel %vm476_vm10, %v3989_v41, %v3981_v32 }
  0x7b   :  { %v3671_v9 = vpop.eup %3670  ;;  %v1139_v15 = vsel %vm1138_vm8, %v4343_v57, %v1137_v13  ;;  %v927_v30 = vmul.f32 %v918_v51, %v918_v51  ;;  %v1309_v28 = vand.u32 2147483648, %v4370_v27  ;;  %vm812_vm13 = vcmask 1047559  }
  0x7c   :  { %v1142_v0 = vsel %vm1140_vm9, %v1141_v17, %v1139_v15  ;;  %v1304_v23 = vmul.f32 %v3669_v25, %v1303_v14  ;;  %v1468_v19 = vmul.f32 %v3671_v9, %v4425_v43  ;;  %3674 = vrsqrt.f32 %v4479_v18 }
  0x7d   :  { %v1145_v6 = vmul.f32 %v3949_v63, %v1142_v0  ;;  %vm1308_vm14 = vcmp.eq.f32.partialorder %v4370_v27, 0.0  ;;  %v930_v22 = vadd.f32 %v927_v30, %v924_v20  ;;  %v933_v25 = vmul.f32 %v921_v61, %v921_v61 }
  0x7e   :  { %v1305_v57 = vmul.f32 %v1304_v23, %v4370_v27  ;;  %v1469_v8 = vmul.f32 %v3671_v9, %v1468_v19  ;;  %v811_v50 = vsel %vm644_vm12, %v3991_v42, %v810_v3  ;;  %v1084_v24 = vsub.f32 %v4497_v2, %v4277_v31 }
  0x7f   :  { %1203 = vmatpush.msrb.mxu2 %v1145_v6  ;;  %3494 = vmatmul.msk.f32.gmra.mxu3 %vm166_vm0, %v4239_v33  ;;  %v813_v46 = vsel %vm812_vm13, %v4003_v53, %v811_v50  ;;  %v1087_v17 = vsub.f32 %v4509_v26, %v4286_v1  ;;  %v4514_v56 = vadd.f32 %v933_v25, %v930_v22  ;;  %vm1474_vm15 = vcmp.eq.f32.partialorder %v4425_v43, inf }
  0x80   :  { %v3673_v39 = vpop.eup %3672  ;;  %v1307_v34 = vsel %vm1306_vm11, %v4370_v27, %v1305_v57  ;;  %v1470_v52 = vmul.f32 0.5, %v1469_v8  ;;  %815 = vst [vmem:[#allocation2 - $0x4] sm:$0xf0] %v813_v46  ;;  %v4519_v27 = vld [vmem:[%s6343_s0 + $0x38] sm:$0xff]  ;;  %v1093_v16 = vmul.f32 %v1084_v24, %v1084_v24  ;;  %vm1476_vm1 = vcmp.eq.f32.partialorder %v4425_v43, 0.0 }
  0x81   :  { %v1310_v47 = vsel %vm1308_vm14, %v1309_v28, %v1307_v34  ;;  %v1642_v4 = vmul.f32 %v3673_v39, %v4445_v7  ;;  %v1090_v54 = vsub.f32 %v4519_v27, %v4289_v60  ;;  %v1096_v14 = vmul.f32 %v1087_v17, %v1087_v17  ;;  %v4546_v34 = vld [vmem:[%s6345_s2] sm:$0xff] }
  0x82   :  { %v1313_v51 = vmul.f32 %v3949_v63, %v1310_v47  ;;  %v1471_v13 = vsub.f32 1.5, %v1470_v52  ;;  %3489 = vmatmul.msk.f32.gmra.mxu2 %vm166_vm0, %v4375_v49  ;;  %v3675_v61 = vpop.eup %3674  ;;  %3676 = vrsqrt.f32 %v4514_v56  ;;  %v1477_v3 = vand.u32 2147483648, %v4425_v43 }
  0x83   :  { %v1643_v15 = vmul.f32 %v3673_v39, %v1642_v4  ;;  %v952_v0 = vmul.f32 %v3675_v61, %v4479_v18  ;;  %v1099_v23 = vadd.f32 %v1096_v14, %v1093_v16  ;;  %v1102_v30 = vmul.f32 %v1090_v54, %v1090_v54 }
  0x84   :  { %1371 = vmatpush.msrb.mxu3 %v1313_v51  ;;  %v1472_v20 = vmul.f32 %v3671_v9, %v1471_v13  ;;  %v1252_v6 = vsub.f32 %v4497_v2, %v4305_v36  ;;  %v1255_v28 = vsub.f32 %v4509_v26, %v4321_v38  ;;  %vm1648_vm2 = vcmp.eq.f32.partialorder %v4445_v7, inf }
  0x85   :  { %v1644_v19 = vmul.f32 0.5, %v1643_v15  ;;  %v953_v8 = vmul.f32 %v3675_v61, %v952_v0  ;;  %v1258_v9 = vsub.f32 %v4519_v27, %v4324_v40  ;;  %v4541_v25 = vadd.f32 %v1102_v30, %v1099_v23 }
  0x86   :  { %v1473_v57 = vmul.f32 %v1472_v20, %v4425_v43  ;;  %v1261_v50 = vmul.f32 %v1252_v6, %v1252_v6  ;;  %v1264_v24 = vmul.f32 %v1255_v28, %v1255_v28  ;;  %v1420_v47 = vsub.f32 %v4497_v2, %v4332_v55 }
  0x87   :  { %v1645_v22 = vsub.f32 1.5, %v1644_v19  ;;  %3495 = vmatmul.msk.f32.gmra.mxu3 %vm166_vm0, %v4274_v59  ;;  %v954_v46 = vmul.f32 0.5, %v953_v8  ;;  %v827_v17 = vld [vmem:[#allocation2] sm:$0xff]  ;;  %v1423_v4 = vsub.f32 %v4509_v26, %v4364_v29  ;;  %3678 = vrsqrt.f32 %v4541_v25 }
  0x88   :  { %v1475_v52 = vsel %vm1474_vm15, %v4425_v43, %v1473_v57  ;;  %v3677_v54 = vpop.eup %3676  ;;  %870 = vmatpush.msrb.mxu0 %v827_v17  ;;  %983 = vst [vmem:[#allocation2 + $0x3] sm:$0x1] %v4003_v53  ;;  %v1270_v16 = vmul.f32 %v1258_v9, %v1258_v9  ;;  %vm1650_vm7 = vcmp.eq.f32.partialorder %v4445_v7, 0.0  ;;  %vm958_vm8 = vcmp.eq.f32.partialorder %v4479_v18, inf }
  0x89   :  { %v1478_v51 = vsel %vm1476_vm1, %v1477_v3, %v1475_v52  ;;  %v1646_v13 = vmul.f32 %v3673_v39, %v1645_v22  ;;  %v955_v15 = vsub.f32 1.5, %v954_v46  ;;  %v940_v20 = vmul.f32 %v3677_v54, %v4514_v56  ;;  %3499 = vmatmul.msk.f32.vlgmr.msrb.gmra.mxu0 %vm166_vm0, %v4546_v34  ;;  %v4586_v52 = vld [vmem:[%s6345_s2 + $0x8] sm:$0xff] }
  0x8a   :  { %v1481_v14 = vmul.f32 %v3949_v63, %v1478_v51  ;;  %3490 = vmatmul.msk.f32.gmra.mxu2 %vm166_vm0, %v4430_v21  ;;  %v1267_v39 = vadd.f32 %v1264_v24, %v1261_v50  ;;  %v1426_v3 = vsub.f32 %v4519_v27, %v4367_v48  ;;  %v1429_v19 = vmul.f32 %v1420_v47, %v1420_v47 }
  0x8b   :  { %v1647_v43 = vmul.f32 %v1646_v13, %v4445_v7  ;;  %v956_v0 = vmul.f32 %v3675_v61, %v955_v15  ;;  %v941_v23 = vmul.f32 %v3677_v54, %v940_v20  ;;  %v1432_v30 = vmul.f32 %v1423_v4, %v1423_v4 }
  0x8c   :  { %1545 = vmatpush.msra.mxu0 %v1481_v14  ;;  %vm960_vm9 = vcmp.eq.f32.partialorder %v4479_v18, 0.0  ;;  %v961_v6 = vand.u32 2147483648, %v4479_v18  ;;  %v4572_v28 = vadd.f32 %v1270_v16, %v1267_v39  ;;  %v1438_v57 = vmul.f32 %v1426_v3, %v1426_v3 }
  0x8d   :  { %v957_v8 = vmul.f32 %v956_v0, %v4479_v18  ;;  %v942_v9 = vmul.f32 0.5, %v941_v23  ;;  %v1435_v22 = vadd.f32 %v1432_v30, %v1429_v19  ;;  %v1083_v50 = vsub.f32 %v4450_v35, %v4277_v31  ;;  %v3679_v24 = vpop.eup %3678 }
  0x8e   :  { %v1651_v61 = vand.u32 2147483648, %v4445_v7  ;;  %vm946_vm11 = vcmp.eq.f32.partialorder %v4514_v56, inf  ;;  %vm948_vm14 = vcmp.eq.f32.partialorder %v4514_v56, 0.0  ;;  %3680 = vrsqrt.f32 %v4572_v28 }
  0x8f   :  { %3496 = vmatmul.msk.f32.gmra.mxu3 %vm166_vm0, %v4318_v37  ;;  %v1649_v31 = vsel %vm1648_vm2, %v4445_v7, %v1647_v43  ;;  %v959_v46 = vsel %vm958_vm8, %v4479_v18, %v957_v8  ;;  %v943_v17 = vsub.f32 1.5, %v942_v9  ;;  %v1120_v47 = vmul.f32 %v3679_v24, %v4541_v25 }
  0x90   :  { %v962_v4 = vsel %vm960_vm9, %v961_v6, %v959_v46  ;;  %v4597_v51 = vadd.f32 %v1438_v57, %v1435_v22  ;;  %v1086_v13 = vsub.f32 %v4457_v62, %v4286_v1  ;;  %v1089_v16 = vsub.f32 %v4472_v12, %v4289_v60 }
  0x91   :  { %v976_v14 = vmul.f32 %v3955_v10, %v962_v4  ;;  %v944_v15 = vmul.f32 %v3677_v54, %v943_v17  ;;  %v1121_v20 = vmul.f32 %v3679_v24, %v1120_v47  ;;  %v1092_v43 = vmul.f32 %v1083_v50, %v1083_v50  ;;  %3500 = vmatmul.msk.f32.gmra.mxu0 %vm166_vm0, %v4586_v52 }
  0x92   :  { %v1652_v18 = vsel %vm1650_vm7, %v1651_v61, %v1649_v31  ;;  %v949_v39 = vand.u32 2147483648, %v4514_v56  ;;  %vm1126_vm15 = vcmp.eq.f32.partialorder %v4541_v25, inf  ;;  %3682 = vrsqrt.f32 %v4597_v51 }
  0x93   :  { %v945_v1 = vmul.f32 %v944_v15, %v4514_v56  ;;  %v1122_v60 = vmul.f32 0.5, %v1121_v20  ;;  %1036 = vmatpush.msrb.mxu1 %v976_v14  ;;  %v1095_v3 = vmul.f32 %v1086_v13, %v1086_v13  ;;  %v1101_v54 = vmul.f32 %v1089_v16, %v1089_v16 }
  0x94   :  { %v3681_v0 = vpop.eup %3680  ;;  %v978_v23 = vsel %vm644_vm12, %v3989_v41, %v3981_v32  ;;  %v1251_v7 = vsub.f32 %v4450_v35, %v4305_v36  ;;  %v1254_v19 = vsub.f32 %v4457_v62, %v4321_v38  ;;  %v1257_v30 = vsub.f32 %v4472_v12, %v4324_v40 }
  0x95   :  { %v947_v6 = vsel %vm946_vm11, %v4514_v56, %v945_v1  ;;  %v1123_v57 = vsub.f32 1.5, %v1122_v60  ;;  %v1288_v8 = vmul.f32 %v3681_v0, %v4572_v28  ;;  %v1098_v9 = vadd.f32 %v1095_v3, %v1092_v43 }
  0x96   :  { %v950_v22 = vsel %vm948_vm14, %v949_v39, %v947_v6  ;;  %v979_v36 = vsel %vm812_vm13, %v3991_v42, %v978_v23  ;;  %v1260_v38 = vmul.f32 %v1251_v7, %v1251_v7  ;;  %v1263_v50 = vmul.f32 %v1254_v19, %v1254_v19 }
  0x97   :  { %3497 = vmatmul.msk.f32.gmra.mxu3 %vm166_vm0, %v4375_v49  ;;  %v975_v40 = vmul.f32 %v3959_v11, %v950_v22  ;;  %v1124_v61 = vmul.f32 %v3679_v24, %v1123_v57  ;;  %v1289_v31 = vmul.f32 %v3681_v0, %v1288_v8  ;;  %v4632_v46 = vadd.f32 %v1101_v54, %v1098_v9 }
  0x98   :  { %982 = vst [vmem:[#allocation2 - $0x5] sm:$0xe0] %v979_v36  ;;  %v3683_v17 = vpop.eup %3682  ;;  %vm1128_vm1 = vcmp.eq.f32.partialorder %v4541_v25, 0.0  ;;  %v1129_v56 = vand.u32 2147483648, %v4541_v25  ;;  %v1266_v47 = vadd.f32 %v1263_v50, %v1260_v38  ;;  %v1269_v4 = vmul.f32 %v1257_v30, %v1257_v30 }
  0x99   :  { %v1125_v13 = vmul.f32 %v1124_v61, %v4541_v25  ;;  %v1290_v16 = vmul.f32 0.5, %v1289_v31  ;;  %v1456_v14 = vmul.f32 %v3683_v17, %v4597_v51  ;;  %1037 = vmatpush.msrb.mxu1 %v975_v40  ;;  %3684 = vrsqrt.f32 %v4632_v46  ;;  %3501 = vmatmul.msk.f32.gmra.mxu0 %vm166_vm0, %v4143_v44 }
  0x9a   :  { %v1655_v24 = vmul.f32 %v3949_v63, %v1652_v18  ;;  %v4642_v15 = vadd.f32 %v1269_v4, %v1266_v47  ;;  %v1419_v1 = vsub.f32 %v4450_v35, %v4332_v55  ;;  %vm1294_vm2 = vcmp.eq.f32.partialorder %v4572_v28, inf }
  0x9b   :  { %v1127_v20 = vsel %vm1126_vm15, %v4541_v25, %v1125_v13  ;;  %v1291_v43 = vsub.f32 1.5, %v1290_v16  ;;  %v1457_v39 = vmul.f32 %v3683_v17, %v1456_v14  ;;  %v1146_v44 = vsel %vm812_vm13, %v3989_v41, %v3981_v32 }
  0x9c   :  { %v1130_v60 = vsel %vm1128_vm1, %v1129_v56, %v1127_v20  ;;  %3686 = vrsqrt.f32 %v4642_v15  ;;  %v1147_v23 = vsel %vm141_vm3, %v4003_v53, %v3991_v42  ;;  %v1297_v55 = vand.u32 2147483648, %v4572_v28 }
  0x9d   :  { %v1144_v18 = vmul.f32 %v3955_v10, %v1130_v60  ;;  %v1292_v3 = vmul.f32 %v3681_v0, %v1291_v43  ;;  %v1458_v54 = vmul.f32 0.5, %v1457_v39  ;;  %v1422_v7 = vsub.f32 %v4457_v62, %v4364_v29 }
  0x9e   :  { %v1425_v19 = vsub.f32 %v4472_v12, %v4367_v48  ;;  %v1428_v30 = vmul.f32 %v1419_v1, %v1419_v1  ;;  %vm1296_vm7 = vcmp.eq.f32.partialorder %v4572_v28, 0.0  ;;  %vm1462_vm8 = vcmp.eq.f32.partialorder %v4597_v51, inf }
  0x9f   :  { %v995_v25 = vld [vmem:[#allocation2] sm:$0xff]  ;;  %3498 = vmatmul.msk.f32.gmra.mxu3 %vm166_vm0, %v4430_v21  ;;  %v3685_v6 = vpop.eup %3684  ;;  %1204 = vmatpush.msrb.mxu2 %v1144_v18  ;;  %v1293_v0 = vmul.f32 %v1292_v3, %v4572_v28  ;;  %v1459_v57 = vsub.f32 1.5, %v1458_v54  ;;  %v1431_v29 = vmul.f32 %v1422_v7, %v1422_v7  ;;  %vm1464_vm9 = vcmp.eq.f32.partialorder %v4597_v51, 0.0 }
  0xa0   :  { %1038 = vmatpush.msrb.mxu1 %v995_v25  ;;  %1150 = vst [vmem:[#allocation2 - $0x6] sm:$0xc0] %v1146_v44  ;;  %v1108_v8 = vmul.f32 %v3685_v6, %v4632_v46  ;;  %v1437_v9 = vmul.f32 %v1425_v19, %v1425_v19  ;;  %v1465_v50 = vand.u32 2147483648, %v4597_v51  ;;  %v1314_v47 = vsel %vm141_vm3, %v3991_v42, %v3989_v41  ;;  %v4726_v19 = vld [vmem:[%s6343_s0 + $0x10] sm:$0xff] }
  0xa1   :  { %3507 = vmatmul.msk.f32.vlgmr.msrb.gmra.mxu1 %vm166_vm0, %v4546_v34  ;;  %1151 = vst [vmem:[#allocation2 + $0x2] sm:$0x3] %v1147_v23  ;;  %v1295_v48 = vsel %vm1294_vm2, %v4572_v28, %v1293_v0  ;;  %v1460_v22 = vmul.f32 %v3683_v17, %v1459_v57  ;;  %3502 = vmatmul.msk.f32.gmra.mxu0 %vm166_vm0, %v4239_v33  ;;  %vm1114_vm11 = vcmp.eq.f32.partialorder %v4632_v46, inf  ;;  %vm1116_vm14 = vcmp.eq.f32.partialorder %v4632_v46, 0.0  ;;  %v4741_v57 = vld [vmem:[%s6343_s0 + $0x40] sm:$0xff] }
  0xa2   :  { %1712 = vmatpush.msra.mxu1 %v1655_v24  ;;  %v3687_v36 = vpop.eup %3686  ;;  %v1298_v38 = vsel %vm1296_vm7, %v1297_v55, %v1295_v48  ;;  %v1109_v40 = vmul.f32 %v3685_v6, %v1108_v8  ;;  %v1434_v61 = vadd.f32 %v1431_v29, %v1428_v30  ;;  %v1315_v20 = vsel %vm144_vm4, %v4003_v53, %v1314_v47 }
  0xa3   :  { %v1312_v31 = vmul.f32 %v3955_v10, %v1298_v38  ;;  %v1461_v17 = vmul.f32 %v1460_v22, %v4597_v51  ;;  %v1276_v56 = vmul.f32 %v3687_v36, %v4642_v15  ;;  %v4712_v44 = vperm.slane %v4509_v26, 2 }
  0xa4   :  { %v1110_v4 = vmul.f32 0.5, %v1109_v40  ;;  %v4688_v13 = vadd.f32 %v1437_v9, %v1434_v61  ;;  %v4715_v18 = vperm.slane %v4519_v27, 2  ;;  %vm1282_vm15 = vcmp.eq.f32.partialorder %v4642_v15, inf }
  0xa5   :  { %1372 = vmatpush.msrb.mxu3 %v1312_v31  ;;  %v1463_v28 = vsel %vm1462_vm8, %v4597_v51, %v1461_v17  ;;  %v1277_v16 = vmul.f32 %v3687_v36, %v1276_v56  ;;  %v1117_v51 = vand.u32 2147483648, %v4632_v46  ;;  %vm1284_vm1 = vcmp.eq.f32.partialorder %v4642_v15, 0.0 }
  0xa6   :  { %v1466_v14 = vsel %vm1464_vm9, %v1465_v50, %v1463_v28  ;;  %v1111_v24 = vsub.f32 1.5, %v1110_v4  ;;  %3688 = vrsqrt.f32 %v4688_v13  ;;  %v1285_v23 = vand.u32 2147483648, %v4642_v15  ;;  %v3763_v50 = vld [vmem:[%s6345_s2 + $0x10] sm:$0xff] }
  0xa7   :  { %v1480_v41 = vmul.f32 %v3955_v10, %v1466_v14  ;;  %v1278_v42 = vmul.f32 0.5, %v1277_v16  ;;  %v1768_v8 = vsub.f32 %v4741_v57, %v4715_v18  ;;  %v4746_v29 = vperm.slane %v4497_v2, 3 }
  0xa8   :  { %v1163_v43 = vld [vmem:[#allocation2] sm:$0xff]  ;;  %v1112_v39 = vmul.f32 %v3685_v6, %v1111_v24  ;;  %v4734_v6 = vld [vmem:[%s6343_s0 + $0x28] sm:$0xff]  ;;  %v4759_v31 = vperm.slane %v4519_v27, 3  ;;  %vm1450_vm2 = vcmp.eq.f32.partialorder %v4688_v13, inf  ;;  %vm1452_vm7 = vcmp.eq.f32.partialorder %v4688_v13, 0.0 }
  0xa9   :  { %1318 = vst [vmem:[#allocation2 - $0x7] sm:$0x80] %v3981_v32  ;;  %3508 = vmatmul.msk.f32.gmra.mxu1 %vm166_vm0, %v4586_v52  ;;  %v1279_v1 = vsub.f32 1.5, %v1278_v42  ;;  %3503 = vmatmul.msk.f32.gmra.mxu0 %vm166_vm0, %v4274_v59  ;;  %v4709_v32 = vperm.slane %v4497_v2, 2  ;;  %v1765_v0 = vsub.f32 %v4734_v6, %v4712_v44  ;;  %v1780_v61 = vmul.f32 %v1768_v8, %v1768_v8 }
  0xaa   :  { %1319 = vst [vmem:[#allocation2 + $0x1] sm:$0x7] %v1315_v20  ;;  %v1113_v53 = vmul.f32 %v1112_v39, %v4632_v46  ;;  %1546 = vmatpush.msra.mxu0 %v1480_v41  ;;  %v1935_v16 = vsub.f32 %v4741_v57, %v4759_v31  ;;  %v4775_v41 = vperm.slane %v4497_v2, 4  ;;  %v4780_v39 = vperm.slane %v4509_v26, 4 }
  0xab   :  { %v1280_v60 = vmul.f32 %v3687_v36, %v1279_v1  ;;  %v1762_v30 = vsub.f32 %v4726_v19, %v4709_v32  ;;  %v4750_v36 = vperm.slane %v4509_v26, 3  ;;  %v1774_v40 = vmul.f32 %v1765_v0, %v1765_v0 }
  0xac   :  { %v3689_v3 = vpop.eup %3688  ;;  %v1115_v54 = vsel %vm1114_vm11, %v4632_v46, %v1113_v53  ;;  %v4808_v8 = vperm.slane %v4509_v26, 5 }
  0xad   :  { %v1118_v55 = vsel %vm1116_vm14, %v1117_v51, %v1115_v54  ;;  %v1281_v25 = vmul.f32 %v1280_v60, %v4642_v15  ;;  %v1444_v7 = vmul.f32 %v3689_v3, %v4688_v13  ;;  %v1771_v22 = vmul.f32 %v1762_v30, %v1762_v30 }
  0xae   :  { %v1143_v46 = vmul.f32 %v3959_v11, %v1118_v55  ;;  %v1932_v47 = vsub.f32 %v4734_v6, %v4750_v36  ;;  %v4783_v51 = vperm.slane %v4519_v27, 4  ;;  %v2096_v60 = vsub.f32 %v4726_v19, %v4775_v41 }
  0xaf   :  { %v1283_v9 = vsel %vm1282_vm15, %v4642_v15, %v1281_v25  ;;  %v1445_v48 = vmul.f32 %v3689_v3, %v1444_v7  ;;  %v1929_v15 = vsub.f32 %v4726_v19, %v4746_v29  ;;  %v1777_v28 = vadd.f32 %v1774_v40, %v1771_v22 }
  0xb0   :  { %1205 = vmatpush.msrb.mxu2 %v1143_v46  ;;  %v1286_v38 = vsel %vm1284_vm1, %v1285_v23, %v1283_v9  ;;  %v1941_v20 = vmul.f32 %v1932_v47, %v1932_v47  ;;  %v4788_v54 = vperm.slane %v4497_v2, 5  ;;  %v1453_v23 = vand.u32 2147483648, %v4688_v13 }
  0xb1   :  { %3509 = vmatmul.msk.f32.gmra.mxu1 %vm166_vm0, %v3763_v50  ;;  %v1311_v17 = vmul.f32 %v3959_v11, %v1286_v38  ;;  %v1446_v56 = vmul.f32 0.5, %v1445_v48  ;;  %3504 = vmatmul.msk.f32.gmra.mxu0 %vm166_vm0, %v4318_v37  ;;  %v1331_v4 = vld [vmem:[#allocation2] sm:$0xff]  ;;  %v1938_v24 = vmul.f32 %v1929_v15, %v1929_v15  ;;  %v4777_v42 = vadd.f32 %v1780_v61, %v1777_v28 }
  0xb2   :  { %1206 = vmatpush.msrb.mxu2 %v1163_v43  ;;  %v1947_v43 = vmul.f32 %v1935_v16, %v1935_v16  ;;  %v1594_v55 = vsub.f32 %v4497_v2, %v4387_v45  ;;  %v2099_v30 = vsub.f32 %v4734_v6, %v4780_v39  ;;  %v2102_v46 = vsub.f32 %v4741_v57, %v4783_v51 }
  0xb3   :  { %3515 = vmatmul.msk.f32.vlgmr.msrb.gmra.mxu2 %vm166_vm0, %v4546_v34  ;;  %1373 = vmatpush.msrb.mxu3 %v1311_v17  ;;  %v1447_v14 = vsub.f32 1.5, %v1446_v56  ;;  %v1944_v53 = vadd.f32 %v1941_v20, %v1938_v24  ;;  %3690 = vrsqrt.f32 %v4777_v42  ;;  %v2105_v0 = vmul.f32 %v2096_v60, %v2096_v60 }
  0xb4   :  { %v4811_v9 = vperm.slane %v4519_v27, 5  ;;  %v2263_v48 = vsub.f32 %v4726_v19, %v4788_v54  ;;  %v2108_v38 = vmul.f32 %v2099_v30, %v2099_v30  ;;  %v2114_v50 = vmul.f32 %v2102_v46, %v2102_v46  ;;  %v4846_v30 = vld [vmem:[%s6345_s2 + $0x10] sm:$0xff] }
  0xb5   :  { %v1448_v1 = vmul.f32 %v3689_v3, %v1447_v14  ;;  %1374 = vmatpush.msrb.mxu3 %v1331_v4  ;;  %v1597_v3 = vsub.f32 %v4509_v26, %v4402_v58  ;;  %v4799_v7 = vadd.f32 %v1947_v43, %v1944_v53  ;;  %v2266_v61 = vsub.f32 %v4734_v6, %v4808_v8 }
  0xb6   :  { %3523 = vmatmul.msk.f32.vlgmr.msrb.gmra.mxu3 %vm166_vm0, %v4546_v34  ;;  %v2269_v17 = vsub.f32 %v4741_v57, %v4811_v9  ;;  %v2272_v56 = vmul.f32 %v2263_v48, %v2263_v48  ;;  %v2111_v47 = vadd.f32 %v2108_v38, %v2105_v0  ;;  %v1603_v4 = vmul.f32 %v1594_v55, %v1594_v55 }
  0xb7   :  { %v1449_v25 = vmul.f32 %v1448_v1, %v4688_v13  ;;  %3692 = vrsqrt.f32 %v4799_v7  ;;  %v1606_v28 = vmul.f32 %v1597_v3, %v1597_v3  ;;  %v2275_v14 = vmul.f32 %v2266_v61, %v2266_v61 }
  0xb8   :  { %v2281_v24 = vmul.f32 %v2269_v17, %v2269_v17  ;;  %v4835_v20 = vadd.f32 %v2114_v50, %v2111_v47  ;;  %v1593_v53 = vsub.f32 %v4450_v35, %v4387_v45  ;;  %v1596_v55 = vsub.f32 %v4457_v62, %v4402_v58  ;;  %v39_v17 = vld [vmem:[%s6343_s0 + $0x50] sm:$0xff] }
  0xb9   :  { %3510 = vmatmul.msk.f32.gmra.mxu1 %vm166_vm0, %v4239_v33  ;;  %v1451_v22 = vsel %vm1450_vm2, %v4688_v13, %v1449_v25  ;;  %3505 = vmatmul.msk.f32.gmra.mxu0 %vm166_vm0, %v4375_v49  ;;  %v3691_v15 = vpop.eup %3690  ;;  %v1600_v13 = vsub.f32 %v4519_v27, %v4405_v5  ;;  %v1609_v43 = vadd.f32 %v1606_v28, %v1603_v4  ;;  %vm1815_vm8 = vcmp.eq.f32.partialorder %v4777_v42, inf }
  0xba   :  { %v1454_v33 = vsel %vm1452_vm7, %v1453_v23, %v1451_v22  ;;  %v1809_v16 = vmul.f32 %v3691_v15, %v4777_v42  ;;  %v2278_v25 = vadd.f32 %v2275_v14, %v2272_v56  ;;  %v1599_v3 = vsub.f32 %v4472_v12, %v4405_v5 }
  0xbb   :  { %v1479_v40 = vmul.f32 %v3959_v11, %v1454_v33  ;;  %3516 = vmatmul.msk.f32.gmra.mxu2 %vm166_vm0, %v4586_v52  ;;  %v1612_v1 = vmul.f32 %v1600_v13, %v1600_v13  ;;  %3694 = vrsqrt.f32 %v4835_v20  ;;  %v1602_v48 = vmul.f32 %v1593_v53, %v1593_v53 }
  0xbc   :  { %v1810_v23 = vmul.f32 %v3691_v15, %v1809_v16  ;;  %v4852_v0 = vadd.f32 %v2281_v24, %v2278_v25  ;;  %v1605_v22 = vmul.f32 %v1596_v55, %v1596_v55  ;;  %vm1817_vm9 = vcmp.eq.f32.partialorder %v4777_v42, 0.0 }
  0xbd   :  { %1547 = vmatpush.msra.mxu0 %v1479_v40  ;;  %v3693_v60 = vpop.eup %3692  ;;  %v4856_v58 = vadd.f32 %v1612_v1, %v1609_v43  ;;  %v1818_v40 = vand.u32 2147483648, %v4777_v42  ;;  %vm1982_vm11 = vcmp.eq.f32.partialorder %v4799_v7, inf  ;;  %vm1984_vm14 = vcmp.eq.f32.partialorder %v4799_v7, 0.0 }
  0xbe   :  { %3524 = vmatmul.msk.f32.gmra.mxu3 %vm166_vm0, %v4586_v52  ;;  %v1976_v46 = vmul.f32 %v3693_v60, %v4799_v7  ;;  %v1811_v45 = vmul.f32 0.5, %v1810_v23  ;;  %3696 = vrsqrt.f32 %v4852_v0  ;;  %v1608_v61 = vadd.f32 %v1605_v22, %v1602_v48  ;;  %v3764_v48 = vld [vmem:[%s6345_s2 + $0x18] sm:$0xff] }
  0xbf   :  { %3698 = vrsqrt.f32 %v4856_v58  ;;  %v60_v13 = vmul.f32 %v4509_v26, %v3955_v10  ;;  %v1985_v28 = vand.u32 2147483648, %v4799_v7  ;;  %vm2149_vm15 = vcmp.eq.f32.partialorder %v4835_v20, inf }
  0xc0   :  { %v1977_v5 = vmul.f32 %v3693_v60, %v1976_v46  ;;  %v1812_v33 = vsub.f32 1.5, %v1811_v45  ;;  %v4886_v43 = vmul.f32 %v4497_v2, %v3955_v10  ;;  %v66_v1 = vmul.f32 %v3955_v10, %v39_v17 }
  0xc1   :  { %3511 = vmatmul.msk.f32.gmra.mxu1 %vm166_vm0, %v4274_v59  ;;  %3506 = vmatmul.msk.f32.gmra.mxu0 %vm166_vm0, %v4430_v21  ;;  %v1611_v59 = vmul.f32 %v1599_v3, %v1599_v3  ;;  %v3695_v56 = vpop.eup %3694  ;;  %v4889_v53 = vrot.slane %v60_v13, 7  ;;  %vm2151_vm1 = vcmp.eq.f32.partialorder %v4835_v20, 0.0  ;;  %v2152_v45 = vand.u32 2147483648, %v4835_v20 }
  0xc2   :  { %v1978_v38 = vmul.f32 0.5, %v1977_v5  ;;  %v1813_v50 = vmul.f32 %v3691_v15, %v1812_v33  ;;  %v63_v15 = vmul.f32 %v4519_v27, %v3955_v10  ;;  %v2143_v16 = vmul.f32 %v3695_v56, %v4835_v20 }
  0xc3   :  { %3517 = vmatmul.msk.f32.gmra.mxu2 %vm166_vm0, %v4846_v30  ;;  %v4879_v14 = vadd.f32 %v1611_v59, %v1608_v61  ;;  %vm1636_vm2 = vcmp.eq.f32.partialorder %v4856_v58, inf  ;;  %v4918_v61 = vrot.slane %v66_v1, 5  ;;  %vm1638_vm7 = vcmp.eq.f32.partialorder %v4856_v58, 0.0 }
  0xc4   :  { %v1979_v47 = vsub.f32 1.5, %v1978_v38  ;;  %v1814_v4 = vmul.f32 %v1813_v50, %v4777_v42  ;;  %v3697_v23 = vpop.eup %3696  ;;  %v2144_v55 = vmul.f32 %v3695_v56, %v2143_v16 }
  0xc5   :  { %3700 = vrsqrt.f32 %v4879_v14  ;;  %v2310_v5 = vmul.f32 %v3697_v23, %v4852_v0 }
  0xc6   :  { %3525 = vmatmul.msk.f32.gmra.mxu3 %vm166_vm0, %v4846_v30  ;;  %v1980_v24 = vmul.f32 %v3693_v60, %v1979_v47  ;;  %v1816_v25 = vsel %vm1815_vm8, %v4777_v42, %v1814_v4  ;;  %v3699_v60 = vpop.eup %3698  ;;  %v2145_v33 = vmul.f32 0.5, %v2144_v55  ;;  %v1761_v42 = vsub.f32 %v4497_v2, %v4709_v32 }
  0xc7   :  { %v1819_v3 = vsel %vm1817_vm9, %v1818_v40, %v1816_v25  ;;  %v1630_v59 = vmul.f32 %v3699_v60, %v4856_v58  ;;  %v2311_v50 = vmul.f32 %v3697_v23, %v2310_v5  ;;  %v1487_v40 = vsel %vm141_vm3, %v4889_v53, %v4886_v43 }
  0xc8   :  { %v1981_v46 = vmul.f32 %v1980_v24, %v4799_v7  ;;  %v1822_v22 = vmul.f32 %v3949_v63, %v1819_v3  ;;  %v2146_v47 = vsub.f32 1.5, %v2145_v33  ;;  %v4926_v24 = vpop.f32.mrf.mxu0  ;;  %v1764_v25 = vsub.f32 %v4509_v26, %v4712_v44 }
  0xc9   :  { %3512 = vmatmul.msk.f32.gmra.mxu1 %vm166_vm0, %v4318_v37  ;;  %v4896_v37 = vrot.slane %v63_v15, 6  ;;  %v1631_v13 = vmul.f32 %v3699_v60, %v1630_v59  ;;  %v2312_v16 = vmul.f32 0.5, %v2311_v50  ;;  %v1767_v3 = vsub.f32 %v4519_v27, %v4715_v18 }
  0xca   :  { %v1983_v38 = vsel %vm1982_vm11, %v4799_v7, %v1981_v46  ;;  %1879 = vmatpush.msra.mxu2 %v1822_v22  ;;  %v1770_v46 = vmul.f32 %v1761_v42, %v1761_v42  ;;  %v1773_v22 = vmul.f32 %v1764_v25, %v1764_v25  ;;  %v1928_v33 = vsub.f32 %v4497_v2, %v4746_v29 }
  0xcb   :  { %3518 = vmatmul.msk.f32.gmra.mxu2 %vm166_vm0, %v3764_v48  ;;  %v1986_v17 = vsel %vm1984_vm14, %v1985_v28, %v1983_v38  ;;  %v1489_v15 = vsel %vm144_vm4, %v4896_v37, %v1487_v40  ;;  %v3701_v7 = vpop.eup %3700  ;;  %v2147_v28 = vmul.f32 %v3695_v56, %v2146_v47  ;;  %v1632_v55 = vmul.f32 0.5, %v1631_v13  ;;  %v3765_v47 = vld [vmem:[%s6345_s2 + $0x20] sm:$0xff] }
  0xcc   :  { %v1989_v4 = vmul.f32 %v3949_v63, %v1986_v17  ;;  %v1491_v1 = vsel %vm147_vm6, %v4918_v61, %v1489_v15  ;;  %v2313_v5 = vsub.f32 1.5, %v2312_v16  ;;  %v1779_v38 = vmul.f32 %v1767_v3, %v1767_v3  ;;  %v4955_v15 = vld [vmem:[%s6345_s2 + $0x20] sm:$0xff] }
  0xcd   :  { %1493 = vst [vmem:[#allocation2] sm:$0xf] %v1491_v1  ;;  %v2148_v59 = vmul.f32 %v2147_v28, %v4835_v20  ;;  %v1633_v56 = vsub.f32 1.5, %v1632_v55  ;;  %v1931_v50 = vsub.f32 %v4509_v26, %v4750_v36  ;;  %v1639_v42 = vand.u32 2147483648, %v4856_v58 }
  0xce   :  { %3526 = vmatmul.msk.f32.gmra.mxu3 %vm166_vm0, %v3764_v48  ;;  %v1618_v48 = vmul.f32 %v3701_v7, %v4879_v14  ;;  %v1776_v17 = vadd.f32 %v1773_v22, %v1770_v46  ;;  %v1937_v16 = vmul.f32 %v1928_v33, %v1928_v33  ;;  %v2314_v28 = vmul.f32 %v3697_v23, %v2313_v5  ;;  %v4977_v5 = vld [vmem:[%s6345_s2 + $0x28] sm:$0xff] }
  0xcf   :  { %2046 = vmatpush.msra.mxu3 %v1989_v4  ;;  %v2150_v13 = vsel %vm2149_vm15, %v4835_v20, %v2148_v59  ;;  %v1634_v4 = vmul.f32 %v3699_v60, %v1633_v56  ;;  %v1940_v1 = vmul.f32 %v1931_v50, %v1931_v50  ;;  %vm2316_vm8 = vcmp.eq.f32.partialorder %v4852_v0, inf }
  0xd0   :  { %v1619_v40 = vmul.f32 %v3701_v7, %v1618_v48  ;;  %v2153_v25 = vsel %vm2151_vm1, %v2152_v45, %v2150_v13  ;;  %v4959_v3 = vadd.f32 %v1779_v38, %v1776_v17  ;;  %vm1624_vm9 = vcmp.eq.f32.partialorder %v4879_v14, inf }
  0xd1   :  { %3513 = vmatmul.msk.f32.gmra.mxu1 %vm166_vm0, %v4375_v49  ;;  %v1934_v49 = vsub.f32 %v4519_v27, %v4759_v31  ;;  %v1635_v46 = vmul.f32 %v1634_v4, %v4856_v58  ;;  %v1943_v48 = vadd.f32 %v1940_v1, %v1937_v16  ;;  %v2156_v59 = vmul.f32 %v3949_v63, %v2153_v25 }
  0xd2   :  { %v1620_v55 = vmul.f32 0.5, %v1619_v40  ;;  %3702 = vrsqrt.f32 %v4959_v3  ;;  %v1627_v23 = vand.u32 2147483648, %v4879_v14  ;;  %v2315_v45 = vmul.f32 %v2314_v28, %v4852_v0 }
  0xd3   :  { %3519 = vmatmul.msk.f32.gmra.mxu2 %vm166_vm0, %v3765_v47  ;;  %v1946_v22 = vmul.f32 %v1934_v49, %v1934_v49  ;;  %v1637_v20 = vsel %vm1636_vm2, %v4856_v58, %v1635_v46  ;;  %v4983_v58 = vpop.f32.mrf.mxu0  ;;  %v2095_v17 = vsub.f32 %v4497_v2, %v4775_v41  ;;  %v2098_v49 = vsub.f32 %v4509_v26, %v4780_v39 }
  0xd4   :  { %v1621_v60 = vsub.f32 1.5, %v1620_v55  ;;  %v1505_v33 = vld [vmem:[#allocation2] sm:$0xff]  ;;  %v1640_v56 = vsel %vm1638_vm7, %v1639_v42, %v1637_v20  ;;  %v4994_v42 = vpop.f32.mrf.mxu1  ;;  %vm1626_vm11 = vcmp.eq.f32.partialorder %v4879_v14, 0.0  ;;  %vm2318_vm14 = vcmp.eq.f32.partialorder %v4852_v0, 0.0 }
  0xd5   :  { %1548 = vmatpush.msra.mxu0 %v1505_v33  ;;  %v4979_v50 = vadd.f32 %v1946_v22, %v1943_v48  ;;  %v1654_v40 = vmul.f32 %v3955_v10, %v1640_v56  ;;  %v2104_v2 = vmul.f32 %v2095_v17, %v2095_v17  ;;  %v2107_v47 = vmul.f32 %v2098_v49, %v2098_v49 }
  0xd6   :  { %3527 = vmatmul.msk.f32.gmra.mxu3 %vm166_vm0, %v4955_v15  ;;  %v1622_v38 = vmul.f32 %v3701_v7, %v1621_v60  ;;  %3531 = vmatmul.msk.f32.vlgmr.msra.gmra.mxu0 %vm166_vm0, %v4546_v34  ;;  %v2101_v7 = vsub.f32 %v4519_v27, %v4783_v51  ;;  %v2317_v27 = vsel %vm2316_vm8, %v4852_v0, %v2315_v45  ;;  %v2319_v4 = vand.u32 2147483648, %v4852_v0 }
  0xd7   :  { %3704 = vrsqrt.f32 %v4979_v50  ;;  %2213 = vmatpush.msrb.mxu0 %v2156_v59  ;;  %1713 = vmatpush.msra.mxu1 %v1654_v40  ;;  %v1760_v1 = vsub.f32 %v4450_v35, %v4709_v32  ;;  %v2110_v55 = vadd.f32 %v2107_v47, %v2104_v2  ;;  %v1763_v46 = vsub.f32 %v4457_v62, %v4712_v44  ;;  %v5029_v44 = vld [vmem:[%s6345_s2 + $0x30] sm:$0xff] }
  0xd8   :  { %v2113_v26 = vmul.f32 %v2101_v7, %v2101_v7  ;;  %v3703_v13 = vpop.eup %3702  ;;  %v1766_v22 = vsub.f32 %v4472_v12, %v4715_v18  ;;  %v1656_v33 = vsel %vm144_vm4, %v4889_v53, %v4886_v43  ;;  %v2320_v62 = vsel %vm2318_vm14, %v2319_v4, %v2317_v27  ;;  %v5056_v27 = vld [vmem:[%s6343_s0 + $0x18] sm:$0xff] }
  0xd9   :  { %3514 = vmatmul.msk.f32.gmra.mxu1 %vm166_vm0, %v4430_v21  ;;  %v1623_v21 = vmul.f32 %v1622_v38, %v4879_v14  ;;  %v1797_v28 = vmul.f32 %v3703_v13, %v4959_v3  ;;  %v1769_v59 = vmul.f32 %v1760_v1, %v1760_v1  ;;  %v1772_v32 = vmul.f32 %v1763_v46, %v1763_v46 }
  0xda   :  { %v5019_v60 = vadd.f32 %v2113_v26, %v2110_v55  ;;  %v1778_v18 = vmul.f32 %v1766_v22, %v1766_v22  ;;  %vm1803_vm15 = vcmp.eq.f32.partialorder %v4959_v3, inf  ;;  %vm1805_vm1 = vcmp.eq.f32.partialorder %v4959_v3, 0.0  ;;  %v5078_v22 = vld [vmem:[%s6345_s2 + $0x38] sm:$0xff] }
  0xdb   :  { %3520 = vmatmul.msk.f32.gmra.mxu2 %vm166_vm0, %v4977_v5  ;;  %v1625_v16 = vsel %vm1624_vm9, %v4879_v14, %v1623_v21  ;;  %v1798_v14 = vmul.f32 %v3703_v13, %v1797_v28  ;;  %v1806_v0 = vand.u32 2147483648, %v4959_v3  ;;  %v1775_v38 = vadd.f32 %v1772_v32, %v1769_v59  ;;  %v5042_v17 = vpop.f32.mrf.mxu0 }
  0xdc   :  { %v1628_v25 = vsel %vm1626_vm11, %v1627_v23, %v1625_v16  ;;  %v1657_v23 = vsel %vm147_vm6, %v4896_v37, %v1656_v33  ;;  %3706 = vrsqrt.f32 %v5019_v60  ;;  %v2323_v49 = vmul.f32 %v3949_v63, %v2320_v62  ;;  %v5047_v2 = vpop.f32.mrf.mxu1 }
  0xdd   :  { %v1653_v48 = vmul.f32 %v3959_v11, %v1628_v25  ;;  %v3705_v20 = vpop.eup %3704  ;;  %v1799_v45 = vmul.f32 0.5, %v1798_v14  ;;  %v1658_v40 = vsel %vm308_vm5, %v4918_v61, %v1657_v23  ;;  %v1927_v47 = vsub.f32 %v4450_v35, %v4746_v29  ;;  %v5085_v14 = vld [vmem:[%s6343_s0] sm:$0xff] }
  0xde   :  { %3528 = vmatmul.msk.f32.gmra.mxu3 %vm166_vm0, %v4977_v5  ;;  %v1964_v56 = vmul.f32 %v3705_v20, %v4979_v50  ;;  %3532 = vmatmul.msk.f32.gmra.mxu0 %vm166_vm0, %v4586_v52  ;;  %1660 = vst [vmem:[#allocation2 - $0x1] sm:$0x1e] %v1658_v40  ;;  %v5051_v26 = vadd.f32 %v1778_v18, %v1775_v38  ;;  %vm1970_vm2 = vcmp.eq.f32.partialorder %v4979_v50, inf  ;;  %vm1972_vm7 = vcmp.eq.f32.partialorder %v4979_v50, 0.0 }
  0xdf   :  { %1714 = vmatpush.msra.mxu1 %v1653_v48  ;;  %v1800_v7 = vsub.f32 1.5, %v1799_v45  ;;  %v1930_v4 = vsub.f32 %v5056_v27, %v4750_v36  ;;  %v1933_v16 = vsub.f32 %v4472_v12, %v4759_v31  ;;  %v1823_v1 = vsel %vm147_vm6, %v4889_v53, %v4886_v43  ;;  %v5099_v45 = vld [vmem:[%s6343_s0 + $0x30] sm:$0xff] }
  0xe0   :  { %v1965_v21 = vmul.f32 %v3705_v20, %v1964_v56  ;;  %v1936_v35 = vmul.f32 %v1927_v47, %v1927_v47  ;;  %v1824_v29 = vsel %vm308_vm5, %v4896_v37, %v1823_v1  ;;  %v1973_v55 = vand.u32 2147483648, %v4979_v50 }
  0xe1   :  { %v1801_v25 = vmul.f32 %v3703_v13, %v1800_v7  ;;  %3708 = vrsqrt.f32 %v5051_v26  ;;  %v1939_v13 = vmul.f32 %v1930_v4, %v1930_v4  ;;  %v1945_v46 = vmul.f32 %v1933_v16, %v1933_v16  ;;  %v5113_v16 = vpop.f32.mrf.mxu2 }
  0xe2   :  { %v1966_v28 = vmul.f32 0.5, %v1965_v21  ;;  %v3707_v12 = vpop.eup %3706  ;;  %v1825_v59 = vsel %vm476_vm10, %v4918_v61, %v1824_v29  ;;  %v2094_v32 = vsub.f32 %v5085_v14, %v4775_v41  ;;  %v2097_v33 = vsub.f32 %v5056_v27, %v4780_v39 }
  0xe3   :  { %3521 = vmatmul.msk.f32.gmra.mxu2 %vm166_vm0, %v5029_v44  ;;  %v1802_v36 = vmul.f32 %v1801_v25, %v4959_v3  ;;  %v2131_v48 = vmul.f32 %v3707_v12, %v5019_v60  ;;  %v1942_v23 = vadd.f32 %v1939_v13, %v1936_v35  ;;  %v2100_v41 = vsub.f32 %v5099_v45, %v4783_v51  ;;  %v5115_v1 = vpop.f32.mrf.mxu0 }
  0xe4   :  { %v1967_v31 = vsub.f32 1.5, %v1966_v28  ;;  %v2103_v40 = vmul.f32 %v2094_v32, %v2094_v32  ;;  %v2106_v7 = vmul.f32 %v2097_v33, %v2097_v33  ;;  %v5122_v35 = vpop.f32.mrf.mxu1  ;;  %vm2137_vm8 = vcmp.eq.f32.partialorder %v5019_v60, inf }
  0xe5   :  { %v1804_v62 = vsel %vm1803_vm15, %v4959_v3, %v1802_v36  ;;  %v2132_v56 = vmul.f32 %v3707_v12, %v2131_v48  ;;  %v1672_v38 = vld [vmem:[#allocation2] sm:$0xff]  ;;  %v5109_v47 = vadd.f32 %v1945_v46, %v1942_v23  ;;  %v5131_v36 = vld [vmem:[%s6345_s2 + $0x18] sm:$0xff]  ;;  %vm2139_vm9 = vcmp.eq.f32.partialorder %v5019_v60, 0.0 }
  0xe6   :  { %3529 = vmatmul.msk.f32.gmra.mxu3 %vm166_vm0, %v5029_v44  ;;  %v1968_v18 = vmul.f32 %v3705_v20, %v1967_v31  ;;  %3533 = vmatmul.msk.f32.gmra.mxu0 %vm166_vm0, %v4846_v30  ;;  %v1807_v39 = vsel %vm1805_vm1, %v1806_v0, %v1804_v62  ;;  %1827 = vst [vmem:[#allocation2 - $0x2] sm:$0x3c] %v1825_v59  ;;  %vm1791_vm11 = vcmp.eq.f32.partialorder %v5051_v26, inf  ;;  %vm1793_vm14 = vcmp.eq.f32.partialorder %v5051_v26, 0.0 }
  0xe7   :  { %v1821_v20 = vmul.f32 %v3955_v10, %v1807_v39  ;;  %1715 = vmatpush.msra.mxu1 %v1672_v38  ;;  %v3709_v4 = vpop.eup %3708  ;;  %v2133_v51 = vmul.f32 0.5, %v2132_v56  ;;  %v2109_v3 = vadd.f32 %v2106_v7, %v2103_v40  ;;  %v2112_v0 = vmul.f32 %v2100_v41, %v2100_v41 }
  0xe8   :  { %v1969_v21 = vmul.f32 %v1968_v18, %v4979_v50  ;;  %3539 = vmatmul.msk.f32.vlgmr.msra.gmra.mxu1 %vm166_vm0, %v4546_v34  ;;  %v1785_v28 = vmul.f32 %v3709_v4, %v5051_v26  ;;  %3710 = vrsqrt.f32 %v5109_v47  ;;  %v1794_v7 = vand.u32 2147483648, %v5051_v26 }
  0xe9   :  { %1880 = vmatpush.msra.mxu2 %v1821_v20  ;;  %2381 = vmatpush.msrb.mxu1 %v2323_v49  ;;  %v2134_v29 = vsub.f32 1.5, %v2133_v51  ;;  %v5134_v46 = vadd.f32 %v2112_v0, %v2109_v3  ;;  %v2140_v49 = vand.u32 2147483648, %v5019_v60  ;;  %vm1958_vm15 = vcmp.eq.f32.partialorder %v5109_v47, inf }
  0xea   :  { %v1971_v25 = vsel %vm1970_vm2, %v4979_v50, %v1969_v21  ;;  %v1786_v13 = vmul.f32 %v3709_v4, %v1785_v28  ;;  %v1990_v50 = vsel %vm308_vm5, %v4889_v53, %v4886_v43  ;;  %v5144_v59 = vpop.f32.mrf.mxu3  ;;  %v5159_v21 = vpop.f32.mrf.mxu2  ;;  %v5174_v28 = vld [vmem:[%s6343_s0 + $0x8] sm:$0xff]  ;;  %vm1960_vm1 = vcmp.eq.f32.partialorder %v5109_v47, 0.0 }
  0xeb   :  { %3522 = vmatmul.msk.f32.gmra.mxu2 %vm166_vm0, %v5078_v22  ;;  %v1974_v34 = vsel %vm1972_vm7, %v1973_v55, %v1971_v25  ;;  %v2135_v48 = vmul.f32 %v3707_v12, %v2134_v29  ;;  %3712 = vrsqrt.f32 %v5134_v46  ;;  %v1991_v33 = vsel %vm476_vm10, %v4896_v37, %v1990_v50  ;;  %v5161_v51 = vpop.f32.mrf.mxu0  ;;  %6370 = vst [vmem:[#allocation11_spill] sm:$0xff] %v5174_v28  ;;  %v5182_v29 = vld [vmem:[%s6343_s0 + $0x20] sm:$0xff] }
  0xec   :  { %v1988_v31 = vmul.f32 %v3955_v10, %v1974_v34  ;;  %v1787_v55 = vmul.f32 0.5, %v1786_v13  ;;  %v1992_v23 = vsel %vm644_vm12, %v4918_v61, %v1991_v33  ;;  %v5177_v34 = vperm.slane %v5174_v28, 6  ;;  %6371 = vst [vmem:[#allocation12_spill] sm:$0xff] %v5182_v29 }
  0xed   :  { %v2136_v32 = vmul.f32 %v2135_v48, %v5019_v60  ;;  %v1839_v12 = vld [vmem:[#allocation2] sm:$0xff]  ;;  %vm2125_vm2 = vcmp.eq.f32.partialorder %v5134_v46, inf  ;;  %vm2127_vm7 = vcmp.eq.f32.partialorder %v5134_v46, 0.0 }
  0xee   :  { %3530 = vmatmul.msk.f32.gmra.mxu3 %vm166_vm0, %v5078_v22  ;;  %3534 = vmatmul.msk.f32.gmra.mxu0 %vm166_vm0, %v5131_v36  ;;  %v3711_v62 = vpop.eup %3710  ;;  %v1788_v18 = vsub.f32 1.5, %v1787_v55  ;;  %1994 = vst [vmem:[#allocation2 - $0x3] sm:$0x78] %v1992_v23  ;;  %v5195_v55 = vld [vmem:[%s6343_s0 + $0x38] sm:$0xff]  ;;  %v2431_v33 = vsub.f32 %v4726_v19, %v5177_v34 }
  0xef   :  { %2047 = vmatpush.msra.mxu3 %v1988_v31  ;;  %v2138_v41 = vsel %vm2137_vm8, %v5019_v60, %v2136_v32  ;;  %v1952_v39 = vmul.f32 %v3711_v62, %v5109_v47  ;;  %v5185_v31 = vperm.slane %v5182_v29, 6  ;;  %6372 = vst [vmem:[#allocation13_spill] sm:$0xff] %v5195_v55  ;;  %v5198_v32 = vperm.slane %v5195_v55, 6 }
  0xf0   :  { %3540 = vmatmul.msk.f32.gmra.mxu1 %vm166_vm0, %v4586_v52  ;;  %v2141_v56 = vsel %vm2139_vm9, %v2140_v49, %v2138_v41  ;;  %v1789_v38 = vmul.f32 %v3709_v4, %v1788_v18  ;;  %v5165_v52 = vpop.f32.mrf.mxu1 }
  0xf1   :  { %v2155_v40 = vmul.f32 %v3955_v10, %v2141_v56  ;;  %v1953_v20 = vmul.f32 %v3711_v62, %v1952_v39  ;;  %v3713_v60 = vpop.eup %3712  ;;  %v2434_v41 = vsub.f32 %v4734_v6, %v5185_v31  ;;  %v5207_v39 = vperm.slane %v5174_v28, 7 }
  0xf2   :  { %v1790_v3 = vmul.f32 %v1789_v38, %v5051_v26  ;;  %v2119_v4 = vmul.f32 %v3713_v60, %v5134_v46  ;;  %v5190_v49 = vpop.f32.mrf.mxu3  ;;  %v1961_v56 = vand.u32 2147483648, %v5109_v47  ;;  %v2437_v38 = vsub.f32 %v4741_v57, %v5198_v32 }
  0xf3   :  { %v1954_v0 = vmul.f32 0.5, %v1953_v20  ;;  %2214 = vmatpush.msrb.mxu0 %v2155_v40  ;;  %v2440_v40 = vmul.f32 %v2431_v33, %v2431_v33 }
  0xf4   :  { %v1792_v25 = vsel %vm1791_vm11, %v5051_v26, %v1790_v3  ;;  %v2120_v48 = vmul.f32 %v3713_v60, %v2119_v4  ;;  %v2443_v3 = vmul.f32 %v2434_v41, %v2434_v41  ;;  %v2449_v4 = vmul.f32 %v2437_v38, %v2437_v38 }
  0xf5   :  { %v1795_v26 = vsel %vm1793_vm14, %v1794_v7, %v1792_v25  ;;  %v1955_v13 = vsub.f32 1.5, %v1954_v0  ;;  %v5213_v7 = vperm.slane %v5182_v29, 7  ;;  %v5217_v0 = vperm.slane %v5195_v55, 7 }
  0xf6   :  { %3535 = vmatmul.msk.f32.gmra.mxu0 %vm166_vm0, %v4955_v15  ;;  %v1820_v50 = vmul.f32 %v3959_v11, %v1795_v26  ;;  %v2121_v23 = vmul.f32 0.5, %v2120_v48  ;;  %v2599_v25 = vsub.f32 %v4726_v19, %v5207_v39  ;;  %v2446_v33 = vadd.f32 %v2443_v3, %v2440_v40 }
  0xf7   :  { %v1956_v18 = vmul.f32 %v3711_v62, %v1955_v13  ;;  %v3772_v13 = vld [vmem:[%s6345_s2] sm:$0xff]  ;;  %v2605_v38 = vsub.f32 %v4741_v57, %v5217_v0 }
  0xf8   :  { %3541 = vmatmul.msk.f32.gmra.mxu1 %vm166_vm0, %v4846_v30  ;;  %1881 = vmatpush.msra.mxu2 %v1820_v50  ;;  %v2122_v20 = vsub.f32 1.5, %v2121_v23  ;;  %v5229_v50 = vpop.f32.mrf.mxu2  ;;  %v2128_v23 = vand.u32 2147483648, %v5134_v46  ;;  %v5236_v41 = vpop.f32.mrf.mxu1 }
  0xf9   :  { %v1957_v62 = vmul.f32 %v1956_v18, %v5109_v47 }
  0xfa   :  { %1882 = vmatpush.msra.mxu2 %v1839_v12  ;;  %v2123_v48 = vmul.f32 %v3713_v60, %v2122_v20  ;;  %v5231_v12 = vpop.f32.mrf.mxu0  ;;  %v2602_v60 = vsub.f32 %v4734_v6, %v5213_v7  ;;  %v2608_v20 = vmul.f32 %v2599_v25, %v2599_v25 }
  0xfb   :  { %v1959_v26 = vsel %vm1958_vm15, %v5109_v47, %v1957_v62  ;;  %3547 = vmatmul.msk.f32.vlgmr.msra.gmra.mxu2 %vm166_vm0, %v3772_v13  ;;  %6373 = vst [vmem:[#allocation14_spill] sm:$0xff] %v5231_v12  ;;  %v5247_v47 = vadd.f32 %v2449_v4, %v2446_v33  ;;  %v5250_v13 = vperm.slane %v4726_v19, 0  ;;  %v232_v4 = vmax.f32 %v4926_v24, 0.0  ;;  %v5264_v33 = vpop.f32.mrf.mxu3 }
  0xfc   :  { %v1962_v18 = vsel %vm1960_vm1, %v1961_v56, %v1959_v26  ;;  %v2124_v40 = vmul.f32 %v2123_v48, %v5134_v46  ;;  %v2006_v56 = vld [vmem:[#allocation2] sm:$0xff]  ;;  %v2611_v3 = vmul.f32 %v2602_v60, %v2602_v60  ;;  %v2617_v26 = vmul.f32 %v2605_v38, %v2605_v38  ;;  %6375 = vst [vmem:[#allocation16_spill] sm:$0xff] %v5264_v33 }
  0xfd   :  { %v1987_v62 = vmul.f32 %v3959_v11, %v1962_v18  ;;  %v5258_v48 = vld [vmem:[%s6345_s2] sm:$0xff]  ;;  %3714 = vrsqrt.f32 %v5247_v47  ;;  %v5267_v60 = vperm.slane %v4734_v6, 0  ;;  %v5271_v38 = vperm.slane %v4741_v57, 0 }
  0xfe   :  { %3536 = vmatmul.msk.f32.gmra.mxu0 %vm166_vm0, %v4977_v5  ;;  %v2126_v10 = vsel %vm2125_vm2, %v5134_v46, %v2124_v40  ;;  %6374 = vst [vmem:[#allocation15_spill] sm:$0xff] %v5258_v48  ;;  %v2614_v18 = vadd.f32 %v2611_v3, %v2608_v20  ;;  %v5276_v40 = vperm.slane %v4726_v19, 1  ;;  %v392_v20 = vmax.f32 %v4994_v42, 0.0  ;;  %v3773_v3 = vld [vmem:[%s6345_s2 + $0x8] sm:$0xff] }
  0xff   :  { %2048 = vmatpush.msra.mxu3 %v1987_v62  ;;  %v2129_v25 = vsel %vm2127_vm7, %v2128_v23, %v2126_v10  ;;  %6376 = vst [vmem:[#allocation17_spill] sm:$0xff] %v5267_v60  ;;  %v2767_v62 = vsub.f32 %v4726_v19, %v5250_v13  ;;  %v2770_v24 = vsub.f32 %v4734_v6, %v5267_v60  ;;  %v5285_v23 = vperm.slane %v4734_v6, 1 }
 0x100   :  { %3542 = vmatmul.msk.f32.gmra.mxu1 %vm166_vm0, %v5131_v36  ;;  %v2154_v46 = vmul.f32 %v3959_v11, %v2129_v25  ;;  %6377 = vst [vmem:[#allocation18_spill] sm:$0xff] %v5271_v38  ;;  %v5280_v10 = vadd.f32 %v2617_v26, %v2614_v18  ;;  %v2773_v26 = vsub.f32 %v4741_v57, %v5271_v38  ;;  %v5302_v11 = vpop.f32.mrf.mxu2  ;;  %vm2484_vm8 = vcmp.eq.f32.partialorder %v5247_v47, inf }
 0x101   :  { %2049 = vmatpush.msra.mxu3 %v2006_v56  ;;  %6378 = vst [vmem:[#allocation19_spill] sm:$0xff] %v5276_v40  ;;  %v5288_v56 = vperm.slane %v4741_v57, 1  ;;  %v2776_v25 = vmul.f32 %v2767_v62, %v2767_v62  ;;  %v2941_v18 = vsub.f32 %v4726_v19, %v5276_v40  ;;  %v2779_v60 = vmul.f32 %v2770_v24, %v2770_v24  ;;  %v5312_v40 = vpop.f32.mrf.mxu1  ;;  %v5319_v24 = vld [vmem:[%s6345_s2 + $0x8] sm:$0xff] }
 0x102   :  { %3555 = vmatmul.msk.f32.vlgmr.msra.gmra.mxu3 %vm166_vm0, %v5258_v48  ;;  %6379 = vst [vmem:[#allocation20_spill] sm:$0xff] %v5285_v23  ;;  %2215 = vmatpush.msrb.mxu0 %v2154_v46  ;;  %3716 = vrsqrt.f32 %v5280_v10  ;;  %v5304_v12 = vpop.f32.mrf.mxu0  ;;  %v2944_v38 = vsub.f32 %v4734_v6, %v5285_v23  ;;  %v233_v19 = vmax.f32 %v4983_v58, 0.0  ;;  %v393_v46 = vmax.f32 %v5047_v2, 0.0 }
 0x103   :  { %6380 = vst [vmem:[#allocation21_spill] sm:$0xff] %v5288_v56  ;;  %3548 = vmatmul.msk.f32.gmra.mxu2 %vm166_vm0, %v3773_v3  ;;  %v3715_v42 = vpop.eup %3714  ;;  %v2785_v3 = vmul.f32 %v2773_v26, %v2773_v26  ;;  %v2947_v62 = vsub.f32 %v4741_v57, %v5288_v56  ;;  %v2950_v33 = vmul.f32 %v2941_v18, %v2941_v18  ;;  %v234_v58 = vmax.f32 %v5042_v17, 0.0  ;;  %v5333_v17 = vpop.f32.mrf.mxu3 }
 0x104   :  { %6381 = vst [vmem:[#allocation22_spill] sm:$0xff] %v5302_v11  ;;  %v2478_v48 = vmul.f32 %v3715_v42, %v5247_v47  ;;  %v400_v11 = vmax.f32 %v232_v4, %v392_v20  ;;  %v2782_v6 = vadd.f32 %v2779_v60, %v2776_v25  ;;  %v2953_v57 = vmul.f32 %v2944_v38, %v2944_v38 }
 0x105   :  { %6382 = vst [vmem:[#allocation23_spill] sm:$0xff] %v5304_v12  ;;  %v560_v12 = vmax.f32 %v5113_v16, 0.0  ;;  %v394_v2 = vmax.f32 %v5122_v35, 0.0  ;;  %v2959_v56 = vmul.f32 %v2947_v62, %v2947_v62  ;;  %v2262_v16 = vsub.f32 %v5174_v28, %v4788_v54 }
 0x106   :  { %3537 = vmatmul.msk.f32.gmra.mxu0 %vm166_vm0, %v5029_v44  ;;  %6383 = vst [vmem:[#allocation24_spill] sm:$0xff] %v5312_v40  ;;  %v2479_v26 = vmul.f32 %v3715_v42, %v2478_v48  ;;  %v5325_v18 = vadd.f32 %v2785_v3, %v2782_v6  ;;  %v2956_v4 = vadd.f32 %v2953_v57, %v2950_v33  ;;  %v235_v33 = vmax.f32 %v5115_v1, 0.0 }
 0x107   :  { %v2265_v20 = vsub.f32 %v5182_v29, %v4808_v8  ;;  %v401_v40 = vmax.f32 %v233_v19, %v393_v46  ;;  %v2268_v35 = vsub.f32 %v5195_v55, %v4811_v9  ;;  %v568_v48 = vmax.f32 %v400_v11, %v560_v12 }
 0x108   :  { %3543 = vmatmul.msk.f32.gmra.mxu1 %vm166_vm0, %v4955_v15  ;;  %v3717_v23 = vpop.eup %3716  ;;  %v2480_v60 = vmul.f32 0.5, %v2479_v26  ;;  %3718 = vrsqrt.f32 %v5325_v18  ;;  %v5342_v25 = vmax.f32 %v234_v58, %v394_v2  ;;  %v561_v3 = vmax.f32 %v5159_v21, 0.0  ;;  %v5356_v58 = vpop.f32.mrf.mxu2 }
 0x109   :  { %v2646_v38 = vmul.f32 %v3717_v23, %v5280_v10  ;;  %v5345_v19 = vadd.f32 %v2959_v56, %v2956_v4  ;;  %v2271_v12 = vmul.f32 %v2262_v16, %v2262_v16  ;;  %v2274_v1 = vmul.f32 %v2265_v20, %v2265_v20  ;;  %v5365_v20 = vpop.f32.mrf.mxu1 }
 0x10a   :  { %3556 = vmatmul.msk.f32.gmra.mxu3 %vm166_vm0, %v5319_v24  ;;  %v2481_v62 = vsub.f32 1.5, %v2480_v60  ;;  %v2280_v46 = vmul.f32 %v2268_v35, %v2268_v35  ;;  %v728_v6 = vmax.f32 %v5144_v59, 0.0  ;;  %v2487_v21 = vand.u32 2147483648, %v5247_v47  ;;  %v5358_v2 = vpop.f32.mrf.mxu0 }
 0x10b   :  { %3549 = vmatmul.msk.f32.gmra.mxu2 %vm166_vm0, %v4846_v30  ;;  %v2647_v11 = vmul.f32 %v3717_v23, %v2646_v38  ;;  %3720 = vrsqrt.f32 %v5345_v19  ;;  %v2277_v4 = vadd.f32 %v2274_v1, %v2271_v12  ;;  %v5360_v16 = vmax.f32 %v401_v40, %v561_v3 }
 0x10c   :  { %v2482_v26 = vmul.f32 %v3715_v42, %v2481_v62  ;;  %v395_v59 = vmax.f32 %v5165_v52, 0.0  ;;  %vm2486_vm9 = vcmp.eq.f32.partialorder %v5247_v47, 0.0  ;;  %v2261_v62 = vsub.f32 %v5085_v14, %v4788_v54 }
 0x10d   :  { %v2648_v56 = vmul.f32 0.5, %v2647_v11  ;;  %v5367_v38 = vadd.f32 %v2280_v46, %v2277_v4  ;;  %v2264_v11 = vsub.f32 %v5056_v27, %v4808_v8  ;;  %v5373_v40 = vmax.f32 %v568_v48, %v728_v6  ;;  %v5392_v46 = vpop.f32.mrf.mxu3 }
 0x10e   :  { %3538 = vmatmul.msk.f32.gmra.mxu0 %vm166_vm0, %v5078_v22  ;;  %v2483_v42 = vmul.f32 %v2482_v26, %v5247_v47  ;;  %v3719_v60 = vpop.eup %3718  ;;  %v2267_v12 = vsub.f32 %v5099_v45, %v4811_v9  ;;  %vm2652_vm11 = vcmp.eq.f32.partialorder %v5280_v10, inf  ;;  %vm2654_vm14 = vcmp.eq.f32.partialorder %v5280_v10, 0.0 }
 0x10f   :  { %v2649_v35 = vsub.f32 1.5, %v2648_v56  ;;  %6384 = vst [vmem:[#allocation25_spill] sm:$0xff] %v5373_v40  ;;  %v2814_v3 = vmul.f32 %v3719_v60, %v5325_v18  ;;  %3722 = vrsqrt.f32 %v5367_v38  ;;  %v2270_v6 = vmul.f32 %v2261_v62, %v2261_v62 }
 0x110   :  { %3544 = vmatmul.msk.f32.gmra.mxu1 %vm166_vm0, %v4977_v5  ;;  %v2485_v52 = vsel %vm2484_vm8, %v5247_v47, %v2483_v42  ;;  %v2655_v47 = vand.u32 2147483648, %v5280_v10  ;;  %v2273_v26 = vmul.f32 %v2264_v11, %v2264_v11  ;;  %v2279_v56 = vmul.f32 %v2267_v12, %v2267_v12 }
 0x111   :  { %v2488_v54 = vsel %vm2486_vm9, %v2487_v21, %v2485_v52  ;;  %v2650_v1 = vmul.f32 %v3717_v23, %v2649_v35  ;;  %v5387_v8 = vpop.eup %3720  ;;  %v2815_v48 = vmul.f32 %v3719_v60, %v2814_v3  ;;  %v2157_v4 = vsel %vm476_vm10, %v4889_v53, %v4886_v43 }
 0x112   :  { %3557 = vmatmul.msk.f32.gmra.mxu3 %vm166_vm0, %v4846_v30  ;;  %v2491_v30 = vmul.f32 %v3949_v63, %v2488_v54  ;;  %v2988_v23 = vmul.f32 %v5387_v8, %v5345_v19  ;;  %v2430_v42 = vsub.f32 %v5174_v28, %v5177_v34  ;;  %v5402_v35 = vmax.f32 %v235_v33, %v395_v59 }
 0x113   :  { %3550 = vmatmul.msk.f32.gmra.mxu2 %vm166_vm0, %v5131_v36  ;;  %v2651_v9 = vmul.f32 %v2650_v1, %v5280_v10  ;;  %v2816_v21 = vmul.f32 0.5, %v2815_v48  ;;  %v2276_v62 = vadd.f32 %v2273_v26, %v2270_v6  ;;  %v2158_v11 = vsel %vm644_vm12, %v4896_v37, %v2157_v4  ;;  %v5419_v48 = vpop.f32.mrf.mxu2 }
 0x114   :  { %2549 = vmatpush.msrb.mxu2 %v2491_v30  ;;  %v2159_v54 = vsel %vm812_vm13, %v4918_v61, %v2158_v11  ;;  %v2433_v33 = vsub.f32 %v5182_v29, %v5185_v31  ;;  %v2989_v30 = vmul.f32 %v5387_v8, %v2988_v23  ;;  %v2439_v4 = vmul.f32 %v2430_v42, %v2430_v42 }
 0x115   :  { %v2653_v52 = vsel %vm2652_vm11, %v5280_v10, %v2651_v9  ;;  %v2817_v12 = vsub.f32 1.5, %v2816_v21  ;;  %v3723_v59 = vpop.eup %3722  ;;  %v5421_v9 = vpop.f32.mrf.mxu0  ;;  %v5423_v6 = vadd.f32 %v2279_v56, %v2276_v62  ;;  %2161 = vst [vmem:[#allocation2 - $0x4] sm:$0xf0] %v2159_v54  ;;  %v2436_v10 = vsub.f32 %v5195_v55, %v5198_v32 }
 0x116   :  { %v2656_v3 = vsel %vm2654_vm14, %v2655_v47, %v2653_v52  ;;  %6385 = vst [vmem:[#allocation26_spill] sm:$0xff] %v5421_v9  ;;  %v2298_v26 = vmul.f32 %v3723_v59, %v5367_v38  ;;  %v5430_v21 = vpop.f32.mrf.mxu1  ;;  %v2442_v23 = vmul.f32 %v2433_v33, %v2433_v33  ;;  %v562_v52 = vmax.f32 %v5229_v50, 0.0  ;;  %v5448_v57 = vpop.f32.mrf.mxu3 }
 0x117   :  { %v2659_v1 = vmul.f32 %v3949_v63, %v2656_v3  ;;  %v2818_v47 = vmul.f32 %v3719_v60, %v2817_v12  ;;  %vm2820_vm15 = vcmp.eq.f32.partialorder %v5325_v18, inf  ;;  %v2823_v56 = vand.u32 2147483648, %v5325_v18  ;;  %6386 = vst [vmem:[#allocation27_spill] sm:$0xff] %v5448_v57 }
 0x118   :  { %3545 = vmatmul.msk.f32.gmra.mxu1 %vm166_vm0, %v5029_v44  ;;  %3724 = vrsqrt.f32 %v5423_v6  ;;  %vm2822_vm1 = vcmp.eq.f32.partialorder %v5325_v18, 0.0  ;;  %v2299_v62 = vmul.f32 %v3723_v59, %v2298_v26  ;;  %v2445_v11 = vadd.f32 %v2442_v23, %v2439_v4 }
 0x119   :  { %2717 = vmatpush.msrb.mxu3 %v2659_v1  ;;  %v2819_v60 = vmul.f32 %v2818_v47, %v5325_v18  ;;  %v2990_v42 = vmul.f32 0.5, %v2989_v30  ;;  %v2448_v3 = vmul.f32 %v2436_v10, %v2436_v10  ;;  %v2598_v50 = vsub.f32 %v5174_v28, %v5207_v39 }
 0x11a   :  { %3558 = vmatmul.msk.f32.gmra.mxu3 %vm166_vm0, %v5131_v36  ;;  %v2601_v12 = vsub.f32 %v5182_v29, %v5213_v7  ;;  %v729_v54 = vmax.f32 %v5190_v49, 0.0  ;;  %v2300_v1 = vmul.f32 0.5, %v2299_v62  ;;  %v2604_v47 = vsub.f32 %v5195_v55, %v5217_v0 }
 0x11b   :  { %3551 = vmatmul.msk.f32.gmra.mxu2 %vm166_vm0, %v4955_v15  ;;  %v2821_v33 = vsel %vm2820_vm15, %v5325_v18, %v2819_v60  ;;  %v396_v26 = vmax.f32 %v5236_v41, 0.0  ;;  %v5451_v10 = vadd.f32 %v2448_v3, %v2445_v11  ;;  %v2607_v4 = vmul.f32 %v2598_v50, %v2598_v50  ;;  %v6387_v11 = vld [vmem:[#allocation16_spill] sm:$0xff] }
 0x11c   :  { %v2824_v30 = vsel %vm2822_vm1, %v2823_v56, %v2821_v33  ;;  %v570_v23 = vmax.f32 %v5342_v25, %v562_v52  ;;  %v2301_v18 = vsub.f32 1.5, %v2300_v1  ;;  %v2173_v60 = vld [vmem:[#allocation2] sm:$0xff]  ;;  %v2610_v62 = vmul.f32 %v2601_v12, %v2601_v12 }
 0x11d   :  { %v2827_v49 = vmul.f32 %v3949_v63, %v2824_v30  ;;  %v2991_v9 = vsub.f32 1.5, %v2990_v42  ;;  %2216 = vmatpush.msrb.mxu0 %v2173_v60  ;;  %2329 = vst [vmem:[#allocation2 + $0x3] sm:$0x1] %v4918_v61  ;;  %3726 = vrsqrt.f32 %v5451_v10  ;;  %v2616_v41 = vmul.f32 %v2604_v47, %v2604_v47  ;;  %v6388_v42 = vld [vmem:[#allocation15_spill] sm:$0xff]  ;;  %v6389_v33 = vld [vmem:[#allocation17_spill] sm:$0xff]  ;;  %v6390_v47 = vld [vmem:[#allocation18_spill] sm:$0xff]  ;;  %v5477_v30 = vpop.f32.mrf.mxu0 }
 0x11e   :  { %v3725_v40 = vpop.eup %3724  ;;  %v2766_v56 = vsub.f32 %v5174_v28, %v5250_v13  ;;  %v730_v3 = vmax.f32 %v6387_v11, 0.0  ;;  %v2302_v25 = vmul.f32 %v3723_v59, %v2301_v18  ;;  %vm2304_vm2 = vcmp.eq.f32.partialorder %v5367_v38, inf  ;;  %3563 = vmatmul.msk.f32.vlgmr.msrb.gmra.mxu0 %vm166_vm0, %v6388_v42  ;;  %v5475_v59 = vpop.f32.mrf.mxu2  ;;  %6391 = vst [vmem:[#allocation16_spill] sm:$0xff] %v5477_v30  ;;  %v6392_v18 = vld [vmem:[#allocation14_spill] sm:$0xff] }
 0x11f   :  { %v2286_v52 = vmul.f32 %v3725_v40, %v5423_v6  ;;  %v2307_v50 = vand.u32 2147483648, %v5367_v38  ;;  %v2613_v12 = vadd.f32 %v2610_v62, %v2607_v4  ;;  %v2769_v1 = vsub.f32 %v5182_v29, %v6389_v33  ;;  %v5482_v28 = vpop.f32.mrf.mxu1  ;;  %2891 = vmatpush.msra.mxu0 %v2827_v49 }
 0x120   :  { %3546 = vmatmul.msk.f32.gmra.mxu1 %vm166_vm0, %v5078_v22  ;;  %v2303_v11 = vmul.f32 %v2302_v25, %v5367_v38  ;;  %vm2306_vm7 = vcmp.eq.f32.partialorder %v5367_v38, 0.0  ;;  %6393 = vst [vmem:[#allocation15_spill] sm:$0xff] %v5482_v28  ;;  %v2992_v4 = vmul.f32 %v5387_v8, %v2991_v9  ;;  %v2775_v29 = vmul.f32 %v2766_v56, %v2766_v56 }
 0x121   :  { %v5485_v62 = vadd.f32 %v2616_v41, %v2613_v12  ;;  %v5488_v57 = vmax.f32 %v5360_v16, %v729_v54  ;;  %v6394_v30 = vmax.f32 %v5161_v51, 0.0  ;;  %v5497_v49 = vmax.f32 %v570_v23, %v730_v3  ;;  %v5503_v16 = vld [vmem:[%s6345_s2 + $0x28] sm:$0xff]  ;;  %v5508_v12 = vpop.f32.mrf.mxu3 }
 0x122   :  { %3559 = vmatmul.msk.f32.gmra.mxu3 %vm166_vm0, %v4955_v15  ;;  %v2772_v15 = vsub.f32 %v5195_v55, %v6390_v47  ;;  %v2778_v55 = vmul.f32 %v2769_v1, %v2769_v1  ;;  %v2305_v25 = vsel %vm2304_vm2, %v5367_v38, %v2303_v11  ;;  %v6396_v51 = vld [vmem:[#allocation22_spill] sm:$0xff]  ;;  %6398 = vst [vmem:[#allocation18_spill] sm:$0xff] %v5508_v12  ;;  %vm2994_vm8 = vcmp.eq.f32.partialorder %v5345_v19, inf }
 0x123   :  { %3552 = vmatmul.msk.f32.gmra.mxu2 %vm166_vm0, %v4977_v5  ;;  %v2287_v5 = vmul.f32 %v3725_v40, %v2286_v52  ;;  %v5492_v60 = vmax.f32 %v6394_v30, %v396_v26  ;;  %v3727_v28 = vpop.eup %3726  ;;  %6395 = vst [vmem:[#allocation17_spill] sm:$0xff] %v5497_v49  ;;  %v2308_v8 = vsel %vm2306_vm7, %v2307_v50, %v2305_v25  ;;  %3728 = vrsqrt.f32 %v5485_v62  ;;  %v6397_v26 = vld [vmem:[#allocation9_spill] sm:$0xff] }
 0x124   :  { %v2784_v9 = vmul.f32 %v2772_v15, %v2772_v15  ;;  %v563_v54 = vmax.f32 %v6396_v51, 0.0  ;;  %v2322_v41 = vmul.f32 %v6397_v26, %v2308_v8  ;;  %v2466_v38 = vmul.f32 %v3727_v28, %v5451_v10 }
 0x125   :  { %v2288_v52 = vmul.f32 0.5, %v2287_v5  ;;  %v2993_v23 = vmul.f32 %v2992_v4, %v5345_v19  ;;  %vm2292_vm9 = vcmp.eq.f32.partialorder %v5423_v6, inf  ;;  %v2781_v3 = vadd.f32 %v2778_v55, %v2775_v29 }
 0x126   :  { %vm2294_vm11 = vcmp.eq.f32.partialorder %v5423_v6, 0.0  ;;  %v2467_v1 = vmul.f32 %v3727_v28, %v2466_v38  ;;  %2382 = vmatpush.msrb.mxu1 %v2322_v41  ;;  %v2429_v15 = vsub.f32 %v5085_v14, %v5177_v34  ;;  %v2295_v30 = vand.u32 2147483648, %v5423_v6  ;;  %3564 = vmatmul.msk.f32.gmra.mxu0 %vm166_vm0, %v5319_v24  ;;  %v6399_v38 = vld [vmem:[#allocation24_spill] sm:$0xff] }
 0x127   :  { %v2289_v56 = vsub.f32 1.5, %v2288_v52  ;;  %v5521_v11 = vadd.f32 %v2784_v9, %v2781_v3  ;;  %v2432_v29 = vsub.f32 %v5056_v27, %v5185_v31  ;;  %v2435_v55 = vsub.f32 %v5099_v45, %v5198_v32  ;;  %v5539_v32 = vpop.f32.mrf.mxu2  ;;  %v5541_v52 = vpop.f32.mrf.mxu0 }
 0x128   :  { %v2468_v5 = vmul.f32 0.5, %v2467_v1  ;;  %v2438_v4 = vmul.f32 %v2429_v15, %v2429_v15  ;;  %v2324_v34 = vsel %vm644_vm12, %v4889_v53, %v4886_v43  ;;  %v2995_v25 = vsel %vm2994_vm8, %v5345_v19, %v2993_v23  ;;  %v5557_v15 = vld [vmem:[%s6345_s2 + $0x30] sm:$0xff] }
 0x129   :  { %v2290_v50 = vmul.f32 %v3725_v40, %v2289_v56  ;;  %vm2996_vm14 = vcmp.eq.f32.partialorder %v5345_v19, 0.0  ;;  %v2997_v31 = vand.u32 2147483648, %v5345_v19  ;;  %3730 = vrsqrt.f32 %v5521_v11  ;;  %v5547_v56 = vpop.f32.mrf.mxu1  ;;  %v5575_v19 = vld [vmem:[%s6345_s2 + $0x10] sm:$0xff] }
 0x12a   :  { %3560 = vmatmul.msk.f32.gmra.mxu3 %vm166_vm0, %v5503_v16  ;;  %v2469_v9 = vsub.f32 1.5, %v2468_v5  ;;  %v2441_v41 = vmul.f32 %v2432_v29, %v2432_v29  ;;  %v397_v23 = vmax.f32 %v6399_v38, 0.0  ;;  %v2325_v1 = vsel %vm812_vm13, %v4896_v37, %v2324_v34 }
 0x12b   :  { %3553 = vmatmul.msk.f32.gmra.mxu2 %vm166_vm0, %v5029_v44  ;;  %v2291_v40 = vmul.f32 %v2290_v50, %v5423_v6  ;;  %v3729_v44 = vpop.eup %3728  ;;  %v2447_v50 = vmul.f32 %v2435_v55, %v2435_v55  ;;  %2328 = vst [vmem:[#allocation2 - $0x5] sm:$0xe0] %v2325_v1  ;;  %v2998_v38 = vsel %vm2996_vm14, %v2997_v31, %v2995_v25  ;;  %vm2472_vm15 = vcmp.eq.f32.partialorder %v5451_v10, inf }
 0x12c   :  { %v2634_v51 = vmul.f32 %v3729_v44, %v5485_v62  ;;  %v2470_v12 = vmul.f32 %v3727_v28, %v2469_v9  ;;  %v2444_v49 = vadd.f32 %v2441_v41, %v2438_v4  ;;  %vm2474_vm1 = vcmp.eq.f32.partialorder %v5451_v10, 0.0  ;;  %v5577_v4 = vpop.f32.mrf.mxu3 }
 0x12d   :  { %v2293_v8 = vsel %vm2292_vm9, %v5423_v6, %v2291_v40  ;;  %v6400_v40 = vld [vmem:[#allocation10_spill] sm:$0xff]  ;;  %v2475_v6 = vand.u32 2147483648, %v5451_v10  ;;  %v2597_v28 = vsub.f32 %v5085_v14, %v5207_v39  ;;  %6401 = vst [vmem:[#allocation14_spill] sm:$0xff] %v5577_v4  ;;  %v2600_v39 = vsub.f32 %v5056_v27, %v5213_v7 }
 0x12e   :  { %v2296_v3 = vsel %vm2294_vm11, %v2295_v30, %v2293_v8  ;;  %v2635_v29 = vmul.f32 %v3729_v44, %v2634_v51  ;;  %v2471_v30 = vmul.f32 %v2470_v12, %v5451_v10  ;;  %v5566_v34 = vadd.f32 %v2447_v50, %v2444_v49  ;;  %3565 = vmatmul.msk.f32.gmra.mxu0 %vm166_vm0, %v5575_v19 }
 0x12f   :  { %v2321_v5 = vmul.f32 %v6400_v40, %v2296_v3  ;;  %v3731_v25 = vpop.eup %3730  ;;  %v5580_v12 = vmax.f32 %v5402_v35, %v563_v54  ;;  %v6402_v49 = vmax.f32 %v6392_v18, 0.0  ;;  %v2603_v8 = vsub.f32 %v5099_v45, %v5217_v0 }
 0x130   :  { %v2636_v55 = vmul.f32 0.5, %v2635_v29  ;;  %v2473_v9 = vsel %vm2472_vm15, %v5451_v10, %v2471_v30  ;;  %v2802_v35 = vmul.f32 %v3731_v25, %v5521_v11  ;;  %3732 = vrsqrt.f32 %v5566_v34  ;;  %v5614_v29 = vld [vmem:[%s6345_s2 + $0x38] sm:$0xff] }
 0x131   :  { %2383 = vmatpush.msrb.mxu1 %v2321_v5  ;;  %v5584_v31 = vmax.f32 %v6402_v49, %v397_v23  ;;  %v2476_v7 = vsel %vm2474_vm1, %v2475_v6, %v2473_v9  ;;  %vm2640_vm2 = vcmp.eq.f32.partialorder %v5485_v62, inf  ;;  %v2643_v0 = vand.u32 2147483648, %v5485_v62  ;;  %v6403_v49 = vld [vmem:[#allocation23_spill] sm:$0xff] }
 0x132   :  { %3561 = vmatmul.msk.f32.gmra.mxu3 %vm166_vm0, %v5557_v15  ;;  %v2637_v51 = vsub.f32 1.5, %v2636_v55  ;;  %v2490_v18 = vmul.f32 %v6397_v26, %v2476_v7  ;;  %v2803_v41 = vmul.f32 %v3731_v25, %v2802_v35  ;;  %v2606_v23 = vmul.f32 %v2597_v28, %v2597_v28  ;;  %v2341_v3 = vld [vmem:[#allocation2] sm:$0xff]  ;;  %v5624_v28 = vpop.f32.mrf.mxu1 }
 0x133   :  { %3554 = vmatmul.msk.f32.gmra.mxu2 %vm166_vm0, %v5078_v22  ;;  %v3001_v22 = vmul.f32 %v3949_v63, %v2998_v38  ;;  %v2609_v50 = vmul.f32 %v2600_v39, %v2600_v39  ;;  %v2615_v1 = vmul.f32 %v2603_v8, %v2603_v8  ;;  %v2492_v5 = vsel %vm812_vm13, %v4889_v53, %v4886_v43 }
 0x134   :  { %v2638_v54 = vmul.f32 %v3729_v44, %v2637_v51  ;;  %v2493_v10 = vsel %vm141_vm3, %v4918_v61, %v4896_v37  ;;  %v5618_v44 = vpop.f32.mrf.mxu0  ;;  %2550 = vmatpush.msrb.mxu2 %v2490_v18  ;;  %vm2642_vm7 = vcmp.eq.f32.partialorder %v5485_v62, 0.0  ;;  %v2804_v30 = vmul.f32 0.5, %v2803_v41  ;;  %2384 = vmatpush.msrb.mxu1 %v2341_v3  ;;  %2496 = vst [vmem:[#allocation2 - $0x6] sm:$0xc0] %v2492_v5 }
 0x135   :  { %v2765_v55 = vsub.f32 %v5085_v14, %v5250_v13  ;;  %v238_v39 = vmax.f32 %v6403_v49, 0.0  ;;  %3571 = vmatmul.msk.f32.vlgmr.msrb.gmra.mxu1 %vm166_vm0, %v6388_v42  ;;  %v2612_v8 = vadd.f32 %v2609_v50, %v2606_v23  ;;  %2497 = vst [vmem:[#allocation2 + $0x2] sm:$0x3] %v2493_v10  ;;  %v2768_v9 = vsub.f32 %v5056_v27, %v6389_v33 }
 0x136   :  { %v5616_v38 = vpop.f32.mrf.mxu2  ;;  %v2639_v6 = vmul.f32 %v2638_v54, %v5485_v62  ;;  %v2771_v51 = vsub.f32 %v5099_v45, %v6390_v47  ;;  %v3733_v35 = vpop.eup %3732  ;;  %v564_v7 = vmax.f32 %v5356_v58, 0.0  ;;  %v2805_v13 = vsub.f32 1.5, %v2804_v30  ;;  %3058 = vmatpush.msra.mxu1 %v3001_v22  ;;  %3566 = vmatmul.msk.f32.gmra.mxu0 %vm166_vm0, %v5131_v36 }
 0x137   :  { %v2774_v18 = vmul.f32 %v2765_v55, %v2765_v55  ;;  %v2454_v45 = vmul.f32 %v3733_v35, %v5566_v34  ;;  %v5644_v33 = vadd.f32 %v2615_v1, %v2612_v8  ;;  %v2777_v58 = vmul.f32 %v2768_v9, %v2768_v9 }
 0x138   :  { %v2641_v14 = vsel %vm2640_vm2, %v5485_v62, %v2639_v6  ;;  %v731_v47 = vmax.f32 %v5333_v17, 0.0  ;;  %v2806_v23 = vmul.f32 %v3731_v25, %v2805_v13  ;;  %v2783_v3 = vmul.f32 %v2771_v51, %v2771_v51 }
 0x139   :  { %v5639_v54 = vpop.f32.mrf.mxu3  ;;  %v2644_v27 = vsel %vm2642_vm7, %v2643_v0, %v2641_v14  ;;  %vm2808_vm13 = vcmp.eq.f32.partialorder %v5521_v11, inf  ;;  %v2811_v22 = vand.u32 2147483648, %v5521_v11  ;;  %v2455_v62 = vmul.f32 %v3733_v35, %v2454_v45 }
 0x13a   :  { %3562 = vmatmul.msk.f32.gmra.mxu3 %vm166_vm0, %v5614_v29  ;;  %v2658_v41 = vmul.f32 %v6397_v26, %v2644_v27  ;;  %3734 = vrsqrt.f32 %v5644_v33  ;;  %v572_v0 = vmax.f32 %v5492_v60, %v564_v7  ;;  %v2807_v50 = vmul.f32 %v2806_v23, %v5521_v11  ;;  %v5675_v49 = vpop.f32.mrf.mxu1  ;;  %v6405_v27 = vld [vmem:[#allocation27_spill] sm:$0xff] }
 0x13b   :  { %vm2810_vm8 = vcmp.eq.f32.partialorder %v5521_v11, 0.0  ;;  %v2780_v17 = vadd.f32 %v2777_v58, %v2774_v18  ;;  %v398_v25 = vmax.f32 %v5365_v20, 0.0  ;;  %v565_v1 = vmax.f32 %v5419_v48, 0.0 }
 0x13c   :  { %2718 = vmatpush.msrb.mxu3 %v2658_v41  ;;  %v2456_v36 = vmul.f32 0.5, %v2455_v62  ;;  %v2660_v5 = vsel %vm141_vm3, %v4896_v37, %v4889_v53  ;;  %v5663_v6 = vpop.f32.mrf.mxu0  ;;  %v239_v60 = vmax.f32 %v5358_v2, 0.0  ;;  %v2809_v30 = vsel %vm2808_vm13, %v5521_v11, %v2807_v50  ;;  %v5669_v55 = vld [vmem:[#allocation2] sm:$0xff] }
 0x13d   :  { %v5671_v20 = vadd.f32 %v2783_v3, %v2780_v17  ;;  %v2661_v48 = vsel %vm144_vm4, %v4918_v61, %v2660_v5  ;;  %v5678_v53 = vmax.f32 %v5580_v12, %v731_v47  ;;  %v732_v37 = vmax.f32 %v5392_v46, 0.0  ;;  %2664 = vst [vmem:[#allocation2 - $0x7] sm:$0x80] %v4886_v43  ;;  %3572 = vmatmul.msk.f32.gmra.mxu1 %vm166_vm0, %v5319_v24  ;;  %v5689_v61 = vld [vmem:[%s6345_s2 + $0x20] sm:$0xff]  ;;  %v6404_v12 = vld [vmem:[#allocation26_spill] sm:$0xff]  ;;  %v6408_v3 = vld [vmem:[#allocation15_spill] sm:$0xff] }
 0x13e   :  { %v5661_v10 = vpop.f32.mrf.mxu2  ;;  %v2812_v2 = vsel %vm2810_vm8, %v2811_v22, %v2809_v30  ;;  %v2457_v8 = vsub.f32 1.5, %v2456_v36  ;;  %v399_v9 = vmax.f32 %v5430_v21, 0.0  ;;  %v896_v51 = vmax.f32 %v6404_v12, 0.0  ;;  %2665 = vst [vmem:[#allocation2 + $0x1] sm:$0x7] %v2661_v48  ;;  %3567 = vmatmul.msk.f32.gmra.mxu0 %vm166_vm0, %v5689_v61  ;;  %v6406_v41 = vld [vmem:[#allocation16_spill] sm:$0xff] }
 0x13f   :  { %v2826_v46 = vmul.f32 %v6397_v26, %v2812_v2  ;;  %3736 = vrsqrt.f32 %v5671_v20  ;;  %v406_v7 = vmax.f32 %v238_v39, %v398_v25  ;;  %v573_v14 = vmax.f32 %v5584_v31, %v565_v1  ;;  %v5728_v36 = vld [vmem:[%s6343_s0 + $0x28] sm:$0xff] }
 0x140   :  { %v3735_v43 = vpop.eup %3734  ;;  %v566_v13 = vmax.f32 %v5475_v59, 0.0  ;;  %v2458_v18 = vmul.f32 %v3733_v35, %v2457_v8  ;;  %v733_v45 = vmax.f32 %v6405_v27, 0.0  ;;  %vm2460_vm9 = vcmp.eq.f32.partialorder %v5566_v34, inf  ;;  %v6407_v35 = vld [vmem:[#allocation25_spill] sm:$0xff] }
 0x141   :  { %v5695_v11 = vpop.f32.mrf.mxu3  ;;  %v2463_v21 = vand.u32 2147483648, %v5566_v34  ;;  %v2622_v58 = vmul.f32 %v3735_v43, %v5644_v33  ;;  %v5705_v47 = vmax.f32 %v572_v0, %v732_v37  ;;  %v897_v39 = vmax.f32 %v6406_v41, 0.0  ;;  %2892 = vmatpush.msra.mxu0 %v2826_v46  ;;  %v5720_v0 = vld [vmem:[%s6343_s0 + $0x10] sm:$0xff] }
 0x142   :  { %v2459_v31 = vmul.f32 %v2458_v18, %v5566_v34  ;;  %vm2462_vm11 = vcmp.eq.f32.partialorder %v5566_v34, 0.0  ;;  %v407_v59 = vmax.f32 %v239_v60, %v399_v9  ;;  %v904_v23 = vmax.f32 %v6407_v35, %v896_v51  ;;  %v5736_v60 = vld [vmem:[%s6343_s0 + $0x40] sm:$0xff]  ;;  %v5747_v12 = vpop.f32.mrf.mxu1 }
 0x143   :  { %v1064_v22 = vmax.f32 %v6408_v3, 0.0  ;;  %v2623_v62 = vmul.f32 %v3735_v43, %v2622_v58  ;;  %v5723_v1 = vperm.slane %v5720_v0, 2  ;;  %v5731_v5 = vperm.slane %v5728_v36, 2 }
 0x144   :  { %v2461_v50 = vsel %vm2460_vm9, %v5566_v34, %v2459_v31  ;;  %v5715_v25 = vpop.f32.mrf.mxu0  ;;  %v5739_v30 = vperm.slane %v5736_v60, 2  ;;  %v5741_v37 = vmax.f32 %v406_v7, %v566_v13  ;;  %v5743_v2 = vmax.f32 %v573_v14, %v733_v45 }
 0x145   :  { %v3737_v48 = vpop.eup %3736  ;;  %v2464_v8 = vsel %vm2462_vm11, %v2463_v21, %v2461_v50  ;;  %v2624_v9 = vmul.f32 0.5, %v2623_v62  ;;  %v905_v51 = vmax.f32 %v5488_v57, %v897_v39  ;;  %3573 = vmatmul.msk.f32.gmra.mxu1 %vm166_vm0, %v5575_v19  ;;  %v3108_v7 = vsub.f32 %v5720_v0, %v5723_v1 }
 0x146   :  { %v5713_v17 = vpop.f32.mrf.mxu2  ;;  %v2489_v46 = vmul.f32 %v6400_v40, %v2464_v8  ;;  %v2790_v18 = vmul.f32 %v3737_v48, %v5671_v20  ;;  %v1072_v14 = vmax.f32 %v904_v23, %v1064_v22  ;;  %v567_v13 = vmax.f32 %v5539_v32, 0.0  ;;  %3568 = vmatmul.msk.f32.gmra.mxu0 %vm166_vm0, %v5503_v16 }
 0x147   :  { %v2625_v34 = vsub.f32 1.5, %v2624_v9  ;;  %v3111_v45 = vsub.f32 %v5728_v36, %v5731_v5  ;;  %v898_v57 = vmax.f32 %v5541_v52, 0.0  ;;  %vm2628_vm14 = vcmp.eq.f32.partialorder %v5644_v33, inf }
 0x148   :  { %2551 = vmatpush.msrb.mxu2 %v2489_v46  ;;  %v2791_v21 = vmul.f32 %v3737_v48, %v2790_v18  ;;  %v3114_v58 = vsub.f32 %v5736_v60, %v5739_v30  ;;  %v3117_v32 = vmul.f32 %v3108_v7, %v3108_v7  ;;  %v5768_v31 = vperm.slane %v5720_v0, 3 }
 0x149   :  { %v5757_v27 = vpop.f32.mrf.mxu3  ;;  %v2626_v41 = vmul.f32 %v3735_v43, %v2625_v34  ;;  %v3120_v39 = vmul.f32 %v3111_v45, %v3111_v45  ;;  %v2631_v35 = vand.u32 2147483648, %v5644_v33  ;;  %v5773_v3 = vperm.slane %v5728_v36, 3 }
 0x14a   :  { %2552 = vmatpush.msrb.mxu2 %v5669_v55  ;;  %v2792_v52 = vmul.f32 0.5, %v2791_v21  ;;  %v3126_v23 = vmul.f32 %v3114_v58, %v3114_v58  ;;  %vm2630_vm15 = vcmp.eq.f32.partialorder %v5644_v33, 0.0  ;;  %v5780_v62 = vperm.slane %v5736_v60, 3  ;;  %v5793_v34 = vpop.f32.mrf.mxu1 }
 0x14b   :  { %v2627_v22 = vmul.f32 %v2626_v41, %v5644_v33  ;;  %3579 = vmatmul.msk.f32.vlgmr.msrb.gmra.mxu2 %vm166_vm0, %v6388_v42  ;;  %v3123_v43 = vadd.f32 %v3120_v39, %v3117_v32  ;;  %v5782_v50 = vmax.f32 %v407_v59, %v567_v13  ;;  %v1065_v55 = vmax.f32 %v5547_v56, 0.0  ;;  %v6410_v13 = vld [vmem:[#allocation17_spill] sm:$0xff]  ;;  %v3777_v41 = vld [vmem:[%s6345_s2 + $0x18] sm:$0xff] }
 0x14c   :  { %v2793_v8 = vsub.f32 1.5, %v2792_v52  ;;  %v1232_v9 = vmax.f32 %v5616_v38, 0.0  ;;  %v5788_v18 = vpop.f32.mrf.mxu0  ;;  %v3275_v59 = vsub.f32 %v5720_v0, %v5768_v31  ;;  %v3278_v56 = vsub.f32 %v5728_v36, %v5773_v3 }
 0x14d   :  { %6409 = vst [vmem:[#allocation22_spill] sm:$0xff] %v5782_v50  ;;  %v2629_v7 = vsel %vm2628_vm14, %v5644_v33, %v2627_v22  ;;  %v5795_v45 = vadd.f32 %v3126_v23, %v3123_v43  ;;  %v906_v38 = vmax.f32 %v6410_v13, %v898_v57  ;;  %3574 = vmatmul.msk.f32.gmra.mxu1 %vm166_vm0, %v3777_v41  ;;  %vm2796_vm1 = vcmp.eq.f32.partialorder %v5671_v20, inf  ;;  %v2677_v23 = vld [vmem:[#allocation2] sm:$0xff] }
 0x14e   :  { %v5786_v46 = vpop.f32.mrf.mxu2  ;;  %v2632_v21 = vsel %vm2630_vm15, %v2631_v35, %v2629_v7  ;;  %v2794_v58 = vmul.f32 %v3737_v48, %v2793_v8  ;;  %v3281_v32 = vsub.f32 %v5736_v60, %v5780_v62  ;;  %v2799_v52 = vand.u32 2147483648, %v5671_v20  ;;  %3569 = vmatmul.msk.f32.gmra.mxu0 %vm166_vm0, %v5557_v15  ;;  %v6413_v41 = vld [vmem:[#allocation20_spill] sm:$0xff] }
 0x14f   :  { %v2657_v39 = vmul.f32 %v6400_v40, %v2632_v21  ;;  %3738 = vrsqrt.f32 %v5795_v45  ;;  %v1073_v48 = vmax.f32 %v905_v51, %v1065_v55  ;;  %vm2798_vm2 = vcmp.eq.f32.partialorder %v5671_v20, 0.0  ;;  %v6411_v51 = vld [vmem:[#allocation19_spill] sm:$0xff]  ;;  %v6414_v50 = vld [vmem:[#allocation12_spill] sm:$0xff] }
 0x150   :  { %v2795_v57 = vmul.f32 %v2794_v58, %v5671_v20  ;;  %v1240_v35 = vmax.f32 %v1072_v14, %v1232_v9  ;;  %v899_v22 = vmax.f32 %v5618_v44, 0.0  ;;  %v3284_v43 = vmul.f32 %v3275_v59, %v3275_v59  ;;  %v6412_v55 = vld [vmem:[#allocation11_spill] sm:$0xff] }
 0x151   :  { %v5814_v33 = vpop.f32.mrf.mxu3  ;;  %2719 = vmatpush.msrb.mxu3 %v2657_v39  ;;  %v3287_v8 = vmul.f32 %v3278_v56, %v3278_v56  ;;  %v3293_v7 = vmul.f32 %v3281_v32, %v3281_v32  ;;  %v1066_v21 = vmax.f32 %v5624_v28, 0.0  ;;  %v2940_v58 = vsub.f32 %v6412_v55, %v6411_v51  ;;  %v6415_v56 = vld [vmem:[#allocation21_spill] sm:$0xff] }
 0x152   :  { %v2797_v13 = vsel %vm2796_vm1, %v5671_v20, %v2795_v57  ;;  %v2943_v14 = vsub.f32 %v6414_v50, %v6413_v41  ;;  %v1400_v44 = vmax.f32 %v5639_v54, 0.0  ;;  %v6416_v32 = vld [vmem:[#allocation13_spill] sm:$0xff]  ;;  %v1233_v28 = vmax.f32 %v5661_v10, 0.0 }
 0x153   :  { %v2800_v9 = vsel %vm2798_vm2, %v2799_v52, %v2797_v13  ;;  %2720 = vmatpush.msrb.mxu3 %v2677_v23  ;;  %3580 = vmatmul.msk.f32.gmra.mxu2 %vm166_vm0, %v5319_v24  ;;  %v3290_v59 = vadd.f32 %v3287_v8, %v3284_v43  ;;  %v2946_v39 = vsub.f32 %v6416_v32, %v6415_v56  ;;  %v5843_v8 = vpop.f32.mrf.mxu1  ;;  %vm3161_vm7 = vcmp.eq.f32.partialorder %v5795_v45, inf }
 0x154   :  { %v2825_v20 = vmul.f32 %v6400_v40, %v2800_v9  ;;  %3587 = vmatmul.msk.f32.vlgmr.msrb.gmra.mxu3 %vm166_vm0, %v6388_v42  ;;  %v5838_v50 = vpop.f32.mrf.mxu0  ;;  %v2949_v52 = vmul.f32 %v2940_v58, %v2940_v58  ;;  %v2952_v23 = vmul.f32 %v2943_v14, %v2943_v14  ;;  %v907_v54 = vmax.f32 %v5678_v53, %v899_v22  ;;  %v6419_v42 = vld [vmem:[#allocation18_spill] sm:$0xff]  ;;  %v5854_v53 = vld [vmem:[%s6343_s0] sm:$0xff] }
 0x155   :  { %6417 = vst [vmem:[#allocation9_spill] sm:$0xff] %v5838_v50  ;;  %v3739_v13 = vpop.eup %3738  ;;  %v5841_v43 = vadd.f32 %v3293_v7, %v3290_v59  ;;  %v2958_v55 = vmul.f32 %v2946_v39, %v2946_v39  ;;  %v61_v9 = vmul.f32 %v5728_v36, %v3949_v63  ;;  %3575 = vmatmul.msk.f32.gmra.mxu1 %vm166_vm0, %v5689_v61  ;;  %v900_v36 = vmax.f32 %v5663_v6, 0.0  ;;  %v5874_v6 = vld [vmem:[%s6343_s0 + $0x18] sm:$0xff] }
 0x156   :  { %v5836_v57 = vpop.f32.mrf.mxu2  ;;  %6418 = vst [vmem:[#allocation24_spill] sm:$0xff] %v5843_v8  ;;  %v3155_v10 = vmul.f32 %v3739_v13, %v5795_v45  ;;  %v2955_v58 = vadd.f32 %v2952_v23, %v2949_v52  ;;  %2893 = vmatpush.msra.mxu0 %v2825_v20  ;;  %v2939_v22 = vsub.f32 %v5854_v53, %v6411_v51  ;;  %v1067_v14 = vmax.f32 %v5675_v49, 0.0 }
 0x157   :  { %v1074_v7 = vmax.f32 %v906_v38, %v1066_v21  ;;  %3740 = vrsqrt.f32 %v5841_v43  ;;  %v1241_v59 = vmax.f32 %v1073_v48, %v1233_v28  ;;  %v5861_v39 = vmax.f32 %v1240_v35, %v1400_v44  ;;  %3570 = vmatmul.msk.f32.gmra.mxu0 %vm166_vm0, %v5614_v29  ;;  %v40_v21 = vld [vmem:[%s6343_s0 + $0x58] sm:$0xff] }
 0x158   :  { %v1401_v20 = vmax.f32 %v5695_v11, 0.0  ;;  %v3156_v52 = vmul.f32 %v3739_v13, %v3155_v10  ;;  %v1234_v23 = vmax.f32 %v5713_v17, 0.0  ;;  %v5869_v38 = vadd.f32 %v2958_v55, %v2955_v58  ;;  %v5881_v11 = vld [vmem:[%s6343_s0 + $0x30] sm:$0xff] }
 0x159   :  { %v5867_v32 = vpop.f32.mrf.mxu3  ;;  %v2942_v49 = vsub.f32 %v5874_v6, %v6413_v41  ;;  %v2945_v17 = vsub.f32 %v5881_v11, %v6415_v56  ;;  %v2948_v35 = vmul.f32 %v2939_v22, %v2939_v22  ;;  %v5890_v51 = vmul.f32 %v5720_v0, %v3949_v63 }
 0x15a   :  { %v3157_v48 = vmul.f32 0.5, %v3156_v52  ;;  %v5892_v44 = vrot.slane %v61_v9, 7  ;;  %v908_v41 = vmax.f32 %v5705_v47, %v900_v36  ;;  %v5895_v28 = vmax.f32 %v907_v54, %v1067_v14 }
 0x15b   :  { %3581 = vmatmul.msk.f32.gmra.mxu2 %vm166_vm0, %v5575_v19  ;;  %3742 = vrsqrt.f32 %v5869_v38  ;;  %v64_v56 = vmul.f32 %v5736_v60, %v3949_v63  ;;  %v5904_v55 = vmax.f32 %v1241_v59, %v1401_v20  ;;  %v2951_v9 = vmul.f32 %v2942_v49, %v2942_v49  ;;  %v5931_v20 = vld [vmem:[%s6345_s2 + $0x18] sm:$0xff] }
 0x15c   :  { %3588 = vmatmul.msk.f32.gmra.mxu3 %vm166_vm0, %v5319_v24  ;;  %v3158_v0 = vsub.f32 1.5, %v3157_v48  ;;  %v2957_v10 = vmul.f32 %v2945_v17, %v2945_v17  ;;  %v5906_v47 = vmax.f32 %v1074_v7, %v1234_v23  ;;  %v901_v54 = vmax.f32 %v5715_v25, 0.0  ;;  %v5916_v24 = vpop.f32.mrf.mxu1  ;;  %v5918_v59 = vpop.f32.mrf.mxu0 }
 0x15d   :  { %v3741_v58 = vpop.eup %3740  ;;  %v1068_v22 = vmax.f32 %v5747_v12, 0.0  ;;  %v67_v14 = vmul.f32 %v3949_v63, %v40_v21  ;;  %3576 = vmatmul.msk.f32.gmra.mxu1 %vm166_vm0, %v5503_v16  ;;  %6420 = vst [vmem:[#allocation10_spill] sm:$0xff] %v5916_v24  ;;  %v2954_v7 = vadd.f32 %v2951_v9, %v2948_v35  ;;  %v2833_v25 = vsel %vm141_vm3, %v5892_v44, %v5890_v51 }
 0x15e   :  { %v5910_v36 = vpop.f32.mrf.mxu2  ;;  %v3159_v60 = vmul.f32 %v3739_v13, %v3158_v0  ;;  %v3322_v52 = vmul.f32 %v3741_v58, %v5841_v43  ;;  %vm3163_vm13 = vcmp.eq.f32.partialorder %v5795_v45, 0.0  ;;  %v3164_v12 = vand.u32 2147483648, %v5795_v45  ;;  %v3781_v0 = vld [vmem:[%s6343_s0 + $0x8] sm:$0xff] }
 0x15f   :  { %v5926_v13 = vrot.slane %v64_v56, 6  ;;  %v5934_v17 = vadd.f32 %v2957_v10, %v2954_v7  ;;  %v5936_v48 = vrot.slane %v67_v14, 5  ;;  %v5939_v21 = vmax.f32 %v5743_v2, %v901_v54  ;;  %v3782_v10 = vld [vmem:[%s6343_s0 + $0x20] sm:$0xff] }
 0x160   :  { %v3160_v23 = vmul.f32 %v3159_v60, %v5795_v45  ;;  %v3323_v49 = vmul.f32 %v3741_v58, %v3322_v52  ;;  %v3107_v9 = vsub.f32 %v3781_v0, %v5723_v1  ;;  %v3110_v14 = vsub.f32 %v3782_v10, %v5731_v5 }
 0x161   :  { %v3743_v35 = vpop.eup %3742  ;;  %v2835_v56 = vsel %vm144_vm4, %v5926_v13, %v2833_v25  ;;  %3744 = vrsqrt.f32 %v5934_v17  ;;  %v5956_v52 = vmax.f32 %v908_v41, %v1068_v22  ;;  %v1235_v7 = vmax.f32 %v5786_v46, 0.0  ;;  %v5964_v50 = vpop.f32.mrf.mxu3 }
 0x162   :  { %v3162_v2 = vsel %vm3161_vm7, %v5795_v45, %v3160_v23  ;;  %v3324_v54 = vmul.f32 0.5, %v3323_v49  ;;  %v2976_v60 = vmul.f32 %v3743_v35, %v5869_v38  ;;  %v1402_v25 = vmax.f32 %v5757_v27, 0.0  ;;  %6421 = vst [vmem:[#allocation23_spill] sm:$0xff] %v5964_v50  ;;  %v3783_v27 = vld [vmem:[%s6343_s0 + $0x38] sm:$0xff] }
 0x163   :  { %3582 = vmatmul.msk.f32.gmra.mxu2 %vm166_vm0, %v5931_v20  ;;  %v3165_v24 = vsel %vm3163_vm13, %v3164_v12, %v3162_v2  ;;  %v2837_v22 = vsel %vm147_vm6, %v5936_v48, %v2835_v56  ;;  %vm3328_vm3 = vcmp.eq.f32.partialorder %v5841_v43, inf  ;;  %v3113_v46 = vsub.f32 %v3783_v27, %v5739_v30 }
 0x164   :  { %3589 = vmatmul.msk.f32.gmra.mxu3 %vm166_vm0, %v5575_v19  ;;  %v3168_v23 = vmul.f32 %v3949_v63, %v3165_v24  ;;  %v3325_v49 = vsub.f32 1.5, %v3324_v54  ;;  %v2977_v41 = vmul.f32 %v3743_v35, %v2976_v60  ;;  %2839 = vst [vmem:[#allocation2] sm:$0xf] %v2837_v22  ;;  %v3116_v45 = vmul.f32 %v3107_v9, %v3107_v9 }
 0x165   :  { %v3119_v12 = vmul.f32 %v3110_v14, %v3110_v14  ;;  %v3331_v24 = vand.u32 2147483648, %v5841_v43  ;;  %3577 = vmatmul.msk.f32.gmra.mxu1 %vm166_vm0, %v5557_v15  ;;  %v3274_v56 = vsub.f32 %v3781_v0, %v5768_v31  ;;  %v3125_v22 = vmul.f32 %v3113_v46, %v3113_v46 }
 0x166   :  { %3225 = vmatpush.msra.mxu2 %v3168_v23  ;;  %v3326_v2 = vmul.f32 %v3741_v58, %v3325_v49  ;;  %v2978_v54 = vmul.f32 0.5, %v2977_v41  ;;  %v3277_v8 = vsub.f32 %v3782_v10, %v5773_v3  ;;  %v3280_v4 = vsub.f32 %v3783_v27, %v5780_v62  ;;  %v5982_v50 = vpop.f32.mrf.mxu2  ;;  %v1553_v49 = vpop.f32.mrf.mxu0 }
 0x167   :  { %v3122_v60 = vadd.f32 %v3119_v12, %v3116_v45  ;;  %v3745_v9 = vpop.eup %3744  ;;  %vm3330_vm8 = vcmp.eq.f32.partialorder %v5841_v43, 0.0  ;;  %v1574_v23 = vmax.f32 %v5918_v59, 0.0  ;;  %v1717_v41 = vpop.f32.mrf.mxu1  ;;  %v3283_v46 = vmul.f32 %v3274_v56, %v3274_v56 }
 0x168   :  { %v3327_v14 = vmul.f32 %v3326_v2, %v5841_v43  ;;  %v2979_v58 = vsub.f32 1.5, %v2978_v54  ;;  %v2964_v0 = vmul.f32 %v3745_v9, %v5934_v17  ;;  %v3286_v10 = vmul.f32 %v3277_v8, %v3277_v8 }
 0x169   :  { %v5988_v45 = vadd.f32 %v3125_v22, %v3122_v60  ;;  %vm2982_vm9 = vcmp.eq.f32.partialorder %v5869_v38, inf  ;;  %v2985_v2 = vand.u32 2147483648, %v5869_v38  ;;  %v3292_v60 = vmul.f32 %v3280_v4, %v3280_v4 }
 0x16a   :  { %v3329_v27 = vsel %vm3328_vm3, %v5841_v43, %v3327_v14  ;;  %v2980_v12 = vmul.f32 %v3743_v35, %v2979_v58  ;;  %v2965_v59 = vmul.f32 %v3745_v9, %v2964_v0  ;;  %vm2984_vm11 = vcmp.eq.f32.partialorder %v5869_v38, 0.0  ;;  %v6013_v58 = vpop.f32.mrf.mxu3 }
 0x16b   :  { %v3332_v54 = vsel %vm3330_vm8, %v3331_v24, %v3329_v27  ;;  %3583 = vmatmul.msk.f32.gmra.mxu2 %vm166_vm0, %v5689_v61  ;;  %3746 = vrsqrt.f32 %v5988_v45  ;;  %v1582_v8 = vmax.f32 %v5861_v39, %v1574_v23  ;;  %v2851_v35 = vld [vmem:[#allocation2] sm:$0xff]  ;;  %v1243_v22 = vmax.f32 %v5895_v28, %v1235_v7 }
 0x16c   :  { %v3335_v56 = vmul.f32 %v3949_v63, %v3332_v54  ;;  %3590 = vmatmul.msk.f32.gmra.mxu3 %vm166_vm0, %v5931_v20  ;;  %v2981_v43 = vmul.f32 %v2980_v12, %v5869_v38  ;;  %v6007_v24 = vld [vmem:[%s6345_s2] sm:$0xff]  ;;  %v6011_v4 = vmax.f32 %v5906_v47, %v1402_v25  ;;  %v2966_v63 = vmul.f32 0.5, %v2965_v59  ;;  %2894 = vmatpush.msra.mxu0 %v2851_v35 }
 0x16d   :  { %v3289_v14 = vadd.f32 %v3286_v10, %v3283_v46  ;;  %v1403_v0 = vmax.f32 %v5814_v33, 0.0  ;;  %3578 = vmatmul.msk.f32.gmra.mxu1 %vm166_vm0, %v5614_v29  ;;  %v1741_v23 = vmax.f32 %v1717_v41, 0.0  ;;  %v3106_v28 = vsub.f32 %v5854_v53, %v5723_v1  ;;  %3595 = vmatmul.msk.f32.vlgmr.msra.gmra.mxu0 %vm166_vm0, %v6007_v24 }
 0x16e   :  { %3392 = vmatpush.msra.mxu3 %v3335_v56  ;;  %v2983_v39 = vsel %vm2982_vm9, %v5869_v38, %v2981_v43  ;;  %v2967_v7 = vsub.f32 1.5, %v2966_v63  ;;  %v1575_v33 = vmax.f32 %v1553_v49, 0.0  ;;  %v3109_v41 = vsub.f32 %v5874_v6, %v5731_v5  ;;  %v1556_v27 = vpop.f32.mrf.mxu0  ;;  %v6039_v49 = vpop.f32.mrf.mxu2 }
 0x16f   :  { %v2986_v47 = vsel %vm2984_vm11, %v2985_v2, %v2983_v39  ;;  %v6025_v25 = vadd.f32 %v3292_v60, %v3289_v14  ;;  %v6030_v10 = vmax.f32 %v1582_v8, %v1741_v23  ;;  %v3112_v1 = vsub.f32 %v5881_v11, %v5739_v30  ;;  %v1720_v38 = vpop.f32.mrf.mxu1  ;;  %v6059_v39 = vld [vmem:[%s6345_s2 + $0x8] sm:$0xff] }
 0x170   :  { %v3000_v46 = vmul.f32 %v6397_v26, %v2986_v47  ;;  %v2968_v2 = vmul.f32 %v3745_v9, %v2967_v7  ;;  %vm2970_vm14 = vcmp.eq.f32.partialorder %v5934_v17, inf  ;;  %vm2972_vm15 = vcmp.eq.f32.partialorder %v5934_v17, 0.0 }
 0x171   :  { %v3747_v12 = vpop.eup %3746  ;;  %3748 = vrsqrt.f32 %v6025_v25  ;;  %v2973_v54 = vand.u32 2147483648, %v5934_v17  ;;  %v3115_v5 = vmul.f32 %v3106_v28, %v3106_v28  ;;  %v3118_v60 = vmul.f32 %v3109_v41, %v3109_v41 }
 0x172   :  { %v3143_v59 = vmul.f32 %v3747_v12, %v5988_v45  ;;  %3059 = vmatpush.msra.mxu1 %v3000_v46  ;;  %v2969_v30 = vmul.f32 %v2968_v2, %v5934_v17  ;;  %v1583_v9 = vmax.f32 %v5904_v55, %v1575_v33  ;;  %v3124_v56 = vmul.f32 %v3112_v1, %v3112_v1 }
 0x173   :  { %3584 = vmatmul.msk.f32.gmra.mxu2 %vm166_vm0, %v5503_v16  ;;  %v3002_v43 = vsel %vm144_vm4, %v5892_v44, %v5890_v51  ;;  %v6050_v8 = vmax.f32 %v1243_v22, %v1403_v0  ;;  %v3121_v63 = vadd.f32 %v3118_v60, %v3115_v5  ;;  %v1236_v55 = vmax.f32 %v5836_v57, 0.0 }
 0x174   :  { %3591 = vmatmul.msk.f32.gmra.mxu3 %vm166_vm0, %v5689_v61  ;;  %v3144_v35 = vmul.f32 %v3747_v12, %v3143_v59  ;;  %v3003_v14 = vsel %vm147_vm6, %v5926_v13, %v3002_v43  ;;  %v2971_v22 = vsel %vm2970_vm14, %v5934_v17, %v2969_v30  ;;  %v1742_v23 = vmax.f32 %v1720_v38, 0.0  ;;  %v6081_v38 = vpop.f32.mrf.mxu3 }
 0x175   :  { %v3004_v0 = vsel %vm308_vm5, %v5936_v48, %v3003_v14  ;;  %v2974_v28 = vsel %vm2972_vm15, %v2973_v54, %v2971_v22  ;;  %v3336_v47 = vsel %vm308_vm5, %v5892_v44, %v5890_v51  ;;  %v6072_v33 = vadd.f32 %v3124_v56, %v3121_v63  ;;  %3596 = vmatmul.msk.f32.gmra.mxu0 %vm166_vm0, %v6059_v39 }
 0x176   :  { %v3145_v7 = vmul.f32 0.5, %v3144_v35  ;;  %3006 = vst [vmem:[#allocation2 - $0x1] sm:$0x1e] %v3004_v0  ;;  %v2999_v46 = vmul.f32 %v6400_v40, %v2974_v28  ;;  %v1576_v41 = vmax.f32 %v1556_v27, 0.0  ;;  %v6077_v1 = vmax.f32 %v1583_v9, %v1742_v23  ;;  %v1559_v59 = vpop.f32.mrf.mxu0 }
 0x177   :  { %v3749_v57 = vpop.eup %3748  ;;  %v3273_v17 = vsub.f32 %v5854_v53, %v5768_v31  ;;  %vm3149_vm4 = vcmp.eq.f32.partialorder %v5988_v45, inf  ;;  %3750 = vrsqrt.f32 %v6072_v33  ;;  %v1723_v5 = vpop.f32.mrf.mxu1  ;;  %vm3151_vm1 = vcmp.eq.f32.partialorder %v5988_v45, 0.0 }
 0x178   :  { %v3146_v2 = vsub.f32 1.5, %v3145_v7  ;;  %v3310_v54 = vmul.f32 %v3749_v57, %v6025_v25  ;;  %v3152_v27 = vand.u32 2147483648, %v5988_v45  ;;  %3060 = vmatpush.msra.mxu1 %v2999_v46  ;;  %v3276_v60 = vsub.f32 %v5874_v6, %v5773_v3 }
 0x179   :  { %v3279_v31 = vsub.f32 %v5881_v11, %v5780_v62  ;;  %v3282_v9 = vmul.f32 %v3273_v17, %v3273_v17  ;;  %v3169_v56 = vsel %vm147_vm6, %v5892_v44, %v5890_v51  ;;  %v1584_v43 = vmax.f32 %v6011_v4, %v1576_v41 }
 0x17a   :  { %v3147_v53 = vmul.f32 %v3747_v12, %v3146_v2  ;;  %v3311_v30 = vmul.f32 %v3749_v57, %v3310_v54  ;;  %v3285_v35 = vmul.f32 %v3276_v60, %v3276_v60  ;;  %v3170_v3 = vsel %vm308_vm5, %v5926_v13, %v3169_v56 }
 0x17b   :  { %3585 = vmatmul.msk.f32.gmra.mxu2 %vm166_vm0, %v5557_v15  ;;  %v3291_v63 = vmul.f32 %v3279_v31, %v3279_v31  ;;  %v3171_v51 = vsel %vm476_vm10, %v5936_v48, %v3170_v3  ;;  %v1244_v12 = vmax.f32 %v5956_v52, %v1236_v55  ;;  %v1577_v22 = vmax.f32 %v1559_v59, 0.0 }
 0x17c   :  { %v3148_v62 = vmul.f32 %v3147_v53, %v5988_v45  ;;  %v3312_v11 = vmul.f32 0.5, %v3311_v30  ;;  %3592 = vmatmul.msk.f32.gmra.mxu3 %vm166_vm0, %v5503_v16  ;;  %v3288_v4 = vadd.f32 %v3285_v35, %v3282_v9  ;;  %v1743_v0 = vmax.f32 %v1723_v5, 0.0 }
 0x17d   :  { %v3018_v14 = vld [vmem:[#allocation2] sm:$0xff]  ;;  %v3751_v23 = vpop.eup %3750  ;;  %v3337_v28 = vsel %vm476_vm10, %v5926_v13, %v3336_v47  ;;  %v1404_v41 = vmax.f32 %v5867_v32, 0.0  ;;  %3597 = vmatmul.msk.f32.gmra.mxu0 %vm166_vm0, %v5575_v19  ;;  %vm3316_vm6 = vcmp.eq.f32.partialorder %v6025_v25, inf  ;;  %v3319_v54 = vand.u32 2147483648, %v6025_v25 }
 0x17e   :  { %v1884_v6 = vpop.f32.mrf.mxu2  ;;  %v3150_v7 = vsel %vm3149_vm4, %v5988_v45, %v3148_v62  ;;  %v3313_v46 = vsub.f32 1.5, %v3312_v11  ;;  %3061 = vmatpush.msra.mxu1 %v3018_v14  ;;  %3173 = vst [vmem:[#allocation2 - $0x2] sm:$0x3c] %v3171_v51  ;;  %v3131_v55 = vmul.f32 %v3751_v23, %v6072_v33  ;;  %v6118_v13 = vadd.f32 %v3291_v63, %v3288_v4  ;;  %v1562_v32 = vpop.f32.mrf.mxu0  ;;  %v6423_v4 = vld [vmem:[#allocation23_spill] sm:$0xff] }
 0x17f   :  { %v1908_v44 = vmax.f32 %v1884_v6, 0.0  ;;  %v3153_v52 = vsel %vm3151_vm1, %v3152_v27, %v3150_v7  ;;  %3603 = vmatmul.msk.f32.vlgmr.msra.gmra.mxu1 %vm166_vm0, %v6007_v24  ;;  %v6124_v2 = vmax.f32 %v1584_v43, %v1743_v0  ;;  %v1726_v45 = vpop.f32.mrf.mxu1  ;;  %v1069_v5 = vmax.f32 %v5793_v34, 0.0 }
 0x180   :  { %v3167_v47 = vmul.f32 %v6397_v26, %v3153_v52  ;;  %v3314_v17 = vmul.f32 %v3749_v57, %v3313_v46  ;;  %v3132_v59 = vmul.f32 %v3751_v23, %v3131_v55  ;;  %3752 = vrsqrt.f32 %v6118_v13  ;;  %v6425_v46 = vld [vmem:[#allocation24_spill] sm:$0xff] }
 0x181   :  { %v1916_v16 = vmax.f32 %v6030_v10, %v1908_v44  ;;  %v1585_v10 = vmax.f32 %v6050_v8, %v1577_v22  ;;  %vm3318_vm5 = vcmp.eq.f32.partialorder %v6025_v25, 0.0  ;;  %v1744_v8 = vmax.f32 %v1726_v45, 0.0 }
 0x182   :  { %3226 = vmatpush.msra.mxu2 %v3167_v47  ;;  %v3315_v19 = vmul.f32 %v3314_v17, %v6025_v25  ;;  %v3338_v27 = vsel %vm644_vm12, %v5936_v48, %v3337_v28  ;;  %v3133_v60 = vmul.f32 0.5, %v3132_v59  ;;  %v1578_v30 = vmax.f32 %v1562_v32, 0.0 }
 0x183   :  { %3586 = vmatmul.msk.f32.gmra.mxu2 %vm166_vm0, %v5614_v29  ;;  %v1237_v9 = vmax.f32 %v5910_v36, 0.0  ;;  %v6142_v43 = vmax.f32 %v1585_v10, %v1744_v8  ;;  %v1412_v48 = vmax.f32 %v1244_v12, %v1404_v41  ;;  %v902_v62 = vmax.f32 %v5788_v18, 0.0 }
 0x184   :  { %v3317_v34 = vsel %vm3316_vm6, %v6025_v25, %v3315_v19  ;;  %3593 = vmatmul.msk.f32.gmra.mxu3 %vm166_vm0, %v5557_v15  ;;  %v3134_v63 = vsub.f32 1.5, %v3133_v60  ;;  %v1077_v36 = vmax.f32 %v5939_v21, %v1069_v5  ;;  %v6422_v15 = vmax.f32 %v6419_v42, 0.0 }
 0x185   :  { %v2051_v57 = vpop.f32.mrf.mxu3  ;;  %v3320_v35 = vsel %vm3318_vm5, %v3319_v54, %v3317_v34  ;;  %v3185_v3 = vld [vmem:[#allocation2] sm:$0xff]  ;;  %3598 = vmatmul.msk.f32.gmra.mxu0 %vm166_vm0, %v5931_v20  ;;  %v1586_v18 = vmax.f32 %v1412_v48, %v1578_v30  ;;  %vm3137_vm10 = vcmp.eq.f32.partialorder %v6072_v33, inf  ;;  %vm3139_vm12 = vcmp.eq.f32.partialorder %v6072_v33, 0.0  ;;  %v6427_v30 = vld [vmem:[#allocation22_spill] sm:$0xff] }
 0x186   :  { %v1887_v31 = vpop.f32.mrf.mxu2  ;;  %v2075_v53 = vmax.f32 %v2051_v57, 0.0  ;;  %v3334_v11 = vmul.f32 %v6397_v26, %v3320_v35  ;;  %3340 = vst [vmem:[#allocation2 - $0x3] sm:$0x78] %v3338_v27  ;;  %v3753_v51 = vpop.eup %3752  ;;  %v742_v44 = vmax.f32 %v5741_v37, %v6422_v15  ;;  %v3135_v12 = vmul.f32 %v3751_v23, %v3134_v63  ;;  %v6424_v23 = vld [vmem:[#allocation14_spill] sm:$0xff]  ;;  %v6426_v27 = vld [vmem:[#allocation9_spill] sm:$0xff] }
 0x187   :  { %v1909_v56 = vmax.f32 %v1887_v31, 0.0  ;;  %3604 = vmatmul.msk.f32.gmra.mxu1 %vm166_vm0, %v6059_v39  ;;  %v1245_v14 = vmax.f32 %v1077_v36, %v1237_v9  ;;  %v3140_v26 = vand.u32 2147483648, %v6072_v33  ;;  %v3298_v21 = vmul.f32 %v3753_v51, %v6118_v13  ;;  %v1729_v42 = vpop.f32.mrf.mxu1 }
 0x188   :  { %v6144_v6 = vmax.f32 %v1916_v16, %v2075_v53  ;;  %3393 = vmatpush.msra.mxu3 %v3334_v11  ;;  %v1405_v37 = vmax.f32 %v6423_v4, 0.0  ;;  %v3136_v22 = vmul.f32 %v3135_v12, %v6072_v33  ;;  %v1745_v0 = vmax.f32 %v1729_v42, 0.0  ;;  %v6199_v42 = vld [vmem:[%s6345_s2 + $0x28] sm:$0xff] }
 0x189   :  { %v1917_v25 = vmax.f32 %v6077_v1, %v1909_v56  ;;  %v1565_v1 = vpop.f32.mrf.mxu0  ;;  %v735_v28 = vmax.f32 %v6424_v23, 0.0  ;;  %v910_v7 = vmax.f32 %v742_v44, %v902_v62  ;;  %v1070_v16 = vmax.f32 %v6425_v46, 0.0 }
 0x18a   :  { %v3299_v41 = vmul.f32 %v3753_v51, %v3298_v21  ;;  %v3138_v55 = vsel %vm3137_vm10, %v6072_v33, %v3136_v22  ;;  %v1579_v10 = vmax.f32 %v1565_v1, 0.0  ;;  %v6166_v32 = vmax.f32 %v1586_v18, %v1745_v0 }
 0x18b   :  { %v1238_v45 = vmax.f32 %v5982_v50, 0.0  ;;  %v3141_v54 = vsel %vm3139_vm12, %v3140_v26, %v3138_v55  ;;  %v1413_v19 = vmax.f32 %v1245_v14, %v1405_v37  ;;  %v903_v33 = vmax.f32 %v6426_v27, 0.0  ;;  %v6179_v50 = vld [vmem:[%s6345_s2 + $0x10] sm:$0xff] }
 0x18c   :  { %v3300_v59 = vmul.f32 0.5, %v3299_v41  ;;  %3594 = vmatmul.msk.f32.gmra.mxu3 %vm166_vm0, %v5614_v29  ;;  %v3166_v57 = vmul.f32 %v6400_v40, %v3141_v54  ;;  %v1078_v60 = vmax.f32 %v910_v7, %v1070_v16  ;;  %v743_v9 = vmax.f32 %v6427_v30, %v735_v28 }
 0x18d   :  { %v2054_v52 = vpop.f32.mrf.mxu3  ;;  %v1587_v29 = vmax.f32 %v1413_v19, %v1579_v10  ;;  %3599 = vmatmul.msk.f32.gmra.mxu0 %vm166_vm0, %v5689_v61  ;;  %vm3304_vm2 = vcmp.eq.f32.partialorder %v6118_v13, inf  ;;  %v3307_v63 = vand.u32 2147483648, %v6118_v13  ;;  %vm3306_vm7 = vcmp.eq.f32.partialorder %v6118_v13, 0.0  ;;  %v3352_v23 = vld [vmem:[#allocation2] sm:$0xff]  ;;  %v2849_v10 = vld [vmem:[%s6345_s2 + $0x30] sm:$0xff] }
 0x18e   :  { %v1890_v47 = vpop.f32.mrf.mxu2  ;;  %v2076_v17 = vmax.f32 %v2054_v52, 0.0  ;;  %v3301_v31 = vsub.f32 1.5, %v3300_v59  ;;  %3227 = vmatpush.msra.mxu2 %v3166_v57  ;;  %v1246_v34 = vmax.f32 %v1078_v60, %v1238_v45  ;;  %v911_v36 = vmax.f32 %v743_v9, %v903_v33 }
 0x18f   :  { %v1910_v5 = vmax.f32 %v1890_v47, 0.0  ;;  %3605 = vmatmul.msk.f32.gmra.mxu1 %vm166_vm0, %v6179_v50  ;;  %v1732_v35 = vpop.f32.mrf.mxu1  ;;  %v1407_v46 = vmax.f32 %v6081_v38, 0.0 }
 0x190   :  { %v6172_v8 = vmax.f32 %v1917_v25, %v2076_v17  ;;  %v3302_v56 = vmul.f32 %v3753_v51, %v3301_v31  ;;  %3228 = vmatpush.msra.mxu2 %v3185_v3  ;;  %v1746_v62 = vmax.f32 %v1732_v35, 0.0  ;;  %v6428_v51 = vld [vmem:[#allocation10_spill] sm:$0xff]  ;;  %v1239_v3 = vmax.f32 %v6039_v49, 0.0 }
 0x191   :  { %v1918_v53 = vmax.f32 %v6124_v2, %v1910_v5  ;;  %v1568_v48 = vpop.f32.mrf.mxu0  ;;  %v1406_v2 = vmax.f32 %v6013_v58, 0.0  ;;  %3611 = vmatmul.msk.f32.vlgmr.msra.gmra.mxu2 %vm166_vm0, %v6007_v24  ;;  %v1071_v15 = vmax.f32 %v6428_v51, 0.0 }
 0x192   :  { %v3303_v11 = vmul.f32 %v3302_v56, %v6118_v13  ;;  %v1580_v58 = vmax.f32 %v1568_v48, 0.0  ;;  %v1754_v18 = vmax.f32 %v1587_v29, %v1746_v62 }
 0x193   :  { %v1414_v21 = vmax.f32 %v1246_v34, %v1406_v2  ;;  %v1079_v0 = vmax.f32 %v911_v36, %v1071_v15 }
 0x194   :  { %v3305_v14 = vsel %vm3304_vm2, %v6118_v13, %v3303_v11 }
 0x195   :  { %v2057_v25 = vpop.f32.mrf.mxu3  ;;  %v3308_v1 = vsel %vm3306_vm7, %v3307_v63, %v3305_v14  ;;  %v1588_v13 = vmax.f32 %v1414_v21, %v1580_v58  ;;  %3600 = vmatmul.msk.f32.gmra.mxu0 %vm166_vm0, %v6199_v42  ;;  %v1247_v7 = vmax.f32 %v1079_v0, %v1239_v3 }
 0x196   :  { %v1893_v44 = vpop.f32.mrf.mxu2  ;;  %v2077_v12 = vmax.f32 %v2057_v25, 0.0  ;;  %v3333_v37 = vmul.f32 %v6400_v40, %v3308_v1 }
 0x197   :  { %v1911_v26 = vmax.f32 %v1893_v44, 0.0  ;;  %3606 = vmatmul.msk.f32.gmra.mxu1 %vm166_vm0, %v5931_v20  ;;  %v1735_v28 = vpop.f32.mrf.mxu1  ;;  %v1415_v17 = vmax.f32 %v1247_v7, %v1407_v46 }
 0x198   :  { %v6201_v4 = vmax.f32 %v1918_v53, %v2077_v12  ;;  %3394 = vmatpush.msra.mxu3 %v3333_v37  ;;  %v1747_v16 = vmax.f32 %v1735_v28, 0.0 }
 0x199   :  { %v1919_v22 = vmax.f32 %v6142_v43, %v1911_v26  ;;  %v1571_v49 = vpop.f32.mrf.mxu0  ;;  %3612 = vmatmul.msk.f32.gmra.mxu2 %vm166_vm0, %v6059_v39 }
 0x19a   :  { %3395 = vmatpush.msra.mxu3 %v3352_v23  ;;  %v1581_v52 = vmax.f32 %v1571_v49, 0.0  ;;  %v1755_v55 = vmax.f32 %v1588_v13, %v1747_v16 }
 0x19b   :  { %3619 = vmatmul.msk.f32.vlgmr.msra.gmra.mxu3 %vm166_vm0, %v6007_v24 }
 0x19c   :  { %v1589_v54 = vmax.f32 %v1415_v17, %v1581_v52 }
 0x19d   :  { %v2060_v40 = vpop.f32.mrf.mxu3  ;;  %3601 = vmatmul.msk.f32.gmra.mxu0 %vm166_vm0, %v2849_v10 }
 0x19e   :  { %v1896_v43 = vpop.f32.mrf.mxu2  ;;  %v2078_v41 = vmax.f32 %v2060_v40, 0.0 }
 0x19f   :  { %v1912_v47 = vmax.f32 %v1896_v43, 0.0  ;;  %3607 = vmatmul.msk.f32.gmra.mxu1 %vm166_vm0, %v5689_v61  ;;  %v1738_v24 = vpop.f32.mrf.mxu1 }
 0x1a0   :  { %v6217_v38 = vmax.f32 %v1919_v22, %v2078_v41  ;;  %v1748_v59 = vmax.f32 %v1738_v24, 0.0 }
 0x1a1   :  { %v1920_v45 = vmax.f32 %v6166_v32, %v1912_v47  ;;  %3613 = vmatmul.msk.f32.gmra.mxu2 %vm166_vm0, %v6179_v50  ;;  %v2850_v32 = vld [vmem:[%s6345_s2 + $0x38] sm:$0xff]  ;;  %v2218_v56 = vpop.f32.mrf.mxu0 }
 0x1a2   :  { %v1756_v27 = vmax.f32 %v1589_v54, %v1748_v59 }
 0x1a3   :  { %3620 = vmatmul.msk.f32.gmra.mxu3 %vm166_vm0, %v6059_v39 }
 0x1a5   :  { %v2063_v5 = vpop.f32.mrf.mxu3  ;;  %3602 = vmatmul.msk.f32.gmra.mxu0 %vm166_vm0, %v2850_v32 }
 0x1a6   :  { %v1899_v19 = vpop.f32.mrf.mxu2  ;;  %v2079_v57 = vmax.f32 %v2063_v5, 0.0 }
 0x1a7   :  { %v1913_v33 = vmax.f32 %v1899_v19, 0.0  ;;  %3608 = vmatmul.msk.f32.gmra.mxu1 %vm166_vm0, %v6199_v42 }
 0x1a8   :  { %v6230_v60 = vmax.f32 %v1920_v45, %v2079_v57 }
 0x1a9   :  { %v1921_v31 = vmax.f32 %v1754_v18, %v1913_v33  ;;  %3614 = vmatmul.msk.f32.gmra.mxu2 %vm166_vm0, %v5931_v20  ;;  %v2221_v25 = vpop.f32.mrf.mxu0 }
 0x1aa   :  { %v2243_v57 = vmax.f32 %v2221_v25, 0.0 }
 0x1ab   :  { %3621 = vmatmul.msk.f32.gmra.mxu3 %vm166_vm0, %v6179_v50 }
 0x1ad   :  { %v2066_v39 = vpop.f32.mrf.mxu3 }
 0x1ae   :  { %v1902_v53 = vpop.f32.mrf.mxu2  ;;  %v2080_v29 = vmax.f32 %v2066_v39, 0.0  ;;  %v2251_v39 = vmax.f32 %v6172_v8, %v2243_v57 }
 0x1af   :  { %v1914_v30 = vmax.f32 %v1902_v53, 0.0  ;;  %3609 = vmatmul.msk.f32.gmra.mxu1 %vm166_vm0, %v2849_v10 }
 0x1b0   :  { %v6239_v9 = vmax.f32 %v1921_v31, %v2080_v29 }
 0x1b1   :  { %v1922_v34 = vmax.f32 %v1755_v55, %v1914_v30  ;;  %3615 = vmatmul.msk.f32.gmra.mxu2 %vm166_vm0, %v5689_v61  ;;  %v3785_v61 = vld [vmem:[%s6345_s2 + $0x20] sm:$0xff]  ;;  %v2224_v44 = vpop.f32.mrf.mxu0  ;;  %s3841_s2 = smov [#allocation6]  }
 0x1b2   :  { %v2386_v62 = vpop.f32.mrf.mxu1  ;;  %s3449_s21 = sshll.u32 %s3841_s2, 4  ;;  %s3450_s21 = int_to_ptr.vmem [resolvable:$true] %s3449_s21 }
 0x1b3   :  { %3622 = vmatmul.msk.f32.gmra.mxu3 %vm166_vm0, %v5931_v20  ;;  %v2410_v24 = vmax.f32 %v2386_v62, 0.0 }
 0x1b5   :  { %v2069_v48 = vpop.f32.mrf.mxu3 }
 0x1b6   :  { %v1905_v35 = vpop.f32.mrf.mxu2  ;;  %v2081_v2 = vmax.f32 %v2069_v48, 0.0 }
 0x1b7   :  { %v1915_v63 = vmax.f32 %v1905_v35, 0.0  ;;  %3610 = vmatmul.msk.f32.gmra.mxu1 %vm166_vm0, %v2850_v32  ;;  %v2244_v35 = vmax.f32 %v2224_v44, 0.0 }
 0x1b8   :  { %v6246_v50 = vmax.f32 %v1922_v34, %v2081_v2 }
 0x1b9   :  { %v1923_v36 = vmax.f32 %v1756_v27, %v1915_v63  ;;  %3616 = vmatmul.msk.f32.gmra.mxu2 %vm166_vm0, %v6199_v42  ;;  %v6264_v18 = vpop.f32.mrf.mxu0  ;;  %v2252_v25 = vmax.f32 %v6201_v4, %v2244_v35 }
 0x1ba   :  { %v2389_v15 = vpop.f32.mrf.mxu1  ;;  %v2245_v44 = vmax.f32 %v6264_v18, 0.0 }
 0x1bb   :  { %3623 = vmatmul.msk.f32.gmra.mxu3 %vm166_vm0, %v3785_v61  ;;  %v2411_v53 = vmax.f32 %v2389_v15, 0.0 }
 0x1bd   :  { %v2072_v11 = vpop.f32.mrf.mxu3  ;;  %v2419_v2 = vmax.f32 %v2251_v39, %v2411_v53 }
 0x1be   :  { %v2082_v20 = vmax.f32 %v2072_v11, 0.0 }
 0x1c0   :  { %v6255_v51 = vmax.f32 %v1923_v36, %v2082_v20 }
 0x1c1   :  { %3617 = vmatmul.msk.f32.gmra.mxu2 %vm166_vm0, %v2849_v10  ;;  %v6269_v21 = vpop.f32.mrf.mxu0 }
 0x1c2   :  { %v6261_v12 = vpop.f32.mrf.mxu1 }
 0x1c3   :  { %3624 = vmatmul.msk.f32.gmra.mxu3 %vm166_vm0, %v6199_v42  ;;  %v2412_v8 = vmax.f32 %v6261_v12, 0.0 }
 0x1c9   :  { %3618 = vmatmul.msk.f32.gmra.mxu2 %vm166_vm0, %v2850_v32  ;;  %v6275_v22 = vpop.f32.mrf.mxu0 }
 0x1ca   :  { %v6267_v14 = vpop.f32.mrf.mxu1 }
 0x1cb   :  { %3625 = vmatmul.msk.f32.gmra.mxu3 %vm166_vm0, %v2849_v10  ;;  %v2242_v10 = vmax.f32 %v2218_v56, 0.0 }
 0x1cd   :  { %v2250_v54 = vmax.f32 %v6144_v6, %v2242_v10 }
 0x1ce   :  { %v2554_v58 = vpop.f32.mrf.mxu2 }
 0x1cf   :  { %v2578_v19 = vmax.f32 %v2554_v58, 0.0  ;;  %v2418_v27 = vmax.f32 %v2250_v54, %v2410_v24  ;;  %v2420_v24 = vmax.f32 %v2252_v25, %v2412_v8 }
 0x1d1   :  { %v6283_v49 = vpop.f32.mrf.mxu0 }
 0x1d2   :  { %v6273_v42 = vpop.f32.mrf.mxu1 }
 0x1d3   :  { %3626 = vmatmul.msk.f32.gmra.mxu3 %vm166_vm0, %v2850_v32  ;;  %v2586_v32 = vmax.f32 %v2418_v27, %v2578_v19 }
 0x1d6   :  { %v2557_v26 = vpop.f32.mrf.mxu2 }
 0x1d7   :  { %v2722_v3 = vpop.f32.mrf.mxu3  ;;  %v2579_v34 = vmax.f32 %v2557_v26, 0.0 }
 0x1d8   :  { %v2746_v31 = vmax.f32 %v2722_v3, 0.0 }
 0x1d9   :  { %v6295_v43 = vpop.f32.mrf.mxu0  ;;  %v2587_v36 = vmax.f32 %v2419_v2, %v2579_v34 }
 0x1da   :  { %v6281_v13 = vpop.f32.mrf.mxu1  ;;  %v2754_v56 = vmax.f32 %v2586_v32, %v2746_v31 }
 0x1de   :  { %v6271_v1 = vpop.f32.mrf.mxu2 }
 0x1df   :  { %v2725_v37 = vpop.f32.mrf.mxu3  ;;  %v2580_v3 = vmax.f32 %v6271_v1, 0.0  ;;  %v2413_v1 = vmax.f32 %v6267_v14, 0.0 }
 0x1e0   :  { %v2747_v11 = vmax.f32 %v2725_v37, 0.0 }
 0x1e1   :  { %v2588_v27 = vmax.f32 %v2420_v24, %v2580_v3 }
 0x1e2   :  { %v6289_v46 = vpop.f32.mrf.mxu1  ;;  %v2755_v26 = vmax.f32 %v2587_v36, %v2747_v11 }
 0x1e6   :  { %v6277_v0 = vpop.f32.mrf.mxu2 }
 0x1e7   :  { %v6279_v23 = vpop.f32.mrf.mxu3  ;;  %v2581_v18 = vmax.f32 %v6277_v0, 0.0  ;;  %v2414_v0 = vmax.f32 %v6273_v42, 0.0 }
 0x1e8   :  { %v2748_v4 = vmax.f32 %v6279_v23, 0.0 }
 0x1ea   :  { %v6297_v41 = vpop.f32.mrf.mxu1  ;;  %v2896_v47 = vpop.f32.mrf.mxu0 }
 0x1eb   :  { %v2920_v29 = vmax.f32 %v2896_v47, 0.0 }
 0x1ed   :  { %v2928_v63 = vmax.f32 %v2754_v56, %v2920_v29  ;;  %v2756_v29 = vmax.f32 %v2588_v27, %v2748_v4  ;;  %v2246_v56 = vmax.f32 %v6269_v21, 0.0 }
 0x1ee   :  { %v6285_v28 = vpop.f32.mrf.mxu2 }
 0x1ef   :  { %v6287_v7 = vpop.f32.mrf.mxu3  ;;  %v2254_v11 = vmax.f32 %v6230_v60, %v2246_v56  ;;  %v2582_v21 = vmax.f32 %v6285_v28, 0.0  ;;  %v2415_v28 = vmax.f32 %v6281_v13, 0.0 }
 0x1f2   :  { %v2899_v5 = vpop.f32.mrf.mxu0 }
 0x1f3   :  { %v2921_v15 = vmax.f32 %v2899_v5, 0.0  ;;  %v2253_v5 = vmax.f32 %v6217_v38, %v2245_v44  ;;  %v2749_v38 = vmax.f32 %v6287_v7, 0.0  ;;  %v2422_v7 = vmax.f32 %v2254_v11, %v2414_v0 }
 0x1f5   :  { %v2421_v35 = vmax.f32 %v2253_v5, %v2413_v1 }
 0x1f6   :  { %v6291_v16 = vpop.f32.mrf.mxu2 }
 0x1f7   :  { %v6293_v40 = vpop.f32.mrf.mxu3 }
 0x1f8   :  { %v2750_v60 = vmax.f32 %v6293_v40, 0.0 }
 0x1fa   :  { %v2902_v6 = vpop.f32.mrf.mxu0 }
 0x1fb   :  { %v2922_v31 = vmax.f32 %v2902_v6, 0.0 }
 0x1fc   :  { %v3063_v17 = vpop.f32.mrf.mxu1 }
 0x1fd   :  { %v3087_v62 = vmax.f32 %v3063_v17, 0.0  ;;  %v2929_v17 = vmax.f32 %v2755_v26, %v2921_v15  ;;  %v2930_v23 = vmax.f32 %v2756_v29, %v2922_v31 }
 0x1fe   :  { %v6301_v55 = vpop.f32.mrf.mxu2 }
 0x1ff   :  { %v6299_v52 = vpop.f32.mrf.mxu3  ;;  %v3095_v58 = vmax.f32 %v2928_v63, %v3087_v62  ;;  %v2589_v62 = vmax.f32 %v2421_v35, %v2581_v18 }
 0x200   :  { %v2751_v13 = vmax.f32 %v6299_v52, 0.0 }
 0x201   :  { %v2757_v8 = vmax.f32 %v2589_v62, %v2749_v38 }
 0x202   :  { %v2905_v57 = vpop.f32.mrf.mxu0 }
 0x204   :  { %v3066_v33 = vpop.f32.mrf.mxu1 }
 0x205   :  { %v3088_v19 = vmax.f32 %v3066_v33, 0.0 }
 0x206   :  { %v6306_v59 = vpop.f32.mrf.mxu2 }
 0x207   :  { %v6303_v45 = vpop.f32.mrf.mxu3  ;;  %v3096_v39 = vmax.f32 %v2929_v17, %v3088_v19 }
 0x20a   :  { %v2908_v36 = vpop.f32.mrf.mxu0 }
 0x20b   :  { %v2924_v19 = vmax.f32 %v2908_v36, 0.0 }
 0x20c   :  { %v3069_v20 = vpop.f32.mrf.mxu1 }
 0x20d   :  { %v3089_v2 = vmax.f32 %v3069_v20, 0.0  ;;  %v2247_v20 = vmax.f32 %v6275_v22, 0.0  ;;  %v2583_v22 = vmax.f32 %v6291_v16, 0.0  ;;  %v2416_v16 = vmax.f32 %v6289_v46, 0.0 }
 0x20f   :  { %v6309_v30 = vpop.f32.mrf.mxu3  ;;  %v3097_v25 = vmax.f32 %v2930_v23, %v3089_v2  ;;  %v2255_v17 = vmax.f32 %v6239_v9, %v2247_v20  ;;  %v2249_v2 = vmax.f32 %v6295_v43, 0.0  ;;  %v2585_v43 = vmax.f32 %v6306_v59, 0.0 }
 0x211   :  { %v2423_v1 = vmax.f32 %v2255_v17, %v2415_v28 }
 0x213   :  { %v2591_v9 = vmax.f32 %v2423_v1, %v2583_v22 }
 0x214   :  { %v3230_v48 = vpop.f32.mrf.mxu2  ;;  %v3072_v53 = vpop.f32.mrf.mxu1 }
 0x215   :  { %v3254_v61 = vmax.f32 %v3230_v48, 0.0 }
 0x217   :  { %v3262_v47 = vmax.f32 %v3095_v58, %v3254_v61  ;;  %v2923_v61 = vmax.f32 %v2905_v57, 0.0  ;;  %v2911_v57 = vpop.f32.mrf.mxu0 }
 0x21c   :  { %v3233_v10 = vpop.f32.mrf.mxu2  ;;  %v3075_v3 = vpop.f32.mrf.mxu1 }
 0x21d   :  { %v3255_v32 = vmax.f32 %v3233_v10, 0.0  ;;  %v3090_v10 = vmax.f32 %v3072_v53, 0.0  ;;  %v3091_v31 = vmax.f32 %v3075_v3, 0.0 }
 0x21e   :  { %v3397_v54 = vpop.f32.mrf.mxu3 }
 0x21f   :  { %v3421_v37 = vmax.f32 %v3397_v54, 0.0  ;;  %v3263_v34 = vmax.f32 %v3096_v39, %v3255_v32  ;;  %v2590_v54 = vmax.f32 %v2422_v7, %v2582_v21 }
 0x221   :  { %v3429_v12 = vmax.f32 %v3262_v47, %v3421_v37  ;;  %v2931_v47 = vmax.f32 %v2757_v8, %v2923_v61  ;;  %v2758_v27 = vmax.f32 %v2590_v54, %v2750_v60  ;;  %v2257_v61 = vmax.f32 %v6255_v51, %v2249_v2 }
 0x223   :  { %3437 = vst [vmem:[#allocation6] sm:$0xff] %v3429_v12  ;;  %v3098_v37 = vmax.f32 %v2931_v47, %v3090_v10  ;;  %v2248_v12 = vmax.f32 %v6283_v49, 0.0  ;;  %v2932_v40 = vmax.f32 %v2758_v27, %v2924_v19  ;;  %v2584_v49 = vmax.f32 %v6301_v55, 0.0 }
 0x224   :  { %v3236_v33 = vpop.f32.mrf.mxu2  ;;  %v3078_v53 = vpop.f32.mrf.mxu1  ;;  %v2417_v55 = vmax.f32 %v6297_v41, 0.0 }
 0x225   :  { %v3256_v14 = vmax.f32 %v3236_v33, 0.0  ;;  %v2925_v33 = vmax.f32 %v2911_v57, 0.0  ;;  %v3099_v56 = vmax.f32 %v2932_v40, %v3091_v31 }
 0x226   :  { %v3400_v48 = vpop.f32.mrf.mxu3  ;;  %v2425_v3 = vmax.f32 %v2257_v61, %v2417_v55 }
 0x227   :  { %v3422_v63 = vmax.f32 %v3400_v48, 0.0  ;;  %v3264_v15 = vmax.f32 %v3097_v25, %v3256_v14  ;;  %v2759_v48 = vmax.f32 %v2591_v9, %v2751_v13  ;;  %v3092_v14 = vmax.f32 %v3078_v53, 0.0 }
 0x228   :  { %v2593_v10 = vmax.f32 %v2425_v3, %v2585_v43 }
 0x229   :  { %v3430_v6 = vmax.f32 %v3263_v34, %v3422_v63  ;;  %v2256_v34 = vmax.f32 %v6246_v50, %v2248_v12  ;;  %v2914_v63 = vpop.f32.mrf.mxu0  ;;  %v2933_v52 = vmax.f32 %v2759_v48, %v2925_v33  ;;  %v2752_v50 = vmax.f32 %v6303_v45, 0.0 }
 0x22a   :  { %v2926_v25 = vmax.f32 %v2914_v63, 0.0 }
 0x22b   :  { %3438 = vst [vmem:[#allocation6 + $0x8] sm:$0xff] %v3430_v6  ;;  %v2424_v38 = vmax.f32 %v2256_v34, %v2416_v16  ;;  %v3100_v21 = vmax.f32 %v2933_v52, %v3092_v14 }
 0x22c   :  { %v3239_v58 = vpop.f32.mrf.mxu2  ;;  %v3081_v0 = vpop.f32.mrf.mxu1 }
 0x22d   :  { %v3257_v42 = vmax.f32 %v3239_v58, 0.0  ;;  %v2592_v36 = vmax.f32 %v2424_v38, %v2584_v49  ;;  %v3093_v7 = vmax.f32 %v3081_v0, 0.0 }
 0x22e   :  { %v3403_v26 = vpop.f32.mrf.mxu3 }
 0x22f   :  { %v3423_v44 = vmax.f32 %v3403_v26, 0.0  ;;  %v3265_v4 = vmax.f32 %v3098_v37, %v3257_v42  ;;  %v2760_v8 = vmax.f32 %v2592_v36, %v2752_v50 }
 0x231   :  { %v3431_v24 = vmax.f32 %v3264_v15, %v3423_v44  ;;  %v2934_v26 = vmax.f32 %v2760_v8, %v2926_v25  ;;  %v2917_v47 = vpop.f32.mrf.mxu0  ;;  %v2753_v44 = vmax.f32 %v6309_v30, 0.0 }
 0x232   :  { %v2927_v41 = vmax.f32 %v2917_v47, 0.0 }
 0x233   :  { %3439 = vst [vmem:[#allocation6 + $0x10] sm:$0xff] %v3431_v24  ;;  %v3101_v60 = vmax.f32 %v2934_v26, %v3093_v7  ;;  %v2761_v24 = vmax.f32 %v2593_v10, %v2753_v44 }
 0x234   :  { %v3242_v32 = vpop.f32.mrf.mxu2  ;;  %v3084_v42 = vpop.f32.mrf.mxu1 }
 0x235   :  { %v3258_v18 = vmax.f32 %v3242_v32, 0.0  ;;  %v2935_v19 = vmax.f32 %v2761_v24, %v2927_v41  ;;  %v3094_v37 = vmax.f32 %v3084_v42, 0.0 }
 0x236   :  { %v3406_v5 = vpop.f32.mrf.mxu3 }
 0x237   :  { %v3424_v39 = vmax.f32 %v3406_v5, 0.0  ;;  %v3266_v35 = vmax.f32 %v3099_v56, %v3258_v18 }
 0x239   :  { %v3432_v29 = vmax.f32 %v3265_v4, %v3424_v39  ;;  %v3102_v4 = vmax.f32 %v2935_v19, %v3094_v37 }
 0x23b   :  { %3440 = vst [vmem:[#allocation6 + $0x18] sm:$0xff] %v3432_v29 }
 0x23c   :  { %v3245_v23 = vpop.f32.mrf.mxu2 }
 0x23d   :  { %v3259_v46 = vmax.f32 %v3245_v23, 0.0 }
 0x23e   :  { %v3409_v62 = vpop.f32.mrf.mxu3 }
 0x23f   :  { %v3425_v6 = vmax.f32 %v3409_v62, 0.0  ;;  %v3267_v15 = vmax.f32 %v3100_v21, %v3259_v46 }
 0x241   :  { %v3433_v11 = vmax.f32 %v3266_v35, %v3425_v6 }
 0x243   :  { %3441 = vst [vmem:[#allocation6 + $0x20] sm:$0xff] %v3433_v11 }
 0x244   :  { %v3248_v58 = vpop.f32.mrf.mxu2 }
 0x245   :  { %v3260_v51 = vmax.f32 %v3248_v58, 0.0 }
 0x246   :  { %v3412_v20 = vpop.f32.mrf.mxu3 }
 0x247   :  { %v3426_v45 = vmax.f32 %v3412_v20, 0.0  ;;  %v3268_v59 = vmax.f32 %v3101_v60, %v3260_v51 }
 0x249   :  { %v3434_v54 = vmax.f32 %v3267_v15, %v3426_v45 }
 0x24b   :  { %3442 = vst [vmem:[#allocation6 + $0x28] sm:$0xff] %v3434_v54 }
 0x24c   :  { %v3251_v17 = vpop.f32.mrf.mxu2 }
 0x24d   :  { %v3261_v22 = vmax.f32 %v3251_v17, 0.0 }
 0x24e   :  { %v3415_v28 = vpop.f32.mrf.mxu3 }
 0x24f   :  { %v3427_v57 = vmax.f32 %v3415_v28, 0.0  ;;  %v3269_v32 = vmax.f32 %v3102_v4, %v3261_v22 }
 0x251   :  { %v3435_v27 = vmax.f32 %v3268_v59, %v3427_v57 }
 0x253   :  { %3443 = vst [vmem:[#allocation6 + $0x30] sm:$0xff] %v3435_v27 }
 0x256   :  { %v3418_v30 = vpop.f32.mrf.mxu3 }
 0x257   :  { %v3428_v12 = vmax.f32 %v3418_v30, 0.0 }
 0x259   :  { %v3436_v5 = vmax.f32 %v3269_v32, %v3428_v12 }
 0x25b   :  { %3444 = vst [vmem:[#allocation6 + $0x38] sm:$0xff] %v3436_v5 }
 0x25c   :  { %3457 = dma.vmem_to_hbm [thread:$0]  %s3450_s21, 1024, %s3452_s24, [#allocation5], %s3842_s25, %s3842_s25, %s3843_s26  }
 0x25d   :  { %3836 = dma.done.wait [#allocation5], 1024  }
 0x25e   :  { %3837 = vsyncadd [#allocation5], 4294966272 }
 0x25f   :  { %3462 = vsyncpa [#allocation4], 1 }
 0x260   :  { %3463 = vsyncpa [#allocation5], 1 }

</bundles_post_ra>
